<compile_context>
chip_gen: v6e
topology: v6e:2x2x1
jax: 0.10.0
libtpu: 0.0.40
codegen_flags: <defaults>
</compile_context>

<pallas_src>
import functools

import jax
import jax.numpy as jnp
from jax import lax
from jax.experimental import pallas as pl
from jax.experimental.pallas import tpu as pltpu

DIM = 32
EPS = 1e-6
LANE = 128
PRECISION = lax.Precision.HIGHEST  # reference path only


def _gelu_exact(x):
    # erf via Abramowitz & Stegun 7.1.26 (|err| < 1.5e-7), matching PyTorch's
    # exact nn.GELU to f32 precision.  Rewritten without sign/select:
    #   0.5*x*(1 + sign(x)*(1-q)) == 0.5*(x + |x| - |x|*q),  q = poly*exp(-z^2)
    a1, a2, a3, a4, a5 = (0.254829592, -0.284496736, 1.421413741,
                          -1.453152027, 1.061405429)
    p = 0.3275911
    ax = jnp.abs(x)
    z = ax * 0.7071067811865476
    d = 1.0 + p * z
    r = pl.reciprocal(d, approx=True)
    t = r * (2.0 - d * r)                      # one Newton refinement
    poly = ((((a5 * t + a4) * t + a3) * t + a2) * t + a1) * t
    q = poly * jnp.exp(-z * z)                 # 1 - erf(z) for z >= 0
    return 0.5 * (x + ax - ax * q)


def _stack_lane_blocks(v, nb):
    """(rows, nb*128) -> (nb*rows, 128): 128-lane groups stacked along rows."""
    if nb == 1:
        return v
    return jnp.concatenate([v[:, g * LANE:(g + 1) * LANE] for g in range(nb)],
                           axis=0)


def _unstack_lane_blocks(p, nb, rows):
    """(nb*rows, 128) -> (rows, nb*128): inverse of _stack_lane_blocks."""
    if nb == 1:
        return p
    return jnp.concatenate([p[g * rows:(g + 1) * rows, :] for g in range(nb)],
                           axis=1)


def refine_block_kernel(x_ref, mats_ref, w_in2_ref, vecs_ref, shift_ref,
                        wtap_ref, o_ref, sdy_ref, fea1_ref, *, c_dim):
    rows, wc = x_ref.shape                      # (H, W*C): one image per step
    nb = wc // LANE

    a_avg = mats_ref[0]                         # block-diag 1/C averaging
    w_out = mats_ref[1]                         # block-diag out_conv weights
    w_in2 = w_in2_ref[...]                      # (128, 256) fused in/1x1 conv

    b_fea, b_fea1 = vecs_ref[0], vecs_ref[1]    # (W*C,) lane-tiled biases
    b_23, b_out = vecs_ref[2], vecs_ref[3]

    x = x_ref[...]

    # ---- LayerNorm2d stats: ONE fused block-diag matmul gives E[x], E[x^2] --
    xs = _stack_lane_blocks(x, nb)                                # (nb*rows,128)
    stats = jnp.dot(jnp.concatenate([xs, xs * xs], axis=0), a_avg,
                    preferred_element_type=jnp.float32)
    mu = _unstack_lane_blocks(stats[:nb * rows], nb, rows)
    ex2 = _unstack_lane_blocks(stats[nb * rows:], nb, rows)
    var = jnp.maximum(ex2 - mu * mu, 0.0)
    # gamma/beta are folded into the input-conv weights/bias at pack time.
    y = (x - mu) * lax.rsqrt(var + EPS)

    # ---- input_conv + conv1x1 from one (., 128) @ (128, 256) MXU matmul -----
    ys = _stack_lane_blocks(y, nb)
    ff = jnp.dot(ys, w_in2, preferred_element_type=jnp.float32)   # (nb*rows,256)
    fea = _unstack_lane_blocks(ff[:, :LANE], nb, rows) + b_fea
    # Park fea1 in VMEM so it is not live across the tap loop (v5e spills).
    fea1_ref[...] = _unstack_lane_blocks(ff[:, LANE:], nb, rows) + b_fea1

    # ---- merged 3x3+5x5 depthwise conv: 4 lane rolls + 25 FMAs + 1 matmul ---
    # dx taps: static lane rolls of fea (edge mask is folded into wtap, and it
    # commutes with the dy row shift, so rolling fea instead of the shifted
    # slabs is exact).
    rolls = []
    for dx in (-2, -1, 0, 1, 2):
        if dx == 0:
            rolls.append(fea)
        else:
            rolls.append(pltpu.roll(fea, shift=(-dx * c_dim) % wc, axis=1))

    fea23 = None
    for j, dy in enumerate((-2, -1, 0, 1, 2)):
        s = None
        for i in range(5):
            w = wtap_ref[j * 5 + i]             # (W*C,) masked tap weights
            term = rolls[i] * w
            s = term if s is None else s + term
        if dy == 0:
            fea23 = s
        else:
            blk = j if j < 2 else j - 1         # slab order: dy = -2,-1,+1,+2
            sdy_ref[pl.ds(blk * rows, rows), :] = s

    # All four dy != 0 row shifts (zero-padded at image edges) in one matmul.
    fea23 = fea23 + jnp.dot(shift_ref[...], sdy_ref[...],
                            preferred_element_type=jnp.float32) + b_23

    # ---- gating, GELU, out_conv (1x1), residual ------------------------------
    g = _gelu_exact(fea1_ref[...] * fea23)
    gs = _stack_lane_blocks(g, nb)
    out = _unstack_lane_blocks(
        jnp.dot(gs, w_out, preferred_element_type=jnp.float32), nb, rows)
    o_ref[...] = out + b_out + x_ref[...]


def _pack_params(p, H, W, C):
    n_copies = LANE // C
    eye = jnp.eye(n_copies, dtype=jnp.float32)

    gamma = p["ln_w"].reshape(C)
    beta = p["ln_b"].reshape(C)

    a_avg = jnp.kron(eye, jnp.full((C, C), 1.0 / C, jnp.float32))
    w_out_bd = jnp.kron(eye, p["w_out"])
    mats = jnp.stack([a_avg, w_out_bd])                            # (2,128,128)

    # LayerNorm affine folded into the input conv; conv1x1 chained at pack time:
    #   fea  = y_norm @ (diag(gamma) W_in)        + (beta W_in + b_in)
    #   fea1 = y_norm @ (diag(gamma) W_in W_1)    + (beta W_in + b_in) W_1 + b_1
    w_in_g = gamma[:, None] * p["w_in"]
    w_in1_g = w_in_g @ p["w1"]
    w_in2 = jnp.concatenate([jnp.kron(eye, w_in_g),
                             jnp.kron(eye, w_in1_g)], axis=1)      # (128,256)

    b_fea = beta @ p["w_in"] + p["b_in"].reshape(C)
    b_fea1 = b_fea @ p["w1"] + p["b1"].reshape(C)

    def lane_tile(v):
        return jnp.tile(jnp.reshape(v, (C,)), (W,))                # (W*C,)

    vecs = jnp.stack([lane_tile(b_fea), lane_tile(b_fea1),
                      lane_tile(p["b3"] + p["b5"]), lane_tile(p["b_out"])])

    # Merged 3x3 + 5x5 depthwise weights with the dx edge mask folded in.
    w_merged = (p["w5"].reshape(5, 5, C)
                + jnp.pad(p["w3"].reshape(3, 3, C), ((1, 1), (1, 1), (0, 0))))
    w_pos = jnp.arange(W)
    taps = []
    for j in range(5):
        for i in range(5):
            dx = i - 2
            ok = ((w_pos + dx >= 0) & (w_pos + dx < W)).astype(jnp.float32)
            taps.append(jnp.repeat(ok, C) * jnp.tile(w_merged[j, i], (W,)))
    wtap = jnp.stack(taps)                                         # (25, W*C)

    # Row-shift matrix (H, 4H): horizontal blocks for dy in (-2,-1,+1,+2);
    # (shift @ [S_-2; S_-1; S_+1; S_+2])[r] = sum_dy S_dy[r + dy], zero-padded.
    r = jnp.arange(H)
    blocks = []
    for dy in (-2, -1, 1, 2):
        src = r + dy
        ok = (src >= 0) & (src < H)
        blk = ok[:, None] & (jnp.arange(H)[None, :]
                             == jnp.clip(src, 0, H - 1)[:, None])
        blocks.append(blk.astype(jnp.float32))
    shift = jnp.concatenate(blocks, axis=1)                        # (H, 4H)
    return mats, w_in2, vecs, shift, wtap


def refine_block(x_nhwc, params):
    N, H, W, C = x_nhwc.shape
    WC = W * C
    assert WC % LANE == 0 and LANE % C == 0, "need W*C % 128 == 0 and 128 % C == 0"
    assert H % 8 == 0, "need H % 8 == 0 for (8,128) sublane tiling"

    # VMEM guard: ~10 live slabs of H*WC*4 B per step plus 2x-buffered I/O.
    # TODO(synk): split the grid along H (with a 2-row halo in the shift matrix)
    # before this approaches v7x's 32 MiB scoped VMEM at larger H/W.
    assert 14 * H * WC * 4 < 24 * 1024 * 1024, "tile H before scaling this up"

    mats, w_in2, vecs, shift, wtap = _pack_params(params, H, W, C)
    x2 = x_nhwc.reshape(N * H, WC)              # lane-dense (rows, W*C) slab

    kernel = functools.partial(refine_block_kernel, c_dim=C)
    out = pl.pallas_call(
        kernel,
        out_shape=jax.ShapeDtypeStruct((N * H, WC), jnp.float32),
        grid_spec=pltpu.PrefetchScalarGridSpec(
            num_scalar_prefetch=0,
            grid=(N,),                          # >=2 parallel steps for v7x
            in_specs=[
                pl.BlockSpec((H, WC), lambda n: (n, 0)),
                pl.BlockSpec(mats.shape, lambda n: (0, 0, 0)),
                pl.BlockSpec(w_in2.shape, lambda n: (0, 0)),
                pl.BlockSpec(vecs.shape, lambda n: (0, 0)),
                pl.BlockSpec(shift.shape, lambda n: (0, 0)),
                pl.BlockSpec(wtap.shape, lambda n: (0, 0)),
            ],
            out_specs=pl.BlockSpec((H, WC), lambda n: (n, 0)),
            scratch_shapes=[
                pltpu.VMEM((4 * H, WC), jnp.float32),   # S_dy slabs (dy != 0)
                pltpu.VMEM((H, WC), jnp.float32),       # parked fea1
            ]),
        compiler_params=pltpu.CompilerParams(
            dimension_semantics=("parallel",)),
    )(x2, mats, w_in2, vecs, shift, wtap)
    return out.reshape(N, H, W, C)


def init_params(key, dim=DIM):
    ks = jax.random.split(key, 10)

    def w(k, shape, scale):
        return jax.random.normal(k, shape, jnp.float32) * scale

    # 1x1 conv weights are stored as (C_in, C_out) so the math is x @ W.
    return dict(
        ln_w=jnp.ones((1, dim), jnp.float32),
        ln_b=jnp.zeros((1, dim), jnp.float32),
        w_in=w(ks[0], (dim, dim), 0.1),  b_in=w(ks[1], (1, dim), 0.05),
        w1=w(ks[2], (dim, dim), 0.1),    b1=w(ks[3], (1, dim), 0.05),
        w3=w(ks[4], (9, dim), 0.1),      b3=w(ks[5], (1, dim), 0.05),
        w5=w(ks[6], (25, dim), 0.05),    b5=w(ks[7], (1, dim), 0.05),
        w_out=w(ks[8], (dim, dim), 0.1), b_out=w(ks[9], (1, dim), 0.05),
    )


def ref_forward(x_nhwc, p):
    # Pure-JAX reference mirroring the PyTorch forward (NHWC layout).
    C = x_nhwc.shape[-1]
    mu = x_nhwc.mean(-1, keepdims=True)
    var = ((x_nhwc - mu) ** 2).mean(-1, keepdims=True)
    y = (x_nhwc - mu) / jnp.sqrt(var + EPS)
    y = y * p["ln_w"].reshape(1, 1, 1, C) + p["ln_b"].reshape(1, 1, 1, C)
    fea = jnp.einsum("nhwc,cd->nhwd", y, p["w_in"],
                     precision=PRECISION) + p["b_in"].reshape(1, 1, 1, C)
    fea1 = jnp.einsum("nhwc,cd->nhwd", fea, p["w1"],
                      precision=PRECISION) + p["b1"].reshape(1, 1, 1, C)
    k3 = p["w3"].reshape(3, 3, 1, C)
    fea2 = lax.conv_general_dilated(
        fea, k3, (1, 1), "SAME",
        dimension_numbers=("NHWC", "HWIO", "NHWC"),
        feature_group_count=C, precision=PRECISION) + p["b3"].reshape(1, 1, 1, C)
    k5 = p["w5"].reshape(5, 5, 1, C)
    fea3 = lax.conv_general_dilated(
        fea, k5, (1, 1), "SAME",
        dimension_numbers=("NHWC", "HWIO", "NHWC"),
        feature_group_count=C, precision=PRECISION) + p["b5"].reshape(1, 1, 1, C)
    mix = fea1 * (fea2 + fea3)
    g = jax.nn.gelu(mix, approximate=False)
    out = jnp.einsum("nhwc,cd->nhwd", g, p["w_out"],
                     precision=PRECISION) + p["b_out"].reshape(1, 1, 1, C)
    return out + x_nhwc


if __name__ == "__main__":
    key = jax.random.PRNGKey(0)
    k_x, k_p = jax.random.split(key)

    # PyTorch-style NCHW input: (N=2, C=32, H=16, W=16)
    x_nchw = jax.random.normal(k_x, (2, DIM, 16, 16), jnp.float32)
    x_nhwc = jnp.transpose(x_nchw, (0, 2, 3, 1))

    params = init_params(k_p)

    out = jax.block_until_ready(refine_block(x_nhwc, params))
    ref = jax.block_until_ready(ref_forward(x_nhwc, params))

    max_diff = float(jnp.max(jnp.abs(out - ref)))
    assert max_diff < 2e-3, f"mismatch vs reference: {max_diff}"

    print("KERNEL_OK")
</pallas_src>

<mosaic_0001>
module attributes {stable_mosaic.version = 11 : i64} {
  func.func @refine_block_kernel(%arg0: i32, %arg1: memref<16x512xf32, #tpu.memory_space<vmem>>, %arg2: memref<2x128x128xf32, #tpu.memory_space<vmem>>, %arg3: memref<128x256xf32, #tpu.memory_space<vmem>>, %arg4: memref<4x512xf32, #tpu.memory_space<vmem>>, %arg5: memref<16x64xf32, #tpu.memory_space<vmem>>, %arg6: memref<25x512xf32, #tpu.memory_space<vmem>>, %arg7: memref<16x512xf32, #tpu.memory_space<vmem>>, %arg8: memref<64x512xf32, #tpu.memory_space<vmem>>, %arg9: memref<16x512xf32, #tpu.memory_space<vmem>>) attributes {dimension_semantics = [#tpu.dimension_semantics<parallel>], iteration_bounds = array<i64: 2>, scalar_prefetch = 0 : i64, scratch_operands = 2 : i64, tpu.core_type = #tpu.core_type<tc>, window_params = [{transform_indices = @transform_0, window_bounds = array<i64: 16, 512>}, {pipeline_mode = #tpu.pipeline_mode<synchronous>, transform_indices = @transform_1, window_bounds = array<i64: 2, 128, 128>}, {pipeline_mode = #tpu.pipeline_mode<synchronous>, transform_indices = @transform_2, window_bounds = array<i64: 128, 256>}, {pipeline_mode = #tpu.pipeline_mode<synchronous>, transform_indices = @transform_3, window_bounds = array<i64: 4, 512>}, {pipeline_mode = #tpu.pipeline_mode<synchronous>, transform_indices = @transform_4, window_bounds = array<i64: 16, 64>}, {pipeline_mode = #tpu.pipeline_mode<synchronous>, transform_indices = @transform_5, window_bounds = array<i64: 25, 512>}, {transform_indices = @transform_6, window_bounds = array<i64: 16, 512>}]} {
    %c0 = arith.constant 0 : index
    %c0_0 = arith.constant 0 : index
    %c0_1 = arith.constant 0 : index
    %0 = vector.load %arg2[%c0, %c0_0, %c0_1] : memref<2x128x128xf32, #tpu.memory_space<vmem>>, vector<1x128x128xf32>
    %1 = vector.shape_cast %0 : vector<1x128x128xf32> to vector<128x128xf32>
    %c1 = arith.constant 1 : index
    %c0_2 = arith.constant 0 : index
    %c0_3 = arith.constant 0 : index
    %2 = vector.load %arg2[%c1, %c0_2, %c0_3] : memref<2x128x128xf32, #tpu.memory_space<vmem>>, vector<1x128x128xf32>
    %3 = vector.shape_cast %2 : vector<1x128x128xf32> to vector<128x128xf32>
    %c0_4 = arith.constant 0 : index
    %c0_5 = arith.constant 0 : index
    %4 = vector.load %arg3[%c0_4, %c0_5] : memref<128x256xf32, #tpu.memory_space<vmem>>, vector<128x256xf32>
    %c0_6 = arith.constant 0 : index
    %c0_7 = arith.constant 0 : index
    %5 = vector.load %arg4[%c0_6, %c0_7] : memref<4x512xf32, #tpu.memory_space<vmem>>, vector<1x512xf32>
    %6 = vector.shape_cast %5 : vector<1x512xf32> to vector<512xf32>
    %c1_8 = arith.constant 1 : index
    %c0_9 = arith.constant 0 : index
    %7 = vector.load %arg4[%c1_8, %c0_9] : memref<4x512xf32, #tpu.memory_space<vmem>>, vector<1x512xf32>
    %8 = vector.shape_cast %7 : vector<1x512xf32> to vector<512xf32>
    %c2 = arith.constant 2 : index
    %c0_10 = arith.constant 0 : index
    %9 = vector.load %arg4[%c2, %c0_10] : memref<4x512xf32, #tpu.memory_space<vmem>>, vector<1x512xf32>
    %10 = vector.shape_cast %9 : vector<1x512xf32> to vector<512xf32>
    %c3 = arith.constant 3 : index
    %c0_11 = arith.constant 0 : index
    %11 = vector.load %arg4[%c3, %c0_11] : memref<4x512xf32, #tpu.memory_space<vmem>>, vector<1x512xf32>
    %12 = vector.shape_cast %11 : vector<1x512xf32> to vector<512xf32>
    %c0_12 = arith.constant 0 : index
    %c0_13 = arith.constant 0 : index
    %13 = vector.load %arg1[%c0_12, %c0_13] : memref<16x512xf32, #tpu.memory_space<vmem>>, vector<16x512xf32>
    %14 = vector.extract_strided_slice %13 {offsets = [0, 0], sizes = [16, 128], strides = [1, 1]} : vector<16x512xf32> to vector<16x128xf32>
    %15 = vector.extract_strided_slice %13 {offsets = [0, 128], sizes = [16, 128], strides = [1, 1]} : vector<16x512xf32> to vector<16x128xf32>
    %16 = vector.extract_strided_slice %13 {offsets = [0, 256], sizes = [16, 128], strides = [1, 1]} : vector<16x512xf32> to vector<16x128xf32>
    %17 = vector.extract_strided_slice %13 {offsets = [0, 384], sizes = [16, 128], strides = [1, 1]} : vector<16x512xf32> to vector<16x128xf32>
    %18 = tpu.concatenate %14, %15, %16, %17 in 0 : vector<16x128xf32>, vector<16x128xf32>, vector<16x128xf32>, vector<16x128xf32> -> vector<64x128xf32>
    %19 = arith.mulf %18, %18 : vector<64x128xf32>
    %20 = tpu.concatenate %18, %19 in 0 : vector<64x128xf32>, vector<64x128xf32> -> vector<128x128xf32>
    %cst = arith.constant dense<0.000000e+00> : vector<128x128xf32>
    %21 = tpu.matmul %20, %1, %cst {dimension_numbers = #tpu.dot_dimension_numbers<[1], [0], [0], [1], [0, 0, 1, 1], [], []>} : vector<128x128xf32>, vector<128x128xf32>, vector<128x128xf32> -> vector<128x128xf32>
    %22 = vector.extract_strided_slice %21 {offsets = [0, 0], sizes = [64, 128], strides = [1, 1]} : vector<128x128xf32> to vector<64x128xf32>
    %23 = vector.extract_strided_slice %22 {offsets = [0, 0], sizes = [16, 128], strides = [1, 1]} : vector<64x128xf32> to vector<16x128xf32>
    %24 = vector.extract_strided_slice %22 {offsets = [16, 0], sizes = [16, 128], strides = [1, 1]} : vector<64x128xf32> to vector<16x128xf32>
    %25 = vector.extract_strided_slice %22 {offsets = [32, 0], sizes = [16, 128], strides = [1, 1]} : vector<64x128xf32> to vector<16x128xf32>
    %26 = vector.extract_strided_slice %22 {offsets = [48, 0], sizes = [16, 128], strides = [1, 1]} : vector<64x128xf32> to vector<16x128xf32>
    %27 = tpu.concatenate %23, %24, %25, %26 in 1 : vector<16x128xf32>, vector<16x128xf32>, vector<16x128xf32>, vector<16x128xf32> -> vector<16x512xf32>
    %28 = vector.extract_strided_slice %21 {offsets = [64, 0], sizes = [64, 128], strides = [1, 1]} : vector<128x128xf32> to vector<64x128xf32>
    %29 = vector.extract_strided_slice %28 {offsets = [0, 0], sizes = [16, 128], strides = [1, 1]} : vector<64x128xf32> to vector<16x128xf32>
    %30 = vector.extract_strided_slice %28 {offsets = [16, 0], sizes = [16, 128], strides = [1, 1]} : vector<64x128xf32> to vector<16x128xf32>
    %31 = vector.extract_strided_slice %28 {offsets = [32, 0], sizes = [16, 128], strides = [1, 1]} : vector<64x128xf32> to vector<16x128xf32>
    %32 = vector.extract_strided_slice %28 {offsets = [48, 0], sizes = [16, 128], strides = [1, 1]} : vector<64x128xf32> to vector<16x128xf32>
    %33 = tpu.concatenate %29, %30, %31, %32 in 1 : vector<16x128xf32>, vector<16x128xf32>, vector<16x128xf32>, vector<16x128xf32> -> vector<16x512xf32>
    %34 = arith.mulf %27, %27 : vector<16x512xf32>
    %35 = arith.subf %33, %34 : vector<16x512xf32>
    %cst_14 = arith.constant 0.000000e+00 : f32
    %36 = vector.broadcast %cst_14 : f32 to vector<16x512xf32>
    %37 = arith.maximumf %35, %36 : vector<16x512xf32>
    %38 = arith.subf %13, %27 : vector<16x512xf32>
    %cst_15 = arith.constant 9.99999997E-7 : f32
    %39 = vector.broadcast %cst_15 : f32 to vector<16x512xf32>
    %40 = arith.addf %37, %39 : vector<16x512xf32>
    %41 = math.rsqrt %40 : vector<16x512xf32>
    %42 = arith.mulf %38, %41 : vector<16x512xf32>
    %43 = vector.extract_strided_slice %42 {offsets = [0, 0], sizes = [16, 128], strides = [1, 1]} : vector<16x512xf32> to vector<16x128xf32>
    %44 = vector.extract_strided_slice %42 {offsets = [0, 128], sizes = [16, 128], strides = [1, 1]} : vector<16x512xf32> to vector<16x128xf32>
    %45 = vector.extract_strided_slice %42 {offsets = [0, 256], sizes = [16, 128], strides = [1, 1]} : vector<16x512xf32> to vector<16x128xf32>
    %46 = vector.extract_strided_slice %42 {offsets = [0, 384], sizes = [16, 128], strides = [1, 1]} : vector<16x512xf32> to vector<16x128xf32>
    %47 = tpu.concatenate %43, %44, %45, %46 in 0 : vector<16x128xf32>, vector<16x128xf32>, vector<16x128xf32>, vector<16x128xf32> -> vector<64x128xf32>
    %cst_16 = arith.constant dense<0.000000e+00> : vector<64x256xf32>
    %48 = tpu.matmul %47, %4, %cst_16 {dimension_numbers = #tpu.dot_dimension_numbers<[1], [0], [0], [1], [0, 0, 1, 1], [], []>} : vector<64x128xf32>, vector<128x256xf32>, vector<64x256xf32> -> vector<64x256xf32>
    %49 = vector.extract_strided_slice %48 {offsets = [0, 0], sizes = [64, 128], strides = [1, 1]} : vector<64x256xf32> to vector<64x128xf32>
    %50 = vector.extract_strided_slice %49 {offsets = [0, 0], sizes = [16, 128], strides = [1, 1]} : vector<64x128xf32> to vector<16x128xf32>
    %51 = vector.extract_strided_slice %49 {offsets = [16, 0], sizes = [16, 128], strides = [1, 1]} : vector<64x128xf32> to vector<16x128xf32>
    %52 = vector.extract_strided_slice %49 {offsets = [32, 0], sizes = [16, 128], strides = [1, 1]} : vector<64x128xf32> to vector<16x128xf32>
    %53 = vector.extract_strided_slice %49 {offsets = [48, 0], sizes = [16, 128], strides = [1, 1]} : vector<64x128xf32> to vector<16x128xf32>
    %54 = tpu.concatenate %50, %51, %52, %53 in 1 : vector<16x128xf32>, vector<16x128xf32>, vector<16x128xf32>, vector<16x128xf32> -> vector<16x512xf32>
    %55 = vector.shape_cast %6 : vector<512xf32> to vector<1x512xf32>
    %56 = vector.broadcast %55 : vector<1x512xf32> to vector<16x512xf32>
    %57 = arith.addf %54, %56 : vector<16x512xf32>
    %58 = vector.extract_strided_slice %48 {offsets = [0, 128], sizes = [64, 128], strides = [1, 1]} : vector<64x256xf32> to vector<64x128xf32>
    %59 = vector.extract_strided_slice %58 {offsets = [0, 0], sizes = [16, 128], strides = [1, 1]} : vector<64x128xf32> to vector<16x128xf32>
    %60 = vector.extract_strided_slice %58 {offsets = [16, 0], sizes = [16, 128], strides = [1, 1]} : vector<64x128xf32> to vector<16x128xf32>
    %61 = vector.extract_strided_slice %58 {offsets = [32, 0], sizes = [16, 128], strides = [1, 1]} : vector<64x128xf32> to vector<16x128xf32>
    %62 = vector.extract_strided_slice %58 {offsets = [48, 0], sizes = [16, 128], strides = [1, 1]} : vector<64x128xf32> to vector<16x128xf32>
    %63 = tpu.concatenate %59, %60, %61, %62 in 1 : vector<16x128xf32>, vector<16x128xf32>, vector<16x128xf32>, vector<16x128xf32> -> vector<16x512xf32>
    %64 = vector.shape_cast %8 : vector<512xf32> to vector<1x512xf32>
    %65 = vector.broadcast %64 : vector<1x512xf32> to vector<16x512xf32>
    %66 = arith.addf %63, %65 : vector<16x512xf32>
    %c0_17 = arith.constant 0 : index
    %c0_18 = arith.constant 0 : index
    %67 = vector.load %arg9[%c0_17, %c0_18] : memref<16x512xf32, #tpu.memory_space<vmem>>, vector<16x512xf32>
    tpu.vector_store %arg9[%c0_17, %c0_18], %66 {strides = array<i32>} : memref<16x512xf32, #tpu.memory_space<vmem>>, vector<16x512xf32>,
    %c64_i32 = arith.constant 64 : i32
    %68 = tpu.dynamic_rotate %57 by %c64_i32 dim 1 : vector<16x512xf32>, i32 -> vector<16x512xf32>
    %c32_i32 = arith.constant 32 : i32
    %69 = tpu.dynamic_rotate %57 by %c32_i32 dim 1 : vector<16x512xf32>, i32 -> vector<16x512xf32>
    %c480_i32 = arith.constant 480 : i32
    %70 = tpu.dynamic_rotate %57 by %c480_i32 dim 1 : vector<16x512xf32>, i32 -> vector<16x512xf32>
    %c448_i32 = arith.constant 448 : i32
    %71 = tpu.dynamic_rotate %57 by %c448_i32 dim 1 : vector<16x512xf32>, i32 -> vector<16x512xf32>
    %c0_19 = arith.constant 0 : index
    %c0_20 = arith.constant 0 : index
    %72 = vector.load %arg6[%c0_19, %c0_20] : memref<25x512xf32, #tpu.memory_space<vmem>>, vector<1x512xf32>
    %73 = vector.shape_cast %72 : vector<1x512xf32> to vector<512xf32>
    %74 = vector.shape_cast %73 : vector<512xf32> to vector<1x512xf32>
    %75 = vector.broadcast %74 : vector<1x512xf32> to vector<16x512xf32>
    %76 = arith.mulf %68, %75 : vector<16x512xf32>
    %c1_21 = arith.constant 1 : index
    %c0_22 = arith.constant 0 : index
    %77 = vector.load %arg6[%c1_21, %c0_22] : memref<25x512xf32, #tpu.memory_space<vmem>>, vector<1x512xf32>
    %78 = vector.shape_cast %77 : vector<1x512xf32> to vector<512xf32>
    %79 = vector.shape_cast %78 : vector<512xf32> to vector<1x512xf32>
    %80 = vector.broadcast %79 : vector<1x512xf32> to vector<16x512xf32>
    %81 = arith.mulf %69, %80 : vector<16x512xf32>
    %82 = arith.addf %76, %81 : vector<16x512xf32>
    %c2_23 = arith.constant 2 : index
    %c0_24 = arith.constant 0 : index
    %83 = vector.load %arg6[%c2_23, %c0_24] : memref<25x512xf32, #tpu.memory_space<vmem>>, vector<1x512xf32>
    %84 = vector.shape_cast %83 : vector<1x512xf32> to vector<512xf32>
    %85 = vector.shape_cast %84 : vector<512xf32> to vector<1x512xf32>
    %86 = vector.broadcast %85 : vector<1x512xf32> to vector<16x512xf32>
    %87 = arith.mulf %57, %86 : vector<16x512xf32>
    %88 = arith.addf %82, %87 : vector<16x512xf32>
    %c3_25 = arith.constant 3 : index
    %c0_26 = arith.constant 0 : index
    %89 = vector.load %arg6[%c3_25, %c0_26] : memref<25x512xf32, #tpu.memory_space<vmem>>, vector<1x512xf32>
    %90 = vector.shape_cast %89 : vector<1x512xf32> to vector<512xf32>
    %91 = vector.shape_cast %90 : vector<512xf32> to vector<1x512xf32>
    %92 = vector.broadcast %91 : vector<1x512xf32> to vector<16x512xf32>
    %93 = arith.mulf %70, %92 : vector<16x512xf32>
    %94 = arith.addf %88, %93 : vector<16x512xf32>
    %c4 = arith.constant 4 : index
    %c0_27 = arith.constant 0 : index
    %95 = vector.load %arg6[%c4, %c0_27] : memref<25x512xf32, #tpu.memory_space<vmem>>, vector<1x512xf32>
    %96 = vector.shape_cast %95 : vector<1x512xf32> to vector<512xf32>
    %97 = vector.shape_cast %96 : vector<512xf32> to vector<1x512xf32>
    %98 = vector.broadcast %97 : vector<1x512xf32> to vector<16x512xf32>
    %99 = arith.mulf %71, %98 : vector<16x512xf32>
    %100 = arith.addf %94, %99 : vector<16x512xf32>
    %c0_28 = arith.constant 0 : index
    %c0_29 = arith.constant 0 : index
    %101 = vector.load %arg8[%c0_28, %c0_29] : memref<64x512xf32, #tpu.memory_space<vmem>>, vector<16x512xf32>
    tpu.vector_store %arg8[%c0_28, %c0_29], %100 {strides = array<i32>} : memref<64x512xf32, #tpu.memory_space<vmem>>, vector<16x512xf32>,
    %c5 = arith.constant 5 : index
    %c0_30 = arith.constant 0 : index
    %102 = vector.load %arg6[%c5, %c0_30] : memref<25x512xf32, #tpu.memory_space<vmem>>, vector<1x512xf32>
    %103 = vector.shape_cast %102 : vector<1x512xf32> to vector<512xf32>
    %104 = vector.shape_cast %103 : vector<512xf32> to vector<1x512xf32>
    %105 = vector.broadcast %104 : vector<1x512xf32> to vector<16x512xf32>
    %106 = arith.mulf %68, %105 : vector<16x512xf32>
    %c6 = arith.constant 6 : index
    %c0_31 = arith.constant 0 : index
    %107 = vector.load %arg6[%c6, %c0_31] : memref<25x512xf32, #tpu.memory_space<vmem>>, vector<1x512xf32>
    %108 = vector.shape_cast %107 : vector<1x512xf32> to vector<512xf32>
    %109 = vector.shape_cast %108 : vector<512xf32> to vector<1x512xf32>
    %110 = vector.broadcast %109 : vector<1x512xf32> to vector<16x512xf32>
    %111 = arith.mulf %69, %110 : vector<16x512xf32>
    %112 = arith.addf %106, %111 : vector<16x512xf32>
    %c7 = arith.constant 7 : index
    %c0_32 = arith.constant 0 : index
    %113 = vector.load %arg6[%c7, %c0_32] : memref<25x512xf32, #tpu.memory_space<vmem>>, vector<1x512xf32>
    %114 = vector.shape_cast %113 : vector<1x512xf32> to vector<512xf32>
    %115 = vector.shape_cast %114 : vector<512xf32> to vector<1x512xf32>
    %116 = vector.broadcast %115 : vector<1x512xf32> to vector<16x512xf32>
    %117 = arith.mulf %57, %116 : vector<16x512xf32>
    %118 = arith.addf %112, %117 : vector<16x512xf32>
    %c8 = arith.constant 8 : index
    %c0_33 = arith.constant 0 : index
    %119 = vector.load %arg6[%c8, %c0_33] : memref<25x512xf32, #tpu.memory_space<vmem>>, vector<1x512xf32>
    %120 = vector.shape_cast %119 : vector<1x512xf32> to vector<512xf32>
    %121 = vector.shape_cast %120 : vector<512xf32> to vector<1x512xf32>
    %122 = vector.broadcast %121 : vector<1x512xf32> to vector<16x512xf32>
    %123 = arith.mulf %70, %122 : vector<16x512xf32>
    %124 = arith.addf %118, %123 : vector<16x512xf32>
    %c9 = arith.constant 9 : index
    %c0_34 = arith.constant 0 : index
    %125 = vector.load %arg6[%c9, %c0_34] : memref<25x512xf32, #tpu.memory_space<vmem>>, vector<1x512xf32>
    %126 = vector.shape_cast %125 : vector<1x512xf32> to vector<512xf32>
    %127 = vector.shape_cast %126 : vector<512xf32> to vector<1x512xf32>
    %128 = vector.broadcast %127 : vector<1x512xf32> to vector<16x512xf32>
    %129 = arith.mulf %71, %128 : vector<16x512xf32>
    %130 = arith.addf %124, %129 : vector<16x512xf32>
    %c16 = arith.constant 16 : index
    %c0_35 = arith.constant 0 : index
    %131 = vector.load %arg8[%c16, %c0_35] : memref<64x512xf32, #tpu.memory_space<vmem>>, vector<16x512xf32>
    tpu.vector_store %arg8[%c16, %c0_35], %130 {strides = array<i32>} : memref<64x512xf32, #tpu.memory_space<vmem>>, vector<16x512xf32>,
    %c10 = arith.constant 10 : index
    %c0_36 = arith.constant 0 : index
    %132 = vector.load %arg6[%c10, %c0_36] : memref<25x512xf32, #tpu.memory_space<vmem>>, vector<1x512xf32>
    %133 = vector.shape_cast %132 : vector<1x512xf32> to vector<512xf32>
    %134 = vector.shape_cast %133 : vector<512xf32> to vector<1x512xf32>
    %135 = vector.broadcast %134 : vector<1x512xf32> to vector<16x512xf32>
    %136 = arith.mulf %68, %135 : vector<16x512xf32>
    %c11 = arith.constant 11 : index
    %c0_37 = arith.constant 0 : index
    %137 = vector.load %arg6[%c11, %c0_37] : memref<25x512xf32, #tpu.memory_space<vmem>>, vector<1x512xf32>
    %138 = vector.shape_cast %137 : vector<1x512xf32> to vector<512xf32>
    %139 = vector.shape_cast %138 : vector<512xf32> to vector<1x512xf32>
    %140 = vector.broadcast %139 : vector<1x512xf32> to vector<16x512xf32>
    %141 = arith.mulf %69, %140 : vector<16x512xf32>
    %142 = arith.addf %136, %141 : vector<16x512xf32>
    %c12 = arith.constant 12 : index
    %c0_38 = arith.constant 0 : index
    %143 = vector.load %arg6[%c12, %c0_38] : memref<25x512xf32, #tpu.memory_space<vmem>>, vector<1x512xf32>
    %144 = vector.shape_cast %143 : vector<1x512xf32> to vector<512xf32>
    %145 = vector.shape_cast %144 : vector<512xf32> to vector<1x512xf32>
    %146 = vector.broadcast %145 : vector<1x512xf32> to vector<16x512xf32>
    %147 = arith.mulf %57, %146 : vector<16x512xf32>
    %148 = arith.addf %142, %147 : vector<16x512xf32>
    %c13 = arith.constant 13 : index
    %c0_39 = arith.constant 0 : index
    %149 = vector.load %arg6[%c13, %c0_39] : memref<25x512xf32, #tpu.memory_space<vmem>>, vector<1x512xf32>
    %150 = vector.shape_cast %149 : vector<1x512xf32> to vector<512xf32>
    %151 = vector.shape_cast %150 : vector<512xf32> to vector<1x512xf32>
    %152 = vector.broadcast %151 : vector<1x512xf32> to vector<16x512xf32>
    %153 = arith.mulf %70, %152 : vector<16x512xf32>
    %154 = arith.addf %148, %153 : vector<16x512xf32>
    %c14 = arith.constant 14 : index
    %c0_40 = arith.constant 0 : index
    %155 = vector.load %arg6[%c14, %c0_40] : memref<25x512xf32, #tpu.memory_space<vmem>>, vector<1x512xf32>
    %156 = vector.shape_cast %155 : vector<1x512xf32> to vector<512xf32>
    %157 = vector.shape_cast %156 : vector<512xf32> to vector<1x512xf32>
    %158 = vector.broadcast %157 : vector<1x512xf32> to vector<16x512xf32>
    %159 = arith.mulf %71, %158 : vector<16x512xf32>
    %160 = arith.addf %154, %159 : vector<16x512xf32>
    %c15 = arith.constant 15 : index
    %c0_41 = arith.constant 0 : index
    %161 = vector.load %arg6[%c15, %c0_41] : memref<25x512xf32, #tpu.memory_space<vmem>>, vector<1x512xf32>
    %162 = vector.shape_cast %161 : vector<1x512xf32> to vector<512xf32>
    %163 = vector.shape_cast %162 : vector<512xf32> to vector<1x512xf32>
    %164 = vector.broadcast %163 : vector<1x512xf32> to vector<16x512xf32>
    %165 = arith.mulf %68, %164 : vector<16x512xf32>
    %c16_42 = arith.constant 16 : index
    %c0_43 = arith.constant 0 : index
    %166 = vector.load %arg6[%c16_42, %c0_43] : memref<25x512xf32, #tpu.memory_space<vmem>>, vector<1x512xf32>
    %167 = vector.shape_cast %166 : vector<1x512xf32> to vector<512xf32>
    %168 = vector.shape_cast %167 : vector<512xf32> to vector<1x512xf32>
    %169 = vector.broadcast %168 : vector<1x512xf32> to vector<16x512xf32>
    %170 = arith.mulf %69, %169 : vector<16x512xf32>
    %171 = arith.addf %165, %170 : vector<16x512xf32>
    %c17 = arith.constant 17 : index
    %c0_44 = arith.constant 0 : index
    %172 = vector.load %arg6[%c17, %c0_44] : memref<25x512xf32, #tpu.memory_space<vmem>>, vector<1x512xf32>
    %173 = vector.shape_cast %172 : vector<1x512xf32> to vector<512xf32>
    %174 = vector.shape_cast %173 : vector<512xf32> to vector<1x512xf32>
    %175 = vector.broadcast %174 : vector<1x512xf32> to vector<16x512xf32>
    %176 = arith.mulf %57, %175 : vector<16x512xf32>
    %177 = arith.addf %171, %176 : vector<16x512xf32>
    %c18 = arith.constant 18 : index
    %c0_45 = arith.constant 0 : index
    %178 = vector.load %arg6[%c18, %c0_45] : memref<25x512xf32, #tpu.memory_space<vmem>>, vector<1x512xf32>
    %179 = vector.shape_cast %178 : vector<1x512xf32> to vector<512xf32>
    %180 = vector.shape_cast %179 : vector<512xf32> to vector<1x512xf32>
    %181 = vector.broadcast %180 : vector<1x512xf32> to vector<16x512xf32>
    %182 = arith.mulf %70, %181 : vector<16x512xf32>
    %183 = arith.addf %177, %182 : vector<16x512xf32>
    %c19 = arith.constant 19 : index
    %c0_46 = arith.constant 0 : index
    %184 = vector.load %arg6[%c19, %c0_46] : memref<25x512xf32, #tpu.memory_space<vmem>>, vector<1x512xf32>
    %185 = vector.shape_cast %184 : vector<1x512xf32> to vector<512xf32>
    %186 = vector.shape_cast %185 : vector<512xf32> to vector<1x512xf32>
    %187 = vector.broadcast %186 : vector<1x512xf32> to vector<16x512xf32>
    %188 = arith.mulf %71, %187 : vector<16x512xf32>
    %189 = arith.addf %183, %188 : vector<16x512xf32>
    %c32 = arith.constant 32 : index
    %c0_47 = arith.constant 0 : index
    %190 = vector.load %arg8[%c32, %c0_47] : memref<64x512xf32, #tpu.memory_space<vmem>>, vector<16x512xf32>
    tpu.vector_store %arg8[%c32, %c0_47], %189 {strides = array<i32>} : memref<64x512xf32, #tpu.memory_space<vmem>>, vector<16x512xf32>,
    %c20 = arith.constant 20 : index
    %c0_48 = arith.constant 0 : index
    %191 = vector.load %arg6[%c20, %c0_48] : memref<25x512xf32, #tpu.memory_space<vmem>>, vector<1x512xf32>
    %192 = vector.shape_cast %191 : vector<1x512xf32> to vector<512xf32>
    %193 = vector.shape_cast %192 : vector<512xf32> to vector<1x512xf32>
    %194 = vector.broadcast %193 : vector<1x512xf32> to vector<16x512xf32>
    %195 = arith.mulf %68, %194 : vector<16x512xf32>
    %c21 = arith.constant 21 : index
    %c0_49 = arith.constant 0 : index
    %196 = vector.load %arg6[%c21, %c0_49] : memref<25x512xf32, #tpu.memory_space<vmem>>, vector<1x512xf32>
    %197 = vector.shape_cast %196 : vector<1x512xf32> to vector<512xf32>
    %198 = vector.shape_cast %197 : vector<512xf32> to vector<1x512xf32>
    %199 = vector.broadcast %198 : vector<1x512xf32> to vector<16x512xf32>
    %200 = arith.mulf %69, %199 : vector<16x512xf32>
    %201 = arith.addf %195, %200 : vector<16x512xf32>
    %c22 = arith.constant 22 : index
    %c0_50 = arith.constant 0 : index
    %202 = vector.load %arg6[%c22, %c0_50] : memref<25x512xf32, #tpu.memory_space<vmem>>, vector<1x512xf32>
    %203 = vector.shape_cast %202 : vector<1x512xf32> to vector<512xf32>
    %204 = vector.shape_cast %203 : vector<512xf32> to vector<1x512xf32>
    %205 = vector.broadcast %204 : vector<1x512xf32> to vector<16x512xf32>
    %206 = arith.mulf %57, %205 : vector<16x512xf32>
    %207 = arith.addf %201, %206 : vector<16x512xf32>
    %c23 = arith.constant 23 : index
    %c0_51 = arith.constant 0 : index
    %208 = vector.load %arg6[%c23, %c0_51] : memref<25x512xf32, #tpu.memory_space<vmem>>, vector<1x512xf32>
    %209 = vector.shape_cast %208 : vector<1x512xf32> to vector<512xf32>
    %210 = vector.shape_cast %209 : vector<512xf32> to vector<1x512xf32>
    %211 = vector.broadcast %210 : vector<1x512xf32> to vector<16x512xf32>
    %212 = arith.mulf %70, %211 : vector<16x512xf32>
    %213 = arith.addf %207, %212 : vector<16x512xf32>
    %c24 = arith.constant 24 : index
    %c0_52 = arith.constant 0 : index
    %214 = vector.load %arg6[%c24, %c0_52] : memref<25x512xf32, #tpu.memory_space<vmem>>, vector<1x512xf32>
    %215 = vector.shape_cast %214 : vector<1x512xf32> to vector<512xf32>
    %216 = vector.shape_cast %215 : vector<512xf32> to vector<1x512xf32>
    %217 = vector.broadcast %216 : vector<1x512xf32> to vector<16x512xf32>
    %218 = arith.mulf %71, %217 : vector<16x512xf32>
    %219 = arith.addf %213, %218 : vector<16x512xf32>
    %c48 = arith.constant 48 : index
    %c0_53 = arith.constant 0 : index
    %220 = vector.load %arg8[%c48, %c0_53] : memref<64x512xf32, #tpu.memory_space<vmem>>, vector<16x512xf32>
    tpu.vector_store %arg8[%c48, %c0_53], %219 {strides = array<i32>} : memref<64x512xf32, #tpu.memory_space<vmem>>, vector<16x512xf32>,
    %c0_54 = arith.constant 0 : index
    %c0_55 = arith.constant 0 : index
    %221 = vector.load %arg5[%c0_54, %c0_55] : memref<16x64xf32, #tpu.memory_space<vmem>>, vector<16x64xf32>
    %c0_56 = arith.constant 0 : index
    %c0_57 = arith.constant 0 : index
    %222 = vector.load %arg8[%c0_56, %c0_57] : memref<64x512xf32, #tpu.memory_space<vmem>>, vector<64x512xf32>
    %cst_58 = arith.constant dense<0.000000e+00> : vector<16x512xf32>
    %223 = tpu.matmul %221, %222, %cst_58 {dimension_numbers = #tpu.dot_dimension_numbers<[1], [0], [0], [1], [0, 0, 1, 1], [], []>} : vector<16x64xf32>, vector<64x512xf32>, vector<16x512xf32> -> vector<16x512xf32>
    %224 = arith.addf %160, %223 : vector<16x512xf32>
    %225 = vector.shape_cast %10 : vector<512xf32> to vector<1x512xf32>
    %226 = vector.broadcast %225 : vector<1x512xf32> to vector<16x512xf32>
    %227 = arith.addf %224, %226 : vector<16x512xf32>
    %c0_59 = arith.constant 0 : index
    %c0_60 = arith.constant 0 : index
    %228 = vector.load %arg9[%c0_59, %c0_60] : memref<16x512xf32, #tpu.memory_space<vmem>>, vector<16x512xf32>
    %229 = arith.mulf %228, %227 : vector<16x512xf32>
    %230 = math.absf %229 : vector<16x512xf32>
    %cst_61 = arith.constant 0.707106769 : f32
    %231 = vector.broadcast %cst_61 : f32 to vector<16x512xf32>
    %232 = arith.mulf %230, %231 : vector<16x512xf32>
    %cst_62 = arith.constant 0.327591091 : f32
    %233 = vector.broadcast %cst_62 : f32 to vector<16x512xf32>
    %234 = arith.mulf %233, %232 : vector<16x512xf32>
    %cst_63 = arith.constant 1.000000e+00 : f32
    %235 = vector.broadcast %cst_63 : f32 to vector<16x512xf32>
    %236 = arith.addf %235, %234 : vector<16x512xf32>
    %237 = tpu.reciprocal %236 {approx = true} : vector<16x512xf32> -> vector<16x512xf32>
    %238 = arith.mulf %236, %237 : vector<16x512xf32>
    %cst_64 = arith.constant 2.000000e+00 : f32
    %239 = vector.broadcast %cst_64 : f32 to vector<16x512xf32>
    %240 = arith.subf %239, %238 : vector<16x512xf32>
    %241 = arith.mulf %237, %240 : vector<16x512xf32>
    %cst_65 = arith.constant 1.06140542 : f32
    %242 = vector.broadcast %cst_65 : f32 to vector<16x512xf32>
    %243 = arith.mulf %242, %241 : vector<16x512xf32>
    %cst_66 = arith.constant -1.45315206 : f32
    %244 = vector.broadcast %cst_66 : f32 to vector<16x512xf32>
    %245 = arith.addf %243, %244 : vector<16x512xf32>
    %246 = arith.mulf %245, %241 : vector<16x512xf32>
    %cst_67 = arith.constant 1.42141378 : f32
    %247 = vector.broadcast %cst_67 : f32 to vector<16x512xf32>
    %248 = arith.addf %246, %247 : vector<16x512xf32>
    %249 = arith.mulf %248, %241 : vector<16x512xf32>
    %cst_68 = arith.constant -0.284496725 : f32
    %250 = vector.broadcast %cst_68 : f32 to vector<16x512xf32>
    %251 = arith.addf %249, %250 : vector<16x512xf32>
    %252 = arith.mulf %251, %241 : vector<16x512xf32>
    %cst_69 = arith.constant 0.254829586 : f32
    %253 = vector.broadcast %cst_69 : f32 to vector<16x512xf32>
    %254 = arith.addf %252, %253 : vector<16x512xf32>
    %255 = arith.mulf %254, %241 : vector<16x512xf32>
    %cst_70 = arith.constant 0.000000e+00 : f32
    %256 = vector.broadcast %cst_70 : f32 to vector<16x512xf32>
    %257 = arith.subf %256, %232 : vector<16x512xf32>
    %258 = arith.mulf %257, %232 : vector<16x512xf32>
    %259 = math.exp %258 : vector<16x512xf32>
    %260 = arith.mulf %255, %259 : vector<16x512xf32>
    %261 = arith.addf %229, %230 : vector<16x512xf32>
    %262 = arith.mulf %230, %260 : vector<16x512xf32>
    %263 = arith.subf %261, %262 : vector<16x512xf32>
    %cst_71 = arith.constant 5.000000e-01 : f32
    %264 = vector.broadcast %cst_71 : f32 to vector<16x512xf32>
    %265 = arith.mulf %264, %263 : vector<16x512xf32>
    %266 = vector.extract_strided_slice %265 {offsets = [0, 0], sizes = [16, 128], strides = [1, 1]} : vector<16x512xf32> to vector<16x128xf32>
    %267 = vector.extract_strided_slice %265 {offsets = [0, 128], sizes = [16, 128], strides = [1, 1]} : vector<16x512xf32> to vector<16x128xf32>
    %268 = vector.extract_strided_slice %265 {offsets = [0, 256], sizes = [16, 128], strides = [1, 1]} : vector<16x512xf32> to vector<16x128xf32>
    %269 = vector.extract_strided_slice %265 {offsets = [0, 384], sizes = [16, 128], strides = [1, 1]} : vector<16x512xf32> to vector<16x128xf32>
    %270 = tpu.concatenate %266, %267, %268, %269 in 0 : vector<16x128xf32>, vector<16x128xf32>, vector<16x128xf32>, vector<16x128xf32> -> vector<64x128xf32>
    %cst_72 = arith.constant dense<0.000000e+00> : vector<64x128xf32>
    %271 = tpu.matmul %270, %3, %cst_72 {dimension_numbers = #tpu.dot_dimension_numbers<[1], [0], [0], [1], [0, 0, 1, 1], [], []>} : vector<64x128xf32>, vector<128x128xf32>, vector<64x128xf32> -> vector<64x128xf32>
    %272 = vector.extract_strided_slice %271 {offsets = [0, 0], sizes = [16, 128], strides = [1, 1]} : vector<64x128xf32> to vector<16x128xf32>
    %273 = vector.extract_strided_slice %271 {offsets = [16, 0], sizes = [16, 128], strides = [1, 1]} : vector<64x128xf32> to vector<16x128xf32>
    %274 = vector.extract_strided_slice %271 {offsets = [32, 0], sizes = [16, 128], strides = [1, 1]} : vector<64x128xf32> to vector<16x128xf32>
    %275 = vector.extract_strided_slice %271 {offsets = [48, 0], sizes = [16, 128], strides = [1, 1]} : vector<64x128xf32> to vector<16x128xf32>
    %276 = tpu.concatenate %272, %273, %274, %275 in 1 : vector<16x128xf32>, vector<16x128xf32>, vector<16x128xf32>, vector<16x128xf32> -> vector<16x512xf32>
    %277 = vector.shape_cast %12 : vector<512xf32> to vector<1x512xf32>
    %278 = vector.broadcast %277 : vector<1x512xf32> to vector<16x512xf32>
    %279 = arith.addf %276, %278 : vector<16x512xf32>
    %c0_73 = arith.constant 0 : index
    %c0_74 = arith.constant 0 : index
    %280 = vector.load %arg1[%c0_73, %c0_74] : memref<16x512xf32, #tpu.memory_space<vmem>>, vector<16x512xf32>
    %281 = arith.addf %279, %280 : vector<16x512xf32>
    %c0_75 = arith.constant 0 : index
    %c0_76 = arith.constant 0 : index
    %282 = vector.load %arg7[%c0_75, %c0_76] : memref<16x512xf32, #tpu.memory_space<vmem>>, vector<16x512xf32>
    tpu.vector_store %arg7[%c0_75, %c0_76], %281 {strides = array<i32>} : memref<16x512xf32, #tpu.memory_space<vmem>>, vector<16x512xf32>,
    return
  }
  func.func @transform_0(%arg0: i32) -> (i32, i32) {
    %c0_i32 = arith.constant 0 : i32
    %c0_i32_0 = arith.constant 0 : i32
    return %arg0, %c0_i32 : i32, i32
  }
  func.func @transform_1(%arg0: i32) -> (i32, i32, i32) {
    %c0_i32 = arith.constant 0 : i32
    %c0_i32_0 = arith.constant 0 : i32
    %c0_i32_1 = arith.constant 0 : i32
    %c0_i32_2 = arith.constant 0 : i32
    return %c0_i32, %c0_i32_0, %c0_i32_1 : i32, i32, i32
  }
  func.func @transform_2(%arg0: i32) -> (i32, i32) {
    %c0_i32 = arith.constant 0 : i32
    %c0_i32_0 = arith.constant 0 : i32
    %c0_i32_1 = arith.constant 0 : i32
    return %c0_i32, %c0_i32_0 : i32, i32
  }
  func.func @transform_3(%arg0: i32) -> (i32, i32) {
    %c0_i32 = arith.constant 0 : i32
    %c0_i32_0 = arith.constant 0 : i32
    %c0_i32_1 = arith.constant 0 : i32
    return %c0_i32, %c0_i32_0 : i32, i32
  }
  func.func @transform_4(%arg0: i32) -> (i32, i32) {
    %c0_i32 = arith.constant 0 : i32
    %c0_i32_0 = arith.constant 0 : i32
    %c0_i32_1 = arith.constant 0 : i32
    return %c0_i32, %c0_i32_0 : i32, i32
  }
  func.func @transform_5(%arg0: i32) -> (i32, i32) {
    %c0_i32 = arith.constant 0 : i32
    %c0_i32_0 = arith.constant 0 : i32
    %c0_i32_1 = arith.constant 0 : i32
    return %c0_i32, %c0_i32_0 : i32, i32
  }
  func.func @transform_6(%arg0: i32) -> (i32, i32) {
    %c0_i32 = arith.constant 0 : i32
    %c0_i32_0 = arith.constant 0 : i32
    return %arg0, %c0_i32 : i32, i32
  }
}

</mosaic_0001>

<bundles_post_ra>
// kernel: tpu_custom_call.1
= control target key start
LH: loop header
LB: loop body
LE: loop exit
PB: predicated region body
PF: predicated region fallthrough
CT: control target
= control target key end

     0   :  { %11 = vsyncpa [#allocation5], 0  ;;  %s5079_s0 = inlined_call_operand.hbm [shape: f32[32,512], index: 0, kind: input, shape index: {}]   ;;  %s5080_s1 = inlined_call_operand.hbm [shape: f32[2,128,128], index: 1, kind: input, shape index: {}]   ;;  %s5081_s2 = inlined_call_operand.hbm [shape: f32[128,256], index: 2, kind: input, shape index: {}]   ;;  %s5082_s3 = inlined_call_operand.hbm [shape: f32[4,512], index: 3, kind: input, shape index: {}]   ;;  %s5083_s4 = inlined_call_operand.hbm [shape: f32[16,64], index: 4, kind: input, shape index: {}]   ;;  %s5084_s5 = inlined_call_operand.hbm [shape: f32[25,512], index: 5, kind: input, shape index: {}]   ;;  %s5085_s6 = inlined_call_operand.hbm [shape: f32[32,512], index: 6, kind: output, shape index: {}]  }
   0x1   :  { %13 = vsyncpa [#allocation5 + $0x1], 0 }
   0x2   :  { %14 = vsyncpa [#allocation8], 0 }
   0x3   :  { %15 = vsyncpa [#allocation11], 0 }
   0x4   :  { %16 = vsyncpa [#allocation14], 0 }
   0x5   :  { %17 = vsyncpa [#allocation6], 0 }
   0x6   :  { %19 = vsyncpa [#allocation6 + $0x1], 0  ;;  %s3240_s21 = smov 0   ;;  %s3242_s22 = smov 0  }
   0x7   :  { %s3244_s23 = smov 0   ;;  %s3246_s24 = smov 0  }
   0x8 LB: > { %s3187_s25 = smov [#allocation7]   ;;  %s3261_s27 = sadd.s32 4294967295, %s3185_s24   ;;  %s3185_s24 = sphi %s3246_s24, %s5478_s24   ;;  %s3181_s23 = sphi %s3244_s23, %s5477_s23   ;;  %s3177_s22 = sphi %s3242_s22, %s5476_s22   ;;  %s3173_s21 = sphi %s3240_s21, %s5475_s21  }
   0x9   : > { %s199_s26 = sshll.u32 %s3187_s25, 4  ;;  %p2606_p0 = scmp.ge.s32.totalorder %s3185_s24, 1  ;;  %s200_s26 = int_to_ptr.vmem [resolvable:$true] %s199_s26 }
   0xa   : > { %p5086_p1 = scmp.eq.s32.totalorder %s3261_s27, 0  ;;  %p187_p2 = scmp.lt.s32.totalorder %s3185_s24, 3 }
   0xb   : > { %s3188_s29 = smov [#allocation10]   ;;  %s3189_s8 = smov [#allocation9]  }
   0xc   : > { %p3266_p3 = pnand %p2606_p0, %p187_p2  ;;  %s226_s30 = sshll.u32 %s3188_s29, 4  ;;  %s227_s30 = int_to_ptr.vmem [resolvable:$true] %s226_s30 }
   0xd   : > { %s212_s9 = sshll.u32 %s3189_s8, 4  ;;  %s2962_s11 = scalar_lea.vmem %s200_s26, 4096  ;;  %s3279_s9 = int_to_ptr.vmem [resolvable:$true] %s212_s9 }
   0xe   : > { %s5175_s28 = scalar_select %p3266_p3, 1, 0 }
   0xf   : > { %p2819_p5 = pneg %p3266_p3  ;;  %p2963_p8 = scmp.ne.s32.totalorder %s200_s26, %s2962_s11 }
  0x10   : > { %p2970_p11 = scmp.lt.s32.totalorder %s200_s26, %s200_s26  ;;  %p2971_p12 = scmp.lt.s32.totalorder %s2962_s11, %s2962_s11 }
  0x11   : > { %p3275_p6 = pnand %p2819_p5, %p5086_p1 }
  0x12   : > { %p2972_p13 = por %p2971_p12, %p2970_p11 }
  0x13   : > { %p3283_p7 = pneg %p3275_p6 }
  0x15   : > { %p2965_p9 = pnand %p2963_p8, %p3283_p7 }
  0x17   : > { %p2966_p10 = pneg %p2965_p9 }
  0x19   : > { %p2973_p0 = pnand %p2972_p13, %p2966_p10 }
  0x1b   : > { %2976 = shalt.err (!%p2973_p0)
}
  0x1c   : > { %s3190_s12 = smov 128   ;;  %s3191_s13 = smov 8  }
  0x1d   : > { %2822 = dma.hbm_to_vmem [thread:$0]  (!%p3275_p6), %s5080_s1, 4096, %s200_s26, [#allocation8], %s3190_s12, %s3190_s12, %s3191_s13  }
  0x1e   : > { %s2988_s16 = scalar_lea.vmem %s227_s30, 256  ;;  %p2996_p9 = scmp.lt.s32.totalorder %s227_s30, %s227_s30 }
  0x1f   : > { %p2989_p2 = scmp.ne.s32.totalorder %s227_s30, %s2988_s16  ;;  %p2997_p10 = scmp.lt.s32.totalorder %s2988_s16, %s2988_s16 }
  0x21   : > { %p2991_p5 = pnand %p2989_p2, %p3283_p7  ;;  %p2998_p11 = por %p2997_p10, %p2996_p9 }
  0x23   : > { %p2992_p8 = pneg %p2991_p5 }
  0x25   : > { %p2999_p12 = pnand %p2998_p11, %p2992_p8 }
  0x27   : > { %3002 = shalt.err (!%p2999_p12)
}
  0x28   : > { %2828 = dma.hbm_to_vmem [thread:$0]  (!%p3275_p6), %s5082_s3, 256, %s227_s30, [#allocation11]  }
  0x29   : > { %s3014_s19 = scalar_lea.vmem %s3279_s9, 4096  ;;  %p3022_p5 = scmp.lt.s32.totalorder %s3279_s9, %s3279_s9 }
  0x2a   : > { %p3015_p13 = scmp.ne.s32.totalorder %s3279_s9, %s3014_s19  ;;  %p3023_p9 = scmp.lt.s32.totalorder %s3014_s19, %s3014_s19 }
  0x2c   : > { %p3017_p0 = pnand %p3015_p13, %p3283_p7  ;;  %p3024_p8 = por %p3023_p9, %p3022_p5 }
  0x2e   : > { %p3018_p2 = pneg %p3017_p0 }
  0x30   : > { %p3025_p10 = pnand %p3024_p8, %p3018_p2 }
  0x32   : > { %3028 = shalt.err (!%p3025_p10)
}
  0x33   : > { %s3192_s20 = smov 256   ;;  %s3193_s25 = smov 16  }
  0x34   : > { %2825 = dma.hbm_to_vmem [thread:$0]  (!%p3275_p6), %s5081_s2, 4096, %s3279_s9, [#allocation8], %s3192_s20, %s3192_s20, %s3193_s25  }
  0x35   : > { %s3194_s30 = smov [#allocation12]   ;;  %s3195_s11 = smov [#allocation13]  }
  0x36   : > { %s236_s8 = sshll.u32 %s3194_s30, 4  ;;  %s249_s14 = sshll.u32 %s3195_s11, 4  ;;  %s237_s8 = int_to_ptr.vmem [resolvable:$true] %s236_s8  ;;  %s250_s14 = int_to_ptr.vmem [resolvable:$true] %s249_s14 }
  0x37   : > { %s3040_s15 = scalar_lea.vmem %s237_s8, 256  ;;  %p3048_p0 = scmp.lt.s32.totalorder %s237_s8, %s237_s8 }
  0x38   : > { %p3041_p11 = scmp.ne.s32.totalorder %s237_s8, %s3040_s15  ;;  %p3049_p2 = scmp.lt.s32.totalorder %s3040_s15, %s3040_s15 }
  0x3a   : > { %p3043_p12 = pnand %p3041_p11, %p3283_p7  ;;  %p3050_p5 = por %p3049_p2, %p3048_p0 }
  0x3c   : > { %p3044_p13 = pneg %p3043_p12 }
  0x3e   : > { %p3051_p9 = pnand %p3050_p5, %p3044_p13 }
  0x40   : > { %3054 = shalt.err (!%p3051_p9)
}
  0x41   : > { %2831 = dma.hbm_to_vmem [thread:$0]  (!%p3275_p6), %s5083_s4, 256, %s237_s8, [#allocation11], %s3190_s12, %s3190_s12, %s3191_s13  }
  0x42   : > { %s3066_s17 = scalar_lea.vmem %s250_s14, 2048  ;;  %p3074_p12 = scmp.lt.s32.totalorder %s250_s14, %s250_s14 }
  0x43   : > { %p3067_p8 = scmp.ne.s32.totalorder %s250_s14, %s3066_s17  ;;  %p3075_p0 = scmp.lt.s32.totalorder %s3066_s17, %s3066_s17 }
  0x45   : > { %p3069_p10 = pnand %p3067_p8, %p3283_p7  ;;  %p3076_p13 = por %p3075_p0, %p3074_p12 }
  0x47   : > { %p3070_p11 = pneg %p3069_p10 }
  0x49   : > { %p3077_p2 = pnand %p3076_p13, %p3070_p11 }
  0x4b   : > { %3080 = shalt.err (!%p3077_p2)
}
  0x4c   : > { %s5087_s18 = smov 512   ;;  %s5088_s10 = smov 32  }
  0x4d   : > { %2834 = dma.hbm_to_vmem [thread:$0]  (!%p3275_p6), %s5084_s5, 2048, %s250_s14, [#allocation14], %s5087_s18, %s5087_s18, %s5088_s10  }
  0x4e   : > { %s2605_s19 = sadd.s32 4294967294, %s3185_s24   ;;  %s3338_s20 = sadd.s32 1, %s3185_s24  }
  0x4f   : > { %s32_s25 = sadd.s32 1, %s3181_s23  ;;  %s29_s26 = ssub.s32 %s3185_s24, %s3338_s20 }
  0x50   : > { %p39_p7 = scmp.ne.s32.totalorder %s3181_s23, %s3177_s22  ;;  %p30_p5 = scmp.eq.s32.totalorder %s29_s26, 0 }
  0x51   : > { %p40_p9 = scmp.eq.s32.totalorder %s3185_s24, 0  ;;  %p45_p8 = scmp.ne.s32.totalorder %s3177_s22, %s3173_s21 }
  0x52   : > { %p174_p10 = scmp.eq.s32.totalorder %s3261_s27, 1  ;;  %p180_p0 = scmp.eq.s32.totalorder %s2605_s19, 1 }
  0x53   : > { %s3350_s7 = scalar_select %p30_p5, %s3181_s23, %s32_s25  }
  0x54   : > { %p41_p11 = por %p40_p9, %p39_p7  ;;  %p3354_p12 = por %p5086_p1, %p45_p8 }
  0x55   : > { %p3358_p6 = por %p174_p10, %p39_p7  ;;  %p2848_p13 = scmp.lt.s32.totalorder %s3185_s24, 2 }
  0x56   : > { %s5178_s29 = scalar_select %p3354_p12, 1, 0 }
  0x57   : > { %s5179_s30 = scalar_select %p3358_p6, 1, 0 }
  0x58   : > { %s263_s8 = sand.u32 1, %s3181_s23   ;;  %p3364_p2 = por %p180_p0, %p45_p8 }
  0x59   : > { %s2613_s14 = sshll.u32 %s263_s8, 6  ;;  %s2636_s15 = sshll.u32 %s3185_s24, 10 }
  0x5a   : > { %s5180_s11 = scalar_select %p3364_p2, 1, 0 }
  0x5b   : > { %s3372_s17 = scalar_lea.hbm %s5079_s0, %s2636_s15  ;;  %s267_s12 = scalar_lea.vmem [#allocation4], %s2613_s14 }
  0x5c   : > { %s275_s13 = sshll.u32 %s267_s12, 4  ;;  %p3374_p7 = pnand %p2848_p13, %p41_p11  ;;  %s3378_s13 = int_to_ptr.vmem [resolvable:$true] %s275_s13 }
  0x5d   : > { %s3380_s25 = scalar_lea.sflag [#allocation5], %s263_s8  ;;  %s3081_s26 = scalar_lea.hbm %s3372_s17, 1024 }
  0x5e   : > { %p3082_p5 = scmp.ne.s32.totalorder %s3372_s17, %s3081_s26  ;;  %p3083_p9 = pneg %p3374_p7 }
  0x5f   : > { %s3086_s14 = scalar_lea.hbm %s5079_s0, 2048  ;;  %p3087_p11 = scmp.lt.s32.totalorder %s3372_s17, %s5079_s0 }
  0x60   : > { %p3084_p8 = pnand %p3083_p9, %p3082_p5  ;;  %p3088_p0 = scmp.lt.s32.totalorder %s3086_s14, %s3081_s26 }
  0x62   : > { %p3085_p10 = pneg %p3084_p8  ;;  %p3089_p13 = por %p3088_p0, %p3087_p11 }
  0x64   : > { %p3090_p4 = pnand %p3089_p13, %p3085_p10 }
  0x66   : > { %3093 = shalt.err (!%p3090_p4)
}
  0x67   : > { %s3094_s8 = scalar_lea.vmem %s3378_s13, 1024  ;;  %s3198_s18 = smov [#allocation4]  }
  0x68   : > { %p3095_p1 = scmp.ne.s32.totalorder %s3378_s13, %s3094_s8  ;;  %s3099_s10 = sshll.u32 %s3198_s18, 4  ;;  %s3100_s10 = int_to_ptr.vmem [resolvable:$false] %s3099_s10 }
  0x69   : > { %s3101_s15 = scalar_lea.vmem %s3100_s10, 2048  ;;  %p3102_p8 = scmp.lt.s32.totalorder %s3378_s13, %s3100_s10 }
  0x6a   : > { %p3097_p2 = pnand %p3095_p1, %p3083_p9  ;;  %p3103_p6 = scmp.lt.s32.totalorder %s3101_s15, %s3094_s8 }
  0x6c   : > { %p3098_p5 = pneg %p3097_p2  ;;  %p3104_p12 = por %p3103_p6, %p3102_p8 }
  0x6e   : > { %p3105_p3 = pnand %p3104_p12, %p3098_p5 }
  0x70   : > { %3108 = shalt.err (!%p3105_p3)
}
  0x71   : > { %s5182_s26 = smov 32   ;;  %s5183_s9 = smov 512  }
  0x72   : > { %2838 = dma.hbm_to_vmem [thread:$0]  (!%p3374_p7), %s3372_s17, 1024, %s3378_s13, %s3380_s25, %s5183_s9, %s5183_s9, %s5182_s26  }
  0x73   : > { %p5184_p1 = scmp.ne.s32.totalorder %s5175_s28, 0 }
  0x75   : > { %287 = sbr.rel (%p5184_p1) target bundleno = 1279 (0x4ff), region = 44 }
  0x7a   : > { %s3407_s18 = sand.u32 1, %s3177_s22   ;;  %p5185_p3 = scmp.ne.s32.totalorder %s5178_s29, 0 }
  0x7b   : > { %s2618_s10 = sshll.u32 %s3407_s18, 6  ;;  %s290_s14 = scalar_lea.sflag [#allocation5], %s3407_s18 }
  0x7c   : > { %s3413_s19 = scalar_lea.vmem [#allocation4], %s2618_s10 }
  0x7d   : > { %3152 = dma.done.wait (%p5185_p3), %s290_s14, 1024  }
  0x7e   : > { %3154 = vsyncadd (%p5185_p3), %s290_s14, 4294966272  ;;  %p5186_p4 = scmp.eq.s32.totalorder %s3261_s27, 0 }
  0x80   : > { %3156 = dma.done.wait (%p5186_p4), [#allocation8], 8192   ;;  %p5187_p12 = pmov %p5186_p4 }
  0x81   : > { %p5188_p6 = pmov %p5186_p4 }
  0x82   : > { %3158 = vsyncadd (%p5187_p12), [#allocation8], 4294959104 }
  0x83   : > { %3160 = dma.done.wait (%p5188_p6), [#allocation11], 512   ;;  %p5189_p2 = pmov %p5186_p4 }
  0x85   : > { %3162 = vsyncadd (%p5189_p2), [#allocation11], 4294966784  ;;  %p5190_p7 = pmov %p5189_p2 }
  0x86   : > { %p5191_p9 = pmov %p5189_p2 }
  0x87   : > { %3164 = dma.done.wait (%p5190_p7), [#allocation14], 2048  }
  0x88   : > { %3166 = vsyncadd (%p5191_p9), [#allocation14], 4294965248  ;;  %v359_v0 = vld [vmem:[#allocation7 + $0x78] sm:$0xff]  ;;  %v358_v1 = vld [vmem:[#allocation7 + $0x70] sm:$0xff]  ;;  %s3200_s28 = smov 64   ;;  %s3201_s29 = smov 32  }
  0x89   : > { %2695 = vmatprep.subr.mxu0 %v359_v0  ;;  %v357_v2 = vld [vmem:[#allocation7 + $0x68] sm:$0xff]  ;;  %v356_v3 = vld [vmem:[#allocation7 + $0x60] sm:$0xff]  ;;  %v355_v5 = vld [vmem:[#allocation7 + $0x58] sm:$0xff]  ;;  %s3202_s17 = smov 96   ;;  %vm1889_vm3 = vcmask 523264   ;;  %s5011_s13 = scalar_lea.vmem [#allocation15], %s2618_s10 }
  0x8a   : > { %2696 = vmatpush3.msra.mxu0 %v359_v0  ;;  %v3432_v4 = vld [vmem:[%s3413_s19] sm:$0xff]  ;;  %v354_v6 = vld [vmem:[#allocation7 + $0x50] sm:$0xff]  ;;  %v353_v7 = vld [vmem:[#allocation7 + $0x48] sm:$0xff]  ;;  %v5092_v0 = vmov 0.0   ;;  %s2484_s25 = sshll.u32 %s5011_s13, 4  ;;  %s2638_s16 = sshll.u32 %s3261_s27, 10  ;;  %s5028_s25 = int_to_ptr.vmem [resolvable:$true] %s2484_s25 }
  0x8b   : > { %2697 = vmatprep.subr.mxu0 %v358_v1  ;;  %2727 = vmatprep.mubr.f32.mxu0 %v3432_v4  ;;  %v352_v8 = vld [vmem:[#allocation7 + $0x40] sm:$0xff]  ;;  %v351_v9 = vld [vmem:[#allocation7 + $0x38] sm:$0xff]  ;;  %v350_v10 = vld [vmem:[#allocation7 + $0x30] sm:$0xff]  ;;  %v424_v24 = vmul.f32 %v3432_v4, %v3432_v4  ;;  %s5034_s15 = scalar_lea.hbm %s5085_s6, %s2638_s16  ;;  %s2470_s26 = scalar_lea.sflag [#allocation6], %s3407_s18 }
  0x8c   : > { %2698 = vmatpush3.msra.mxu0 %v358_v1  ;;  %v349_v11 = vld [vmem:[#allocation7 + $0x28] sm:$0xff]  ;;  %v348_v12 = vld [vmem:[#allocation7 + $0x20] sm:$0xff]  ;;  %v347_v13 = vld [vmem:[#allocation7 + $0x18] sm:$0xff]  ;;  %697 = vmatprep.mubr.f32.mxu1 %v5092_v0  ;;  %s3109_s9 = scalar_lea.vmem %s5028_s25, 1024  ;;  %p5472_p11 = scmp.ne.s32.totalorder %s5179_s30, 0 }
  0x8d   : > { %2699 = vmatprep.subr.mxu0 %v357_v2  ;;  %v346_v14 = vld [vmem:[#allocation7 + $0x10] sm:$0xff]  ;;  %v345_v15 = vld [vmem:[#allocation7 + $0x8] sm:$0xff]  ;;  %v344_v16 = vld [vmem:[#allocation7] sm:$0xff]  ;;  %p3110_p10 = scmp.ne.s32.totalorder %s5028_s25, %s3109_s9  ;;  %s3203_s27 = smov [#allocation15]  }
  0x8e   : > { %2700 = vmatpush3.msra.mxu0 %v357_v2  ;;  %v3436_v17 = vld [vmem:[%s3413_s19 + $0x20] sm:$0xff]  ;;  %v3439_v18 = vld [vmem:[%s3413_s19 + $0x8] sm:$0xff]  ;;  %v3447_v20 = vld [vmem:[%s3413_s19 + $0x10] sm:$0xff]  ;;  %s3113_s10 = sshll.u32 %s3203_s27, 4  ;;  %s3114_s10 = int_to_ptr.vmem [resolvable:$false] %s3113_s10 }
  0x8f   : > { %2701 = vmatprep.subr.mxu0 %v356_v3  ;;  %v3444_v19 = vld [vmem:[%s3413_s19 + $0x28] sm:$0xff]  ;;  %v3452_v21 = vld [vmem:[%s3413_s19 + $0x30] sm:$0xff]  ;;  %v3455_v22 = vld [vmem:[%s3413_s19 + $0x18] sm:$0xff]  ;;  %v425_v25 = vmul.f32 %v3436_v17, %v3436_v17  ;;  %v426_v26 = vmul.f32 %v3439_v18, %v3439_v18  ;;  %v428_v28 = vmul.f32 %v3447_v20, %v3447_v20  ;;  %p3111_p0 = pnand %p3110_p10, %p5472_p11  ;;  %s3115_s14 = scalar_lea.vmem %s3114_s10, 2048 }
  0x90   : > { %2702 = vmatpush3.msra.mxu0 %v356_v3  ;;  %v3460_v23 = vld [vmem:[%s3413_s19 + $0x38] sm:$0xff]  ;;  %v427_v27 = vmul.f32 %v3444_v19, %v3444_v19  ;;  %v429_v29 = vmul.f32 %v3452_v21, %v3452_v21  ;;  %v430_v30 = vmul.f32 %v3455_v22, %v3455_v22  ;;  %v407_v33 = vld [vmem:[#allocation9 + $0xf0] sm:$0xff]  ;;  %v406_v34 = vld [vmem:[#allocation9 + $0xe8] sm:$0xff]  ;;  %p3116_p5 = scmp.lt.s32.totalorder %s5028_s25, %s3114_s10  ;;  %p3117_p8 = scmp.lt.s32.totalorder %s3115_s14, %s3109_s9 }
  0x91   : > { %2703 = vmatprep.subr.mxu0 %v355_v5  ;;  %v431_v31 = vmul.f32 %v3460_v23, %v3460_v23  ;;  %v408_v32 = vld [vmem:[#allocation9 + $0xf8] sm:$0xff]  ;;  %v405_v35 = vld [vmem:[#allocation9 + $0xe0] sm:$0xff]  ;;  %v403_v37 = vld [vmem:[#allocation9 + $0xd0] sm:$0xff]  ;;  %p3112_p13 = pneg %p3111_p0 }
  0x92   : > { %2704 = vmatpush3.msra.mxu0 %v355_v5  ;;  %633 = vmatprep.subr.mxu1 %v408_v32  ;;  %v404_v36 = vld [vmem:[#allocation9 + $0xd8] sm:$0xff]  ;;  %v402_v38 = vld [vmem:[#allocation9 + $0xc8] sm:$0xff]  ;;  %v401_v39 = vld [vmem:[#allocation9 + $0xc0] sm:$0xff]  ;;  %p3118_p1 = por %p3117_p8, %p3116_p5 }
  0x93   : > { %2705 = vmatprep.subr.mxu0 %v354_v6  ;;  %634 = vmatpush1.msra.mxu1 %v407_v33  ;;  %v400_v40 = vld [vmem:[#allocation9 + $0xb8] sm:$0xff]  ;;  %v399_v41 = vld [vmem:[#allocation9 + $0xb0] sm:$0xff]  ;;  %v398_v42 = vld [vmem:[#allocation9 + $0xa8] sm:$0xff] }
  0x94   : > { %2706 = vmatpush3.msra.mxu0 %v354_v6  ;;  %635 = vmatprep.subr.mxu1 %v406_v34  ;;  %v397_v43 = vld [vmem:[#allocation9 + $0xa0] sm:$0xff]  ;;  %v396_v44 = vld [vmem:[#allocation9 + $0x98] sm:$0xff]  ;;  %v395_v45 = vld [vmem:[#allocation9 + $0x90] sm:$0xff]  ;;  %p3119_p3 = pnand %p3118_p1, %p3112_p13 }
  0x95   : > { %2707 = vmatprep.subr.mxu0 %v353_v7  ;;  %636 = vmatpush1.msra.mxu1 %v405_v35  ;;  %v394_v46 = vld [vmem:[#allocation9 + $0x88] sm:$0xff]  ;;  %v393_v47 = vld [vmem:[#allocation9 + $0x80] sm:$0xff]  ;;  %v392_v48 = vld [vmem:[#allocation9 + $0x78] sm:$0xff] }
  0x96   : > { %2708 = vmatpush3.msra.mxu0 %v353_v7  ;;  %637 = vmatprep.subr.mxu1 %v404_v36  ;;  %v391_v49 = vld [vmem:[#allocation9 + $0x70] sm:$0xff]  ;;  %v390_v50 = vld [vmem:[#allocation9 + $0x68] sm:$0xff]  ;;  %v389_v51 = vld [vmem:[#allocation9 + $0x60] sm:$0xff] }
  0x97   : > { %2709 = vmatprep.subr.mxu0 %v352_v8  ;;  %638 = vmatpush1.msra.mxu1 %v403_v37  ;;  %v388_v52 = vld [vmem:[#allocation9 + $0x58] sm:$0xff]  ;;  %v387_v53 = vld [vmem:[#allocation9 + $0x50] sm:$0xff]  ;;  %v386_v54 = vld [vmem:[#allocation9 + $0x48] sm:$0xff] }
  0x98   : > { %2710 = vmatpush3.msra.mxu0 %v352_v8  ;;  %639 = vmatprep.subr.mxu1 %v402_v38  ;;  %v385_v55 = vld [vmem:[#allocation9 + $0x40] sm:$0xff]  ;;  %v384_v56 = vld [vmem:[#allocation9 + $0x38] sm:$0xff]  ;;  %v383_v57 = vld [vmem:[#allocation9 + $0x30] sm:$0xff] }
  0x99   : > { %2711 = vmatprep.subr.mxu0 %v351_v9  ;;  %640 = vmatpush1.msra.mxu1 %v401_v39  ;;  %v382_v58 = vld [vmem:[#allocation9 + $0x28] sm:$0xff]  ;;  %v381_v59 = vld [vmem:[#allocation9 + $0x20] sm:$0xff]  ;;  %v380_v60 = vld [vmem:[#allocation9 + $0x18] sm:$0xff] }
  0x9a   : > { %2712 = vmatpush3.msra.mxu0 %v351_v9  ;;  %641 = vmatprep.subr.mxu1 %v400_v40  ;;  %v379_v61 = vld [vmem:[#allocation9 + $0x10] sm:$0xff]  ;;  %v378_v62 = vld [vmem:[#allocation9 + $0x8] sm:$0xff]  ;;  %v377_v63 = vld [vmem:[#allocation9] sm:$0xff] }
  0x9b   : > { %2713 = vmatprep.subr.mxu0 %v350_v10  ;;  %642 = vmatpush1.msra.mxu1 %v399_v41 }
  0x9c   : > { %2714 = vmatpush3.msra.mxu0 %v350_v10  ;;  %643 = vmatprep.subr.mxu1 %v398_v42 }
  0x9d   : > { %2715 = vmatprep.subr.mxu0 %v349_v11  ;;  %644 = vmatpush1.msra.mxu1 %v397_v43 }
  0x9e   : > { %2716 = vmatpush3.msra.mxu0 %v349_v11  ;;  %645 = vmatprep.subr.mxu1 %v396_v44 }
  0x9f   : > { %2717 = vmatprep.subr.mxu0 %v348_v12  ;;  %646 = vmatpush1.msra.mxu1 %v395_v45 }
  0xa0   : > { %2718 = vmatpush3.msra.mxu0 %v348_v12  ;;  %647 = vmatprep.subr.mxu1 %v394_v46 }
  0xa1   : > { %2719 = vmatprep.subr.mxu0 %v347_v13  ;;  %648 = vmatpush1.msra.mxu1 %v393_v47 }
  0xa2   : > { %2720 = vmatpush3.msra.mxu0 %v347_v13  ;;  %649 = vmatprep.subr.mxu1 %v392_v48 }
  0xa3   : > { %2721 = vmatprep.subr.mxu0 %v346_v14  ;;  %650 = vmatpush1.msra.mxu1 %v391_v49 }
  0xa4   : > { %2722 = vmatpush3.msra.mxu0 %v346_v14  ;;  %651 = vmatprep.subr.mxu1 %v390_v50 }
  0xa5   : > { %2723 = vmatprep.subr.mxu0 %v345_v15  ;;  %652 = vmatpush1.msra.mxu1 %v389_v51 }
  0xa6   : > { %2724 = vmatpush3.msra.mxu0 %v345_v15  ;;  %653 = vmatprep.subr.mxu1 %v388_v52 }
  0xa7   : > { %2725 = vmatprep.subr.mxu0 %v344_v16  ;;  %654 = vmatpush1.msra.mxu1 %v387_v53 }
  0xa8   : > { %2726 = vmatpush3.msra.mxu0 %v344_v16  ;;  %655 = vmatprep.subr.mxu1 %v386_v54 }
  0xa9   : > { %2728 = vmatmul.mubr.f32.vlgmr.msra.gmra.mxu0 %v3436_v17  ;;  %656 = vmatpush1.msra.mxu1 %v385_v55 }
  0xaa   : > { %2730 = vmatprep.mubr.f32.mxu0 %v3439_v18  ;;  %657 = vmatprep.subr.mxu1 %v384_v56 }
  0xab   : > { %658 = vmatpush1.msra.mxu1 %v383_v57 }
  0xac   : > { %659 = vmatprep.subr.mxu1 %v382_v58 }
  0xad   : > { %2731 = vmatmul.mubr.f32.gmra.mxu0 %v3444_v19  ;;  %660 = vmatpush1.msra.mxu1 %v381_v59 }
  0xae   : > { %2733 = vmatprep.mubr.f32.mxu0 %v3447_v20  ;;  %661 = vmatprep.subr.mxu1 %v380_v60 }
  0xaf   : > { %662 = vmatpush1.msra.mxu1 %v379_v61 }
  0xb0   : > { %663 = vmatprep.subr.mxu1 %v378_v62 }
  0xb1   : > { %2734 = vmatmul.mubr.f32.gmra.mxu0 %v3452_v21  ;;  %664 = vmatpush1.msra.mxu1 %v377_v63 }
  0xb2   : > { %2736 = vmatprep.mubr.f32.mxu0 %v3455_v22 }
  0xb5   : > { %2737 = vmatmul.mubr.f32.gmra.mxu0 %v3460_v23 }
  0xb6   : > { %2739 = vmatprep.mubr.f32.mxu0 %v424_v24 }
  0xb9   : > { %2740 = vmatmul.mubr.f32.gmra.mxu0 %v425_v25 }
  0xba   : > { %2742 = vmatprep.mubr.f32.mxu0 %v426_v26 }
  0xbd   : > { %2743 = vmatmul.mubr.f32.gmra.mxu0 %v427_v27 }
  0xbe   : > { %2745 = vmatprep.mubr.f32.mxu0 %v428_v28 }
  0xc1   : > { %2746 = vmatmul.mubr.f32.gmra.mxu0 %v429_v29 }
  0xc2   : > { %2748 = vmatprep.mubr.f32.mxu0 %v430_v30 }
  0xc5   : > { %2749 = vmatmul.mubr.f32.gmra.mxu0 %v431_v31 }
 0x169   : > { %v2729_v1 = vpop.f32.mrf.mxu0 }
 0x16a   : > { %v581_v10 = vmul.f32 %v2729_v1, %v2729_v1  ;;  %v605_v58 = vsub.f32 %v3436_v17, %v2729_v1 }
 0x16b   : > { %v498_v2 = vpop.f32.mrf.mxu0 }
 0x16c   : > { %v577_v12 = vmul.f32 %v498_v2, %v498_v2  ;;  %v601_v50 = vsub.f32 %v3432_v4, %v498_v2 }
 0x16d   : > { %v3480_v3 = vpop.f32.mrf.mxu0 }
 0x16e   : > { %v582_v25 = vmul.f32 %v3480_v3, %v3480_v3  ;;  %v606_v17 = vsub.f32 %v3444_v19, %v3480_v3 }
 0x16f   : > { %v3482_v5 = vpop.f32.mrf.mxu0 }
 0x170   : > { %v578_v26 = vmul.f32 %v3482_v5, %v3482_v5  ;;  %v602_v62 = vsub.f32 %v3439_v18, %v3482_v5 }
 0x171   : > { %v3484_v6 = vpop.f32.mrf.mxu0 }
 0x172   : > { %v583_v40 = vmul.f32 %v3484_v6, %v3484_v6 }
 0x173   : > { %v3486_v7 = vpop.f32.mrf.mxu0 }
 0x174   : > { %v579_v34 = vmul.f32 %v3486_v7, %v3486_v7 }
 0x175   : > { %v3488_v8 = vpop.f32.mrf.mxu0 }
 0x176   : > { %v584_v51 = vmul.f32 %v3488_v8, %v3488_v8 }
 0x177   : > { %v3490_v9 = vpop.f32.mrf.mxu0 }
 0x178   : > { %v580_v46 = vmul.f32 %v3490_v9, %v3490_v9 }
 0x179   : > { %v2741_v11 = vpop.f32.mrf.mxu0 }
 0x17a   : > { %v589_v13 = vsub.f32 %v2741_v11, %v581_v10 }
 0x17b   : > { %v538_v14 = vpop.f32.mrf.mxu0 }
 0x17c   : > { %v597_v15 = vmax.f32 %v589_v13, 0.0  ;;  %v585_v16 = vsub.f32 %v538_v14, %v577_v12  ;;  %v603_v12 = vsub.f32 %v3447_v20, %v3486_v7  ;;  %v607_v13 = vsub.f32 %v3452_v21, %v3484_v6 }
 0x17d   : > { %v2744_v24 = vpop.f32.mrf.mxu0  ;;  %v604_v14 = vsub.f32 %v3455_v22, %v3490_v9  ;;  %v747_v6 = vlaneseq  ;;  %v409_v22 = vld [vmem:[#allocation10] ss:$4 sm:$0xf] }
 0x17e   : > { %v593_v27 = vmax.f32 %v585_v16, 0.0  ;;  %v613_v29 = vadd.f32 1e-06, %v597_v15  ;;  %v590_v31 = vsub.f32 %v2744_v24, %v582_v25  ;;  %v608_v15 = vsub.f32 %v3460_v23, %v3488_v8 }
 0x17f   : > { %v548_v28 = vpop.f32.mrf.mxu0  ;;  %v748_v16 = vshrl.u32 %v747_v6, 7 }
 0x180   : > { %v609_v30 = vadd.f32 1e-06, %v593_v27  ;;  %v586_v32 = vsub.f32 %v548_v28, %v578_v26  ;;  %v598_v37 = vmax.f32 %v590_v31, 0.0 }
 0x181   : > { %v2747_v33 = vpop.f32.mrf.mxu0  ;;  %v3527_v24 = vsub.s32 0, %v748_v16  ;;  %v3532_v27 = vsub.s32 1, %v748_v16 }
 0x182   : > { %2903 = vrsqrt.f32 %v609_v30  ;;  %v594_v35 = vmax.f32 %v586_v32, 0.0  ;;  %v591_v42 = vsub.f32 %v2747_v33, %v583_v40  ;;  %v614_v43 = vadd.f32 1e-06, %v598_v37 }
 0x183   : > { %v558_v36 = vpop.f32.mrf.mxu0  ;;  %2905 = vrsqrt.f32 %v613_v29  ;;  %5192 = vst [vmem:[#allocation21_spill] sm:$0xff] %v3527_v24  ;;  %v750_v9 = vrot.slane %v409_v22, %v3527_v24  ;;  %5193 = vst [vmem:[#allocation22_spill] sm:$0xff] %v3532_v27  ;;  %v754_v29 = vrot.slane %v409_v22, %v3532_v27 }
 0x184   : > { %v610_v38 = vadd.f32 1e-06, %v594_v35  ;;  %v587_v39 = vsub.f32 %v558_v36, %v579_v34  ;;  %v599_v47 = vmax.f32 %v591_v42, 0.0  ;;  %v3561_v36 = vsub.s32 2, %v748_v16 }
 0x185   : > { %v2750_v41 = vpop.f32.mrf.mxu0 }
 0x186   : > { %2907 = vrsqrt.f32 %v610_v38  ;;  %v595_v44 = vmax.f32 %v587_v39, 0.0  ;;  %v615_v53 = vadd.f32 1e-06, %v599_v47  ;;  %v592_v54 = vsub.f32 %v2750_v41, %v584_v51  ;;  %5198 = vst [vmem:[#allocation27_spill] sm:$0xff] %v3561_v36 }
 0x187   : > { %v568_v45 = vpop.f32.mrf.mxu0  ;;  %2909 = vrsqrt.f32 %v614_v43  ;;  %v3565_v39 = vsub.s32 3, %v748_v16  ;;  %v758_v41 = vrot.slane %v409_v22, %v3561_v36 }
 0x188   : > { %v611_v48 = vadd.f32 1e-06, %v595_v44  ;;  %v588_v49 = vsub.f32 %v568_v45, %v580_v46  ;;  %v600_v59 = vmax.f32 %v592_v54, 0.0  ;;  %v1154_v54 = vld [vmem:[#allocation13 + $0x7] ss:$8 sm:$0xf] }
 0x189   : > { %5199 = vst [vmem:[#allocation28_spill] sm:$0xff] %v3565_v39  ;;  %v762_v44 = vrot.slane %v409_v22, %v3565_v39 }
 0x18a   : > { %2911 = vrsqrt.f32 %v611_v48  ;;  %v596_v55 = vmax.f32 %v588_v49, 0.0  ;;  %v616_v63 = vadd.f32 1e-06, %v600_v59 }
 0x18b   : > { %2913 = vrsqrt.f32 %v615_v53  ;;  %v1536_v53 = vld [vmem:[#allocation13 + $0x41] ss:$8 sm:$0xf] }
 0x18c   : > { %v612_v60 = vadd.f32 1e-06, %v596_v55  ;;  %v959_v55 = vld [vmem:[#allocation13 + $0x2] ss:$8 sm:$0xf]  ;;  %v1541_v59 = vrot.slane %v1536_v53, %v3527_v24 }
 0x18d   : > { %v3674_v16 = vrot.slane %v959_v55, %v3561_v36 }
 0x18e   : > { %2915 = vrsqrt.f32 %v612_v60  ;;  %v3622_v60 = vld [vmem:[#allocation13 + $0x1] ss:$8 sm:$0xf] }
 0x18f   : > { %v2904_v52 = vpop.eup %2903  ;;  %2917 = vrsqrt.f32 %v616_v63  ;;  %v1159_v63 = vrot.slane %v1154_v54, %v3527_v24  ;;  %v3678_v22 = vrot.slane %v3622_v60, %v3532_v27 }
 0x190   : > { %v625_v56 = vmul.f32 %v2904_v52, %v601_v50  ;;  %v2906_v57 = vpop.eup %2905  ;;  %v1731_v52 = vld [vmem:[#allocation13 + $0x46] ss:$8 sm:$0xf] }
 0x191   : > { %v629_v61 = vmul.f32 %v2906_v57, %v605_v58  ;;  %v3618_v57 = vrot.slane %v1731_v52, %v3532_v27  ;;  %v1736_v58 = vrot.slane %v1731_v52, %v3527_v24 }
 0x192   : > { %698 = vmatmul.mubr.f32.vlgmr.msra.gmra.mxu1 %v625_v56  ;;  %v1349_v56 = vld [vmem:[#allocation13 + $0x24] ss:$8 sm:$0xf] }
 0x193   : > { %703 = vmatprep.mubr.f32.mxu1 %v5092_v0  ;;  %v2908_v4 = vpop.eup %2907 }
 0x194   : > { %v626_v2 = vmul.f32 %v2908_v4, %v602_v62  ;;  %v2910_v10 = vpop.eup %2909  ;;  %v3627_v4 = vrot.slane %v1536_v53, %v3532_v27  ;;  %v3630_v62 = vrot.slane %v1154_v54, %v3532_v27 }
 0x195   : > { %v630_v1 = vmul.f32 %v2910_v10, %v606_v17  ;;  %v3634_v10 = vld [vmem:[#allocation13 + $0x6] ss:$8 sm:$0xf]  ;;  %v3636_v17 = vld [vmem:[#allocation13 + $0x23] ss:$8 sm:$0xf] }
 0x196   : > { %704 = vmatmul.mubr.f32.gmra.mxu1 %v629_v61  ;;  %v3624_v61 = vld [vmem:[#allocation13 + $0x44] ss:$8 sm:$0xf] }
 0x197   : > { %709 = vmatprep.mubr.f32.mxu1 %v5092_v0  ;;  %v2912_v11 = vpop.eup %2911 }
 0x198   : > { %v627_v18 = vmul.f32 %v2912_v11, %v603_v12  ;;  %v2914_v5 = vpop.eup %2913  ;;  %v3642_v11 = vrot.slane %v1731_v52, %v3561_v36  ;;  %v3645_v12 = vrot.slane %v1536_v53, %v3561_v36 }
 0x199   : > { %v631_v19 = vmul.f32 %v2914_v5, %v607_v13  ;;  %v3648_v5 = vld [vmem:[#allocation13 + $0x40] ss:$8 sm:$0xf]  ;;  %v3650_v13 = vld [vmem:[#allocation13 + $0x45] ss:$8 sm:$0xf] }
 0x19a   : > { %710 = vmatmul.mubr.f32.gmra.mxu1 %v626_v2  ;;  %v964_v2 = vrot.slane %v959_v55, %v3527_v24 }
 0x19b   : > { %715 = vmatprep.mubr.f32.mxu1 %v5092_v0  ;;  %v2916_v3 = vpop.eup %2915 }
 0x19c   : > { %v628_v20 = vmul.f32 %v2916_v3, %v604_v14  ;;  %v2918_v7 = vpop.eup %2917  ;;  %v3656_v3 = vrot.slane %v1536_v53, %v3565_v39  ;;  %v3659_v14 = vrot.slane %v1154_v54, %v3561_v36 }
 0x19d   : > { %v632_v21 = vmul.f32 %v2918_v7, %v608_v15  ;;  %v3665_v7 = vand.u32 127, %v747_v6  ;;  %v3668_v15 = vrot.slane %v1154_v54, %v3565_v39  ;;  %v3686_v6 = vld [vmem:[#allocation13 + $0x60] ss:$8 sm:$0xf] }
 0x19e   : > { %716 = vmatmul.mubr.f32.gmra.mxu1 %v630_v1  ;;  %v3639_v1 = vrot.slane %v959_v55, %v3532_v27 }
 0x19f   : > { %721 = vmatprep.mubr.f32.mxu1 %v5092_v0  ;;  %vm830_vm0 = vcmp.lt.s32.totalorder %v3665_v7, 64  ;;  %vm855_vm1 = vcmp.lt.s32.totalorder %v3665_v7, 32  ;;  %vm880_vm2 = vcmp.lt.s32.totalorder %v3665_v7, 96 }
 0x1a2   : > { %722 = vmatmul.mubr.f32.gmra.mxu1 %v627_v18  ;;  %v1354_v18 = vrot.slane %v1349_v56, %v3527_v24 }
 0x1a3   : > { %727 = vmatprep.mubr.f32.mxu1 %v5092_v0 }
 0x1a6   : > { %728 = vmatmul.mubr.f32.gmra.mxu1 %v631_v19  ;;  %v3653_v19 = vrot.slane %v1731_v52, %v3565_v39 }
 0x1a7   : > { %733 = vmatprep.mubr.f32.mxu1 %v5092_v0 }
 0x1aa   : > { %734 = vmatmul.mubr.f32.gmra.mxu1 %v628_v20  ;;  %v3662_v20 = vrot.slane %v1349_v56, %v3532_v27 }
 0x1ab   : > { %739 = vmatprep.mubr.f32.mxu1 %v5092_v0 }
 0x1ae   : > { %740 = vmatmul.mubr.f32.gmra.mxu1 %v632_v21  ;;  %v3671_v21 = vrot.slane %v959_v55, %v3565_v39 }
 0x1af   : > { %1960 = vmatprep.mubr.f32.mxu1 %v5092_v0  ;;  %v3735_v0 = vrot.slane %v3686_v6, %v3527_v24 }
 0x252   : > { %v699_v25 = vpop.f32.mrf.mxu1 }
 0x253   : > { %v3530_v26 = vadd.f32 %v750_v9, %v699_v25  ;;  %v3684_v25 = vrot.slane %v3624_v61, %v3532_v27 }
 0x254   : > { %v3534_v23 = vpop.f32.mrf.mxu1 }
 0x255   : > { %5194 = vst [vmem:[#allocation23_spill] sm:$0xff] %v3534_v23  ;;  %812 = vrot.lane.b32.xlu0 %v3530_v26, %s3200_s28  ;;  %v3719_v52 = vmul.f32 %v1736_v58, %v3530_v26  ;;  %v3722_v53 = vmul.f32 %v1541_v59, %v3530_v26  ;;  %v3725_v54 = vmul.f32 %v1159_v63, %v3530_v26 }
 0x256   : > { %v705_v8 = vpop.f32.mrf.mxu1  ;;  %v3728_v55 = vmul.f32 %v964_v2, %v3530_v26 }
 0x257   : > { %v3538_v28 = vadd.f32 %v750_v9, %v705_v8  ;;  %v3680_v9 = vld [vmem:[#allocation13 + $0x27] ss:$8 sm:$0xf]  ;;  %v3689_v8 = vrot.slane %v1349_v56, %v3561_v36  ;;  %5207 = vst [vmem:[#allocation36_spill] sm:$0xff] %v3719_v52  ;;  %5208 = vst [vmem:[#allocation37_spill] sm:$0xff] %v3722_v53  ;;  %v3818_v52 = vrot.slane %v3622_v60, %v3527_v24 }
 0x258   : > { %v3541_v30 = vpop.f32.mrf.mxu1  ;;  %5209 = vst [vmem:[#allocation38_spill] sm:$0xff] %v3725_v54  ;;  %5210 = vst [vmem:[#allocation39_spill] sm:$0xff] %v3728_v55 }
 0x259   : > { %5195 = vst [vmem:[#allocation24_spill] sm:$0xff] %v3541_v30  ;;  %839 = vrot.lane.b32.xlu0 %v3530_v26, %s3201_s29  ;;  %841 = vrot.lane.b32.xlu1 %v3538_v28, %s3201_s29  ;;  %5205 = vst [vmem:[#allocation34_spill] sm:$0xff] %v3689_v8  ;;  %v3749_v30 = vld [vmem:[#allocation13 + $0x5] ss:$8 sm:$0xf]  ;;  %v3758_v23 = vmul.f32 %v1159_v63, %v3538_v28 }
 0x25a   : > { %v711_v31 = vpop.f32.mrf.mxu1  ;;  %5222 = vst [vmem:[#allocation51_spill] sm:$0xff] %v3818_v52  ;;  %v3842_v52 = vrot.slane %v3624_v61, %v3527_v24 }
 0x25b   : > { %v3547_v32 = vadd.f32 %v754_v29, %v711_v31  ;;  %v3696_v31 = vrot.slane %v3634_v10, %v3532_v27  ;;  %5214 = vst [vmem:[#allocation43_spill] sm:$0xff] %v3758_v23 }
 0x25c   : > { %v3549_v33 = vpop.f32.mrf.mxu1  ;;  %5228 = vst [vmem:[#allocation57_spill] sm:$0xff] %v3842_v52  ;;  %v3866_v52 = vrot.slane %v3680_v9, %v3561_v36 }
 0x25d   : > { %5196 = vst [vmem:[#allocation25_spill] sm:$0xff] %v3549_v33  ;;  %814 = vrot.lane.b32.xlu0 %v3538_v28, %s3200_s28  ;;  %816 = vrot.lane.b32.xlu1 %v3547_v32, %s3200_s28  ;;  %v3755_v33 = vld [vmem:[#allocation13 + $0x21] ss:$8 sm:$0xf]  ;;  %v3792_v23 = vmul.f32 %v3627_v4, %v3547_v32  ;;  %v3810_v54 = vmul.f32 %v3639_v1, %v3547_v32 }
 0x25e   : > { %v717_v34 = vpop.f32.mrf.mxu1  ;;  %5233 = vst [vmem:[#allocation62_spill] sm:$0xff] %v3866_v52 }
 0x25f   : > { %v3563_v38 = vadd.f32 %v754_v29, %v717_v34  ;;  %v3692_v29 = vrot.slane %v1349_v56, %v3565_v39  ;;  %v3700_v34 = vrot.slane %v3636_v17, %v3532_v27  ;;  %v3731_v56 = vmul.f32 %v1736_v58, %v3538_v28  ;;  %5220 = vst [vmem:[#allocation49_spill] sm:$0xff] %v3810_v54 }
 0x260   : > { %v3555_v35 = vpop.f32.mrf.mxu1  ;;  %v3753_v58 = vrot.slane %v3680_v9, %v3532_v27  ;;  %v3834_v54 = vrot.slane %v3680_v9, %v3527_v24 }
 0x261   : > { %5197 = vst [vmem:[#allocation26_spill] sm:$0xff] %v3555_v35  ;;  %866 = vrot.lane.b32.xlu0 %v3538_v28, %s3202_s17  ;;  %843 = vrot.lane.b32.xlu1 %v3547_v32, %s3201_s29  ;;  %5206 = vst [vmem:[#allocation35_spill] sm:$0xff] %v3692_v29 }
 0x262   : > { %v723_v37 = vpop.f32.mrf.mxu1  ;;  %5211 = vst [vmem:[#allocation40_spill] sm:$0xff] %v3731_v56  ;;  %v3794_v56 = vld [vmem:[#allocation13] ss:$8 sm:$0xf]  ;;  %5226 = vst [vmem:[#allocation55_spill] sm:$0xff] %v3834_v54 }
 0x263   : > { %v3601_v51 = vadd.f32 %v758_v41, %v723_v37  ;;  %v3704_v37 = vrot.slane %v3648_v5, %v3532_v27  ;;  %v3814_v53 = vrot.slane %v3794_v56, %v3527_v24  ;;  %v3858_v54 = vrot.slane %v3794_v56, %v3561_v36 }
 0x264   : > { %v3567_v40 = vpop.f32.mrf.mxu1 }
 0x265   : > { %5200 = vst [vmem:[#allocation29_spill] sm:$0xff] %v3567_v40  ;;  %845 = vrot.lane.b32.xlu1 %v3563_v38, %s3201_s29  ;;  %818 = vrot.lane.b32.xlu0 %v3563_v38, %s3200_s28  ;;  %v3743_v40 = vmul.f32 %v1354_v18, %v3530_v26  ;;  %5221 = vst [vmem:[#allocation50_spill] sm:$0xff] %v3814_v53  ;;  %v3838_v53 = vrot.slane %v3648_v5, %v3527_v24 }
 0x266   : > { %v729_v42 = vpop.f32.mrf.mxu1  ;;  %5231 = vst [vmem:[#allocation60_spill] sm:$0xff] %v3858_v54  ;;  %v3882_v54 = vrot.slane %v3794_v56, %v3532_v27  ;;  %v3890_v52 = vmul.f32 %v3642_v11, %v3601_v51 }
 0x267   : > { %v3574_v43 = vadd.f32 %v758_v41, %v729_v42  ;;  %v3708_v41 = vrot.slane %v3650_v13, %v3532_v27  ;;  %v3710_v42 = vld [vmem:[#allocation13 + $0x3] ss:$8 sm:$0xf]  ;;  %5213 = vst [vmem:[#allocation42_spill] sm:$0xff] %v3743_v40  ;;  %5227 = vst [vmem:[#allocation56_spill] sm:$0xff] %v3838_v53  ;;  %v3862_v53 = vrot.slane %v3749_v30, %v3561_v36 }
 0x268   : > { %v3577_v45 = vpop.f32.mrf.mxu1  ;;  %v3747_v35 = vrot.slane %v3710_v42, %v3527_v24  ;;  %5237 = vst [vmem:[#allocation66_spill] sm:$0xff] %v3890_v52  ;;  %v3914_v52 = vmul.f32 %v3662_v20, %v3547_v32 }
 0x269   : > { %5201 = vst [vmem:[#allocation30_spill] sm:$0xff] %v3574_v43  ;;  %5202 = vst [vmem:[#allocation31_spill] sm:$0xff] %v3577_v45  ;;  %870 = vrot.lane.b32.xlu0 %v3563_v38, %s3202_s17  ;;  %874 = vrot.lane.b32.xlu1 %v3574_v43, %s3202_s17  ;;  %v3737_v45 = vld [vmem:[#allocation13 + $0x43] ss:$8 sm:$0xf] }
 0x26a   : > { %v735_v46 = vpop.f32.mrf.mxu1  ;;  %5232 = vst [vmem:[#allocation61_spill] sm:$0xff] %v3862_v53  ;;  %v3886_v53 = vmul.f32 %v3639_v1, %v3563_v38  ;;  %v3906_v1 = vmul.f32 %v3674_v16, %v3601_v51  ;;  %5242 = vst [vmem:[#allocation71_spill] sm:$0xff] %v3914_v52  ;;  %v3978_v52 = vrot.slane %v3622_v60, %v3565_v39 }
 0x26b   : > { %v3583_v47 = vadd.f32 %v762_v44, %v735_v46  ;;  %v3714_v46 = vld [vmem:[#allocation13 + $0x42] ss:$8 sm:$0xf] }
 0x26c   : > { %v3585_v48 = vpop.f32.mrf.mxu1  ;;  %v3769_v40 = vrot.slane %v3714_v46, %v3527_v24  ;;  %5236 = vst [vmem:[#allocation65_spill] sm:$0xff] %v3886_v53  ;;  %5240 = vst [vmem:[#allocation69_spill] sm:$0xff] %v3906_v1  ;;  %v3910_v53 = vmul.f32 %v3642_v11, %v3574_v43  ;;  %v3931_v11 = vmul.f32 %v3645_v12, %v3574_v43 }
 0x26d   : > { %5203 = vst [vmem:[#allocation32_spill] sm:$0xff] %v3585_v48  ;;  %822 = vrot.lane.b32.xlu1 %v3574_v43, %s3200_s28  ;;  %824 = vrot.lane.b32.xlu0 %v3583_v47, %s3200_s28  ;;  %v3740_v48 = vmul.f32 %v1541_v59, %v3538_v28  ;;  %v3761_v59 = vmul.f32 %v964_v2, %v3538_v28 }
 0x26e   : > { %v741_v49 = vpop.f32.mrf.mxu1  ;;  %5216 = vst [vmem:[#allocation45_spill] sm:$0xff] %v3769_v40  ;;  %v3784_v2 = vmul.f32 %v3618_v57, %v3547_v32  ;;  %v3826_v40 = vrot.slane %v3634_v10, %v3527_v24  ;;  %5241 = vst [vmem:[#allocation70_spill] sm:$0xff] %v3910_v53  ;;  %v4032_v53 = vrot.slane %v3710_v42, %v3561_v36 }
 0x26f   : > { %v3591_v50 = vadd.f32 %v762_v44, %v741_v49  ;;  %v3712_v44 = vld [vmem:[#allocation13 + $0x20] ss:$8 sm:$0xf]  ;;  %v3716_v49 = vld [vmem:[#allocation13 + $0x47] ss:$8 sm:$0xf] }
 0x270   : > { %5212 = vst [vmem:[#allocation41_spill] sm:$0xff] %v3740_v48  ;;  %5215 = vst [vmem:[#allocation44_spill] sm:$0xff] %v3761_v59  ;;  %v3773_v55 = vrot.slane %v3716_v49, %v3527_v24  ;;  %v3776_v48 = vmul.f32 %v1354_v18, %v3538_v28  ;;  %v3780_v63 = vrot.slane %v3716_v49, %v3532_v27 }
 0x271   : > { %5204 = vst [vmem:[#allocation33_spill] sm:$0xff] %v3591_v50  ;;  %851 = vrot.lane.b32.xlu1 %v3583_v47, %s3201_s29  ;;  %826 = vrot.lane.b32.xlu0 %v3591_v50, %s3200_s28  ;;  %v3788_v59 = vrot.slane %v3737_v45, %v3527_v24  ;;  %v3798_v28 = vrot.slane %v3749_v30, %v3532_v27  ;;  %5224 = vst [vmem:[#allocation53_spill] sm:$0xff] %v3826_v40 }
 0x272   : > { %5217 = vst [vmem:[#allocation46_spill] sm:$0xff] %v3773_v55  ;;  %5218 = vst [vmem:[#allocation47_spill] sm:$0xff] %v3776_v48  ;;  %v3802_v18 = vrot.slane %v3755_v33, %v3527_v24  ;;  %v3806_v48 = vmul.f32 %v3630_v62, %v3547_v32  ;;  %v3822_v55 = vrot.slane %v3749_v30, %v3527_v24 }
 0x273   : > { %v3850_v40 = vmul.f32 %v3618_v57, %v3563_v38  ;;  %v3870_v57 = vrot.slane %v3624_v61, %v3561_v36  ;;  %v3927_v1 = vrot.slane %v3712_v44, %v3532_v27  ;;  %5245 = vst [vmem:[#allocation74_spill] sm:$0xff] %v3931_v11  ;;  %v1279_v11 = vld [vmem:[#allocation13 + $0x22] ss:$8 sm:$0xf]  ;;  %5260 = vst [vmem:[#allocation89_spill] sm:$0xff] %v4032_v53 }
 0x274   : > { %5219 = vst [vmem:[#allocation48_spill] sm:$0xff] %v3806_v48  ;;  %5223 = vst [vmem:[#allocation52_spill] sm:$0xff] %v3822_v55  ;;  %v3830_v48 = vrot.slane %v3636_v17, %v3527_v24  ;;  %v3846_v55 = vrot.slane %v3650_v13, %v3527_v24  ;;  %v4095_v53 = vrot.slane %v3755_v33, %v3565_v39 }
 0x275   : > { %853 = vrot.lane.b32.xlu1 %v3591_v50, %s3201_s29  ;;  %868 = vrot.lane.b32.xlu0 %v3547_v32, %s3202_s17  ;;  %5234 = vst [vmem:[#allocation63_spill] sm:$0xff] %v3870_v57  ;;  %v3918_v57 = vmul.f32 %v3662_v20, %v3563_v38  ;;  %v3935_v32 = vmul.f32 %v3659_v14, %v3574_v43 }
 0x276   : > { %5225 = vst [vmem:[#allocation54_spill] sm:$0xff] %v3830_v48  ;;  %5229 = vst [vmem:[#allocation58_spill] sm:$0xff] %v3846_v55  ;;  %v3854_v48 = vrot.slane %v3686_v6, %v3532_v27  ;;  %v3874_v55 = vmul.f32 %v3627_v4, %v3563_v38  ;;  %v3894_v4 = vrot.slane %v3714_v46, %v3532_v27 }
 0x277   : > { %5243 = vst [vmem:[#allocation72_spill] sm:$0xff] %v3918_v57  ;;  %5246 = vst [vmem:[#allocation75_spill] sm:$0xff] %v3935_v32  ;;  %v3945_v20 = vrot.slane %v3737_v45, %v3532_v27  ;;  %v3973_v57 = vmul.f32 %v3692_v29, %v3583_v47  ;;  %v3994_v29 = vrot.slane %v3636_v17, %v3565_v39 }
 0x278   : > { %5230 = vst [vmem:[#allocation59_spill] sm:$0xff] %v3854_v48  ;;  %v3878_v48 = vmul.f32 %v3630_v62, %v3563_v38  ;;  %v3898_v62 = vmul.f32 %v3645_v12, %v3601_v51  ;;  %v3939_v38 = vmul.f32 %v3674_v16, %v3574_v43  ;;  %v3953_v12 = vmul.f32 %v3653_v19, %v3583_v47 }
 0x279   : > { %872 = vrot.lane.b32.xlu1 %v3601_v51, %s3202_s17  ;;  %864 = vrot.lane.b32.xlu0 %v3530_v26, %s3202_s17  ;;  %v3765_v26 = vrot.slane %v3712_v44, %v3527_v24  ;;  %5248 = vst [vmem:[#allocation77_spill] sm:$0xff] %v3945_v20  ;;  %v3961_v16 = vrot.slane %v3622_v60, %v3561_v36  ;;  %5253 = vst [vmem:[#allocation82_spill] sm:$0xff] %v3973_v57 }
 0x27a   : > { %5235 = vst [vmem:[#allocation64_spill] sm:$0xff] %v3878_v48  ;;  %5238 = vst [vmem:[#allocation67_spill] sm:$0xff] %v3898_v62  ;;  %v3902_v48 = vmul.f32 %v3659_v14, %v3601_v51  ;;  %v3922_v62 = vmul.f32 %v3689_v8, %v3601_v51  ;;  %v3949_v8 = vrot.slane %v3755_v33, %v3532_v27 }
 0x27b   : > { %5247 = vst [vmem:[#allocation76_spill] sm:$0xff] %v3939_v38  ;;  %5249 = vst [vmem:[#allocation78_spill] sm:$0xff] %v3953_v12  ;;  %v3957_v14 = vmul.f32 %v3656_v3, %v3583_v47  ;;  %v3982_v38 = vrot.slane %v3634_v10, %v3561_v36  ;;  %v3998_v60 = vrot.slane %v3648_v5, %v3561_v36  ;;  %v4028_v12 = vld [vmem:[#allocation13 + $0x26] ss:$8 sm:$0xf] }
 0x27c   : > { %5239 = vst [vmem:[#allocation68_spill] sm:$0xff] %v3902_v48  ;;  %5244 = vst [vmem:[#allocation73_spill] sm:$0xff] %v3922_v62  ;;  %v3969_v62 = vmul.f32 %v3671_v21, %v3583_v47  ;;  %v4002_v57 = vrot.slane %v3648_v5, %v3565_v39  ;;  %v4022_v5 = vmul.f32 %v3656_v3, %v3591_v50 }
 0x27d   : > { %820 = vrot.lane.b32.xlu1 %v3601_v51, %s3200_s28  ;;  %849 = vrot.lane.b32.xlu0 %v3574_v43, %s3201_s29  ;;  %5250 = vst [vmem:[#allocation79_spill] sm:$0xff] %v3957_v14  ;;  %v3965_v43 = vmul.f32 %v3668_v15, %v3583_v47  ;;  %5255 = vst [vmem:[#allocation84_spill] sm:$0xff] %v3994_v29  ;;  %v4018_v29 = vmul.f32 %v3653_v19, %v3591_v50 }
 0x27e   : > { %5252 = vst [vmem:[#allocation81_spill] sm:$0xff] %v3969_v62  ;;  %v3990_v62 = vrot.slane %v3636_v17, %v3561_v36  ;;  %v4014_v17 = vrot.slane %v3650_v13, %v3565_v39  ;;  %5257 = vst [vmem:[#allocation86_spill] sm:$0xff] %v4022_v5  ;;  %v4026_v14 = vmul.f32 %v3668_v15, %v3591_v50 }
 0x27f   : > { %5251 = vst [vmem:[#allocation80_spill] sm:$0xff] %v3965_v43  ;;  %v3986_v43 = vrot.slane %v3634_v10, %v3565_v39  ;;  %v4006_v10 = vrot.slane %v3650_v13, %v3561_v36  ;;  %5256 = vst [vmem:[#allocation85_spill] sm:$0xff] %v4018_v29  ;;  %v4036_v13 = vrot.slane %v3712_v44, %v3561_v36 }
 0x280   : > { %5254 = vst [vmem:[#allocation83_spill] sm:$0xff] %v3990_v62  ;;  %5258 = vst [vmem:[#allocation87_spill] sm:$0xff] %v4026_v14  ;;  %v4043_v3 = vmul.f32 %v3671_v21, %v3591_v50  ;;  %v4047_v15 = vrot.slane %v3714_v46, %v3561_v36  ;;  %v4051_v14 = vrot.slane %v3716_v49, %v3561_v36 }
 0x281   : > { %847 = vrot.lane.b32.xlu1 %v3601_v51, %s3201_s29  ;;  %878 = vrot.lane.b32.xlu0 %v3591_v50, %s3202_s17  ;;  %5259 = vst [vmem:[#allocation88_spill] sm:$0xff] %v4028_v12  ;;  %5261 = vst [vmem:[#allocation90_spill] sm:$0xff] %v4036_v13  ;;  %v4055_v5 = vrot.slane %v3710_v42, %v3532_v27  ;;  %v4062_v13 = vrot.slane %v3686_v6, %v3565_v39  ;;  %v4068_v50 = vld [vmem:[#allocation13 + $0x25] ss:$8 sm:$0xf] }
 0x282   : > { %5263 = vst [vmem:[#allocation92_spill] sm:$0xff] %v4043_v3  ;;  %5264 = vst [vmem:[#allocation93_spill] sm:$0xff] %v4047_v15  ;;  %v4066_v21 = vrot.slane %v3737_v45, %v3565_v39  ;;  %v4072_v3 = vrot.slane %v4028_v12, %v3527_v24  ;;  %v4091_v15 = vrot.slane %v3680_v9, %v3565_v39 }
 0x283   : > { %5265 = vst [vmem:[#allocation94_spill] sm:$0xff] %v4051_v14  ;;  %5266 = vst [vmem:[#allocation95_spill] sm:$0xff] %v4055_v5  ;;  %v4075_v14 = vrot.slane %v1279_v11, %v3532_v27  ;;  %v4099_v62 = vrot.slane %v3716_v49, %v3565_v39  ;;  %v4111_v9 = vrot.slane %v3755_v33, %v3561_v36 }
 0x284   : > { %5268 = vst [vmem:[#allocation97_spill] sm:$0xff] %v4062_v13  ;;  %5269 = vst [vmem:[#allocation98_spill] sm:$0xff] %v4066_v21  ;;  %v4083_v13 = vrot.slane %v3624_v61, %v3565_v39  ;;  %v4087_v21 = vrot.slane %v3686_v6, %v3561_v36  ;;  %v4103_v61 = vrot.slane %v3737_v45, %v3561_v36 }
 0x285   : > { %876 = vrot.lane.b32.xlu1 %v3583_v47, %s3202_s17  ;;  %v1037_v47 = vld [vmem:[#allocation13 + $0x4] ss:$8 sm:$0xf]  ;;  %5270 = vst [vmem:[#allocation99_spill] sm:$0xff] %v4068_v50  ;;  %5271 = vst [vmem:[#allocation100_spill] sm:$0xff] %v4072_v3  ;;  %v4107_v6 = vrot.slane %v3749_v30, %v3565_v39  ;;  %v4120_v49 = vrot.slane %v3714_v46, %v3565_v39  ;;  %v4127_v30 = vrot.slane %v4068_v50, %v3527_v24 }
 0x286   : > { %v4039_v19 = vrot.slane %v1037_v47, %v3527_v24  ;;  %v4058_v29 = vrot.slane %v1037_v47, %v3532_v27  ;;  %5272 = vst [vmem:[#allocation101_spill] sm:$0xff] %v4075_v14  ;;  %5273 = vst [vmem:[#allocation102_spill] sm:$0xff] %v4083_v13  ;;  %v4123_v45 = vrot.slane %v1037_v47, %v3565_v39 }
 0x287   : > { %5274 = vst [vmem:[#allocation103_spill] sm:$0xff] %v4087_v21  ;;  %5275 = vst [vmem:[#allocation104_spill] sm:$0xff] %v4091_v15  ;;  %v4131_v33 = vrot.slane %v3712_v44, %v3565_v39  ;;  %v4141_v46 = vrot.slane %v1279_v11, %v3527_v24  ;;  %v4153_v44 = vrot.slane %v4068_v50, %v3532_v27 }
 0x288   : > { %5262 = vst [vmem:[#allocation91_spill] sm:$0xff] %v4039_v19  ;;  %5267 = vst [vmem:[#allocation96_spill] sm:$0xff] %v4058_v29 }
 0x289   : > { %5276 = vst [vmem:[#allocation105_spill] sm:$0xff] %v4095_v53  ;;  %5277 = vst [vmem:[#allocation106_spill] sm:$0xff] %v4099_v62 }
 0x28a   : > { %5278 = vst [vmem:[#allocation107_spill] sm:$0xff] %v4103_v61  ;;  %5279 = vst [vmem:[#allocation108_spill] sm:$0xff] %v4107_v6  ;;  %v4138_v6 = vrot.slane %v1037_v47, %v3561_v36  ;;  %v4160_v47 = vrot.slane %v1279_v11, %v3561_v36 }
 0x28b   : > { %5280 = vst [vmem:[#allocation109_spill] sm:$0xff] %v4111_v9  ;;  %5281 = vst [vmem:[#allocation110_spill] sm:$0xff] %v4120_v49  ;;  %v4135_v9 = vrot.slane %v3794_v56, %v3565_v39  ;;  %v4157_v56 = vrot.slane %v4028_v12, %v3532_v27 }
 0x28c   : > { %5282 = vst [vmem:[#allocation111_spill] sm:$0xff] %v4123_v45  ;;  %5283 = vst [vmem:[#allocation112_spill] sm:$0xff] %v4127_v30  ;;  %v4149_v30 = vrot.slane %v3710_v42, %v3565_v39  ;;  %v4169_v42 = vrot.slane %v4068_v50, %v3561_v36 }
 0x28d   : > { %5284 = vst [vmem:[#allocation113_spill] sm:$0xff] %v4131_v33  ;;  %5285 = vst [vmem:[#allocation114_spill] sm:$0xff] %v4135_v9 }
 0x28e   : > { %5286 = vst [vmem:[#allocation115_spill] sm:$0xff] %v4138_v6  ;;  %5287 = vst [vmem:[#allocation116_spill] sm:$0xff] %v4141_v46 }
 0x28f   : > { %5290 = vst [vmem:[#allocation119_spill] sm:$0xff] %v4149_v30  ;;  %5291 = vst [vmem:[#allocation120_spill] sm:$0xff] %v4153_v44  ;;  %v4172_v44 = vrot.slane %v1279_v11, %v3565_v39 }
 0x290   : > { %5292 = vst [vmem:[#allocation121_spill] sm:$0xff] %v4157_v56  ;;  %5293 = vst [vmem:[#allocation122_spill] sm:$0xff] %v4160_v47 }
 0x291   : > { %5294 = vst [vmem:[#allocation123_spill] sm:$0xff] %v4169_v42  ;;  %5295 = vst [vmem:[#allocation124_spill] sm:$0xff] %v4172_v44 }
 0x2c7   : > { %v3941_v51 = vpop.permute.xlu0 %812 }
 0x2cb   : > { %v4008_v48 = vpop.permute.xlu0 %839  ;;  %v4010_v32 = vpop.permute.xlu1 %841 }
 0x2cf   : > { %v4077_v5 = vpop.permute.xlu0 %814  ;;  %v4079_v29 = vpop.permute.xlu1 %816 }
 0x2d0   : > { %v835_v53 = vsel %vm830_vm0, %v3941_v51, %v4079_v29 }
 0x2d1   : > { %v1684_v46 = vmul.f32 %v3684_v25, %v835_v53  ;;  %v1302_v56 = vmul.f32 %v4075_v14, %v835_v53  ;;  %v4181_v9 = vmul.f32 %v3735_v0, %v835_v53  ;;  %v1489_v36 = vmul.f32 %v3753_v58, %v835_v53 }
 0x2d2   : > { %v4187_v50 = vmul.f32 %v3788_v59, %v835_v53  ;;  %v1107_v39 = vmul.f32 %v3798_v28, %v835_v53  ;;  %v4191_v44 = vmul.f32 %v3802_v18, %v835_v53  ;;  %v912_v49 = vmul.f32 %v3882_v54, %v835_v53 }
 0x2d3   : > { %v4143_v61 = vpop.permute.xlu0 %866  ;;  %v4145_v45 = vpop.permute.xlu1 %843  ;;  %5296 = vst [vmem:[#allocation125_spill] sm:$0xff] %v4181_v9  ;;  %v4206_v15 = vmul.f32 %v4039_v19, %v835_v53 }
 0x2d4   : > { %5288 = vst [vmem:[#allocation117_spill] sm:$0xff] %v4143_v61  ;;  %5289 = vst [vmem:[#allocation118_spill] sm:$0xff] %v4145_v45  ;;  %v860_v24 = vsel %vm855_vm1, %v4008_v48, %v4145_v45 }
 0x2d5   : > { %v1138_v27 = vmul.f32 %v3696_v31, %v860_v24  ;;  %v1333_v12 = vmul.f32 %v3700_v34, %v860_v24  ;;  %v1520_v47 = vmul.f32 %v3704_v37, %v860_v24  ;;  %v943_v6 = vmul.f32 %v3678_v22, %v860_v24  ;;  %5297 = vst [vmem:[#allocation126_spill] sm:$0xff] %v4187_v50 }
 0x2d6   : > { %v1715_v30 = vmul.f32 %v3708_v41, %v860_v24  ;;  %5298 = vst [vmem:[#allocation127_spill] sm:$0xff] %v4191_v44  ;;  %5301 = vst [vmem:[#allocation130_spill] sm:$0xff] %v4206_v15 }
 0x2d7   : > { %v4184_v42 = vpop.permute.xlu1 %845  ;;  %v819_v11 = vpop.permute.xlu0 %818  ;;  %v4193_v14 = vadd.f32 %v1333_v12, %v1302_v56  ;;  %v1528_v62 = vadd.f32 %v1520_v47, %v1489_v36  ;;  %v1146_v13 = vadd.f32 %v1138_v27, %v1107_v39  ;;  %v4209_v12 = vmul.f32 %v4072_v3, %v835_v53  ;;  %v5324_v3 = vld [vmem:[#allocation50_spill] sm:$0xff] }
 0x2d8   : > { %v861_v24 = vsel %vm855_vm1, %v4010_v32, %v4184_v42  ;;  %v4202_v33 = vsel %vm830_vm0, %v4077_v5, %v819_v11  ;;  %v1723_v21 = vadd.f32 %v1715_v30, %v1684_v46  ;;  %v4215_v50 = vadd.f32 %v943_v6, %v912_v49 }
 0x2d9   : > { %5299 = vst [vmem:[#allocation128_spill] sm:$0xff] %v4193_v14  ;;  %5300 = vst [vmem:[#allocation129_spill] sm:$0xff] %v4202_v33  ;;  %v1524_v56 = vmul.f32 %v3704_v37, %v861_v24  ;;  %v1719_v14 = vmul.f32 %v3708_v41, %v861_v24  ;;  %v1688_v44 = vmul.f32 %v3684_v25, %v4202_v33 }
 0x2da   : > { %5302 = vst [vmem:[#allocation131_spill] sm:$0xff] %v4209_v12  ;;  %5303 = vst [vmem:[#allocation132_spill] sm:$0xff] %v4215_v50  ;;  %v4218_v9 = vmul.f32 %v3678_v22, %v861_v24  ;;  %v1142_v15 = vmul.f32 %v3696_v31, %v861_v24  ;;  %v4222_v36 = vmul.f32 %v3700_v34, %v861_v24  ;;  %v5330_v50 = vld [vmem:[#allocation61_spill] sm:$0xff] }
 0x2db   : > { %v871_v27 = vpop.permute.xlu0 %870  ;;  %v4224_v39 = vpop.permute.xlu1 %874  ;;  %v1493_v37 = vmul.f32 %v3753_v58, %v4202_v33  ;;  %v1727_v31 = vadd.f32 %v1719_v14, %v1688_v44  ;;  %v1111_v34 = vmul.f32 %v3798_v28, %v4202_v33  ;;  %v4242_v41 = vmul.f32 %v3735_v0, %v4202_v33 }
 0x2dc   : > { %5304 = vst [vmem:[#allocation133_spill] sm:$0xff] %v4218_v9  ;;  %5305 = vst [vmem:[#allocation134_spill] sm:$0xff] %v4222_v36  ;;  %v4231_v25 = vsel %vm880_vm2, %v4143_v61, %v871_v27  ;;  %v4236_v22 = vsel %vm880_vm2, %v871_v27, %v4224_v39  ;;  %v4245_v53 = vadd.f32 %v3784_v2, %v1723_v21 }
 0x2dd   : > { %5306 = vst [vmem:[#allocation135_spill] sm:$0xff] %v4224_v39  ;;  %5307 = vst [vmem:[#allocation136_spill] sm:$0xff] %v4231_v25  ;;  %v4249_v58 = vmul.f32 %v3788_v59, %v4202_v33  ;;  %v4252_v6 = vadd.f32 %v3792_v23, %v1528_v62  ;;  %v1766_v49 = vadd.f32 %v3850_v40, %v1727_v31  ;;  %v5316_v23 = vld [vmem:[#allocation45_spill] sm:$0xff]  ;;  %v5318_v40 = vld [vmem:[#allocation46_spill] sm:$0xff] }
 0x2de   : > { %5308 = vst [vmem:[#allocation137_spill] sm:$0xff] %v4236_v22  ;;  %5309 = vst [vmem:[#allocation138_spill] sm:$0xff] %v4242_v41  ;;  %v1797_v14 = vmul.f32 %v3780_v63, %v4236_v22  ;;  %v1532_v28 = vadd.f32 %v1524_v56, %v1493_v37  ;;  %v4259_v0 = vmul.f32 %v3802_v18, %v4202_v33  ;;  %v5321_v37 = vld [vmem:[#allocation48_spill] sm:$0xff]  ;;  %v5338_v39 = vld [vmem:[#allocation54_spill] sm:$0xff] }
 0x2df   : > { %5310 = vst [vmem:[#allocation139_spill] sm:$0xff] %v4245_v53  ;;  %5311 = vst [vmem:[#allocation140_spill] sm:$0xff] %v4249_v58  ;;  %v4263_v2 = vmul.f32 %v3747_v35, %v4231_v25  ;;  %v4267_v59 = vmul.f32 %v3765_v26, %v4231_v25  ;;  %v4271_v62 = vmul.f32 %v5316_v23, %v4231_v25  ;;  %v823_v30 = vpop.permute.xlu1 %822  ;;  %v4277_v46 = vpop.permute.xlu0 %824  ;;  %v5334_v58 = vld [vmem:[#allocation56_spill] sm:$0xff] }
 0x2e0   : > { %5312 = vst [vmem:[#allocation141_spill] sm:$0xff] %v4252_v6  ;;  %5313 = vst [vmem:[#allocation142_spill] sm:$0xff] %v4259_v0  ;;  %v4275_v21 = vmul.f32 %v5318_v40, %v4231_v25  ;;  %v4281_v18 = vsel %vm830_vm0, %v819_v11, %v823_v30  ;;  %v4287_v44 = vsel %vm830_vm0, %v4277_v46, %v3941_v51  ;;  %v5325_v51 = vld [vmem:[#allocation52_spill] sm:$0xff]  ;;  %v5326_v25 = vld [vmem:[#allocation59_spill] sm:$0xff] }
 0x2e1   : > { %5314 = vst [vmem:[#allocation143_spill] sm:$0xff] %v4263_v2  ;;  %5315 = vst [vmem:[#allocation144_spill] sm:$0xff] %v4267_v59  ;;  %v1602_v47 = vmul.f32 %v3894_v4, %v4236_v22  ;;  %v1150_v24 = vadd.f32 %v1142_v15, %v1111_v34  ;;  %v1805_v56 = vadd.f32 %v1797_v14, %v1766_v49  ;;  %v5333_v59 = vld [vmem:[#allocation53_spill] sm:$0xff] }
 0x2e2   : > { %5317 = vst [vmem:[#allocation45_spill] sm:$0xff] %v4271_v62  ;;  %5319 = vst [vmem:[#allocation46_spill] sm:$0xff] %v4275_v21  ;;  %v1220_v27 = vmul.f32 %v3927_v1, %v4236_v22  ;;  %v4294_v31 = vadd.f32 %v5321_v37, %v1146_v13  ;;  %v4298_v11 = vmul.f32 %v3882_v54, %v4202_v33  ;;  %v5327_v13 = vld [vmem:[#allocation55_spill] sm:$0xff]  ;;  %v5328_v37 = vld [vmem:[#allocation57_spill] sm:$0xff] }
 0x2e3   : > { %5320 = vst [vmem:[#allocation145_spill] sm:$0xff] %v4287_v44  ;;  %v911_v12 = vmul.f32 %v5324_v3, %v4287_v44  ;;  %v1106_v36 = vmul.f32 %v5325_v51, %v4287_v44  ;;  %v1836_v15 = vmul.f32 %v5326_v25, %v4281_v18  ;;  %v1571_v34 = vadd.f32 %v3874_v55, %v1532_v28  ;;  %v4307_v49 = vpop.permute.xlu1 %851  ;;  %v827_v19 = vpop.permute.xlu0 %826  ;;  %v5329_v33 = vld [vmem:[#allocation60_spill] sm:$0xff]  ;;  %v5331_v22 = vld [vmem:[#allocation62_spill] sm:$0xff]  ;;  %v5335_v25 = vld [vmem:[#allocation63_spill] sm:$0xff] }
 0x2e4   : > { %5322 = vst [vmem:[#allocation48_spill] sm:$0xff] %v4294_v31  ;;  %5323 = vst [vmem:[#allocation146_spill] sm:$0xff] %v4298_v11  ;;  %v1488_v14 = vmul.f32 %v5327_v13, %v4287_v44  ;;  %v1683_v54 = vmul.f32 %v5328_v37, %v4287_v44  ;;  %v4315_v2 = vmul.f32 %v5329_v33, %v4281_v18  ;;  %v5332_v11 = vld [vmem:[#allocation51_spill] sm:$0xff] }
 0x2e5   : > { %v4319_v0 = vmul.f32 %v5330_v50, %v4281_v18  ;;  %v862_v55 = vsel %vm855_vm1, %v4307_v49, %v4008_v48  ;;  %v4328_v28 = vsel %vm830_vm0, %v827_v19, %v4077_v5  ;;  %v1844_v44 = vadd.f32 %v1836_v15, %v1805_v56  ;;  %v5336_v48 = vld [vmem:[#allocation58_spill] sm:$0xff]  ;;  %v5337_v15 = vld [vmem:[#allocation64_spill] sm:$0xff] }
 0x2e6   : > { %v4332_v9 = vmul.f32 %v5331_v22, %v4281_v18  ;;  %v942_v31 = vmul.f32 %v5332_v11, %v862_v55  ;;  %v1137_v6 = vmul.f32 %v5333_v59, %v862_v55  ;;  %v1519_v62 = vmul.f32 %v5334_v58, %v862_v55 }
 0x2e7   : > { %v4339_v53 = vmul.f32 %v5335_v25, %v4281_v18  ;;  %v1714_v41 = vmul.f32 %v5336_v48, %v862_v55  ;;  %1912 = vmatprep.subr.mxu1 %v1844_v44  ;;  %v1610_v5 = vadd.f32 %v1602_v47, %v1571_v34  ;;  %v1641_v56 = vmul.f32 %v3945_v20, %v4281_v18  ;;  %v854_v45 = vpop.permute.xlu1 %853  ;;  %v869_v47 = vpop.permute.xlu0 %868 }
 0x2e8   : > { %v1189_v61 = vadd.f32 %v5337_v15, %v1150_v24  ;;  %v4346_v21 = vmul.f32 %v5338_v39, %v862_v55  ;;  %v4350_v22 = vsel %vm830_vm0, %v823_v30, %v827_v19  ;;  %v915_v25 = vmul.f32 %v5324_v3, %v4328_v28 }
 0x2e9   : > { %v1110_v44 = vmul.f32 %v5325_v51, %v4328_v28  ;;  %v4356_v34 = vadd.f32 %v942_v31, %v911_v12  ;;  %v1722_v20 = vadd.f32 %v1714_v41, %v1683_v54  ;;  %v863_v24 = vsel %vm855_vm1, %v854_v45, %v4010_v32 }
 0x2ea   : > { %5339 = vst [vmem:[#allocation50_spill] sm:$0xff] %v4346_v21  ;;  %v1492_v55 = vmul.f32 %v5327_v13, %v4328_v28  ;;  %v1145_v19 = vadd.f32 %v1137_v6, %v1106_v36  ;;  %v1527_v30 = vadd.f32 %v1519_v62, %v1488_v14  ;;  %v1141_v15 = vmul.f32 %v5333_v59, %v863_v24 }
 0x2eb   : > { %v1523_v3 = vmul.f32 %v5334_v58, %v863_v24  ;;  %v946_v21 = vmul.f32 %v5332_v11, %v863_v24  ;;  %v1687_v12 = vmul.f32 %v5328_v37, %v4328_v28  ;;  %v1718_v41 = vmul.f32 %v5336_v48, %v863_v24  ;;  %v4374_v36 = vpop.permute.xlu1 %872  ;;  %v4376_v6 = vpop.permute.xlu0 %864 }
 0x2ec   : > { %v1259_v31 = vmul.f32 %v3949_v8, %v4281_v18  ;;  %v4372_v32 = vmul.f32 %v5338_v39, %v863_v24  ;;  %v4378_v59 = vadd.f32 %v1641_v56, %v1610_v5  ;;  %v1228_v58 = vadd.f32 %v1220_v27, %v1189_v61  ;;  %v5341_v39 = vld [vmem:[#allocation36_spill] sm:$0xff]  ;;  %v5342_v27 = vld [vmem:[#allocation37_spill] sm:$0xff] }
 0x2ed   : > { %v1531_v51 = vadd.f32 %v1523_v3, %v1492_v55  ;;  %v1726_v62 = vadd.f32 %v1718_v41, %v1687_v12  ;;  %v4383_v11 = vsel %vm880_vm2, %v869_v47, %v4374_v36  ;;  %v4388_v13 = vsel %vm880_vm2, %v4376_v6, %v869_v47  ;;  %v5343_v47 = vld [vmem:[#allocation38_spill] sm:$0xff] }
 0x2ee   : > { %5340 = vst [vmem:[#allocation52_spill] sm:$0xff] %v4372_v32  ;;  %v1761_v14 = vadd.f32 %v5341_v39, %v1722_v20  ;;  %v1149_v37 = vadd.f32 %v1141_v15, %v1110_v44  ;;  %v1597_v54 = vmul.f32 %v5316_v23, %v4388_v13  ;;  %v1792_v61 = vmul.f32 %v5318_v40, %v4388_v13  ;;  %v5344_v40 = vld [vmem:[#allocation40_spill] sm:$0xff]  ;;  %v5377_v32 = vld [vmem:[#allocation95_spill] sm:$0xff] }
 0x2ef   : > { %v1566_v48 = vadd.f32 %v5342_v27, %v1527_v30  ;;  %v4396_v5 = vadd.f32 %v946_v21, %v915_v25  ;;  %v4400_v56 = vmul.f32 %v3747_v35, %v4388_v13  ;;  %v4402_v24 = vadd.f32 %v1259_v31, %v1228_v58  ;;  %v821_v23 = vpop.permute.xlu1 %820  ;;  %v850_v44 = vpop.permute.xlu0 %849  ;;  %v5345_v21 = vld [vmem:[#allocation41_spill] sm:$0xff] }
 0x2f0   : > { %v4405_v55 = vadd.f32 %v5343_v47, %v1145_v19  ;;  %v4409_v20 = vmul.f32 %v3765_v26, %v4388_v13  ;;  %v1765_v15 = vadd.f32 %v5344_v40, %v1726_v62  ;;  %v1793_v25 = vmul.f32 %v3780_v63, %v4383_v11 }
 0x2f1   : > { %v1570_v30 = vadd.f32 %v5345_v21, %v1531_v51  ;;  %v4417_v35 = vsel %vm855_vm1, %v850_v44, %v854_v45  ;;  %v4422_v19 = vsel %vm855_vm1, %v4184_v42, %v850_v44  ;;  %v1800_v26 = vadd.f32 %v1792_v61, %v1761_v14  ;;  %v5348_v45 = vld [vmem:[#allocation43_spill] sm:$0xff] }
 0x2f2   : > { %5346 = vst [vmem:[#allocation55_spill] sm:$0xff] %v4417_v35  ;;  %5347 = vst [vmem:[#allocation57_spill] sm:$0xff] %v4422_v19  ;;  %v4426_v3 = vmul.f32 %v3894_v4, %v4383_v11  ;;  %v948_v12 = vmul.f32 %v3961_v16, %v4422_v19  ;;  %v1143_v63 = vmul.f32 %v3982_v38, %v4422_v19  ;;  %v5352_v21 = vld [vmem:[#allocation63_spill] sm:$0xff] }
 0x2f3   : > { %v4432_v41 = vadd.f32 %v1597_v54, %v1566_v48  ;;  %v1188_v31 = vadd.f32 %v5348_v45, %v1149_v37  ;;  %v4438_v42 = vsel %vm830_vm0, %v821_v23, %v4277_v46  ;;  %v4443_v4 = vsel %vm830_vm0, %v4079_v29, %v821_v23  ;;  %v848_v14 = vpop.permute.xlu1 %847  ;;  %v5351_v23 = vld [vmem:[#allocation62_spill] sm:$0xff] }
 0x2f4   : > { %v1525_v51 = vmul.f32 %v3998_v60, %v4422_v19  ;;  %v1216_v58 = vmul.f32 %v3927_v1, %v4383_v11  ;;  %v4451_v62 = vmul.f32 %v3978_v52, %v4417_v35  ;;  %v4455_v39 = vmul.f32 %v3986_v43, %v4417_v35 }
 0x2f5   : > { %v4459_v46 = vmul.f32 %v4002_v57, %v4417_v35  ;;  %v1720_v29 = vmul.f32 %v4006_v10, %v4422_v19  ;;  %v4464_v37 = vadd.f32 %v948_v12, %v4315_v2  ;;  %v4467_v1 = vadd.f32 %v1143_v63, %v4319_v0  ;;  %v5350_v0 = vld [vmem:[#allocation118_spill] sm:$0xff] }
 0x2f6   : > { %v4470_v54 = vadd.f32 %v1525_v51, %v4332_v9  ;;  %v4474_v61 = vmul.f32 %v4014_v17, %v4417_v35  ;;  %v913_v27 = vmul.f32 %v5329_v33, %v4443_v4  ;;  %v1108_v48 = vmul.f32 %v5330_v50, %v4443_v4  ;;  %v879_v50 = vpop.permute.xlu0 %878  ;;  %v5353_v51 = vld [vmem:[#allocation83_spill] sm:$0xff] }
 0x2f7   : > { %v4483_v2 = vsel %vm855_vm1, %v848_v14, %v4307_v49  ;;  %v858_v9 = vsel %vm855_vm1, %v5350_v0, %v848_v14  ;;  %v4489_v47 = vadd.f32 %v1720_v29, %v4339_v53  ;;  %v1490_v44 = vmul.f32 %v5351_v23, %v4443_v4  ;;  %v877_v23 = vpop.permute.xlu1 %876 }
 0x2f8   : > { %5349 = vst [vmem:[#allocation60_spill] sm:$0xff] %v4483_v2  ;;  %v944_v33 = vmul.f32 %v3961_v16, %v858_v9  ;;  %v1139_v40 = vmul.f32 %v3982_v38, %v858_v9  ;;  %v1685_v12 = vmul.f32 %v5352_v21, %v4443_v4  ;;  %v4499_v49 = vmul.f32 %v3978_v52, %v4483_v2  ;;  %v5358_v21 = vld [vmem:[#allocation117_spill] sm:$0xff] }
 0x2f9   : > { %v4503_v63 = vmul.f32 %v3986_v43, %v4483_v2  ;;  %v1521_v53 = vmul.f32 %v3998_v60, %v858_v9  ;;  %v4509_v16 = vmul.f32 %v5353_v51, %v858_v9  ;;  %v4513_v38 = vmul.f32 %v4002_v57, %v4483_v2  ;;  %v5355_v43 = vld [vmem:[#allocation46_spill] sm:$0xff]  ;;  %v5356_v60 = vld [vmem:[#allocation135_spill] sm:$0xff] }
 0x2fa   : > { %v4506_v45 = vadd.f32 %v944_v33, %v913_v27  ;;  %v1716_v29 = vmul.f32 %v4006_v10, %v858_v9  ;;  %v4516_v14 = vadd.f32 %v1139_v40, %v1108_v48  ;;  %v4520_v52 = vmul.f32 %v4014_v17, %v4483_v2  ;;  %v5359_v17 = vld [vmem:[#allocation89_spill] sm:$0xff]  ;;  %v5361_v40 = vld [vmem:[#allocation90_spill] sm:$0xff] }
 0x2fb   : > { %5354 = vst [vmem:[#allocation61_spill] sm:$0xff] %v4509_v16  ;;  %v1804_v0 = vadd.f32 %v5355_v43, %v1765_v15  ;;  %v4526_v27 = vsel %vm880_vm2, %v5356_v60, %v879_v50  ;;  %v4528_v33 = vadd.f32 %v1521_v53, %v1490_v44  ;;  %v4535_v10 = vsel %vm880_vm2, %v879_v50, %v5358_v21  ;;  %v5360_v15 = vld [vmem:[#allocation138_spill] sm:$0xff]  ;;  %v5362_v60 = vld [vmem:[#allocation139_spill] sm:$0xff] }
 0x2fc   : > { %5357 = vst [vmem:[#allocation51_spill] sm:$0xff] %v4526_v27  ;;  %v4530_v57 = vadd.f32 %v1716_v29, %v1685_v12  ;;  %v4539_v48 = vmul.f32 %v5359_v17, %v4526_v27  ;;  %v4544_v43 = vmul.f32 %v5361_v40, %v4526_v27  ;;  %v1801_v44 = vadd.f32 %v1793_v25, %v5362_v60  ;;  %v5363_v12 = vld [vmem:[#allocation59_spill] sm:$0xff]  ;;  %v5364_v29 = vld [vmem:[#allocation93_spill] sm:$0xff]  ;;  %v5365_v50 = vld [vmem:[#allocation94_spill] sm:$0xff] }
 0x2fd   : > { %v1843_v9 = vadd.f32 %v5360_v15, %v1804_v0  ;;  %v1832_v53 = vmul.f32 %v5363_v12, %v4443_v4  ;;  %v4551_v35 = vmul.f32 %v5364_v29, %v4526_v27  ;;  %v1798_v21 = vmul.f32 %v5365_v50, %v4526_v27  ;;  %v5367_v15 = vld [vmem:[#allocation45_spill] sm:$0xff] }
 0x2fe   : > { %v4558_v0 = vsel %vm880_vm2, %v4374_v36, %v877_v23  ;;  %v1609_v16 = vadd.f32 %v5367_v15, %v1570_v30  ;;  %v5368_v25 = vld [vmem:[#allocation125_spill] sm:$0xff]  ;;  %v4565_v12 = vsel %vm880_vm2, %v877_v23, %v4376_v6  ;;  %v5370_v6 = vld [vmem:[#allocation140_spill] sm:$0xff] }
 0x2ff   : > { %5366 = vst [vmem:[#allocation53_spill] sm:$0xff] %v4558_v0  ;;  %1913 = vmatpush1.msra.mxu1 %v1843_v9  ;;  %v1840_v51 = vadd.f32 %v1832_v53, %v1801_v44  ;;  %v1839_v60 = vadd.f32 %v5368_v25, %v1800_v26  ;;  %v4569_v19 = vmul.f32 %v5359_v17, %v4558_v0  ;;  %v5369_v26 = vld [vmem:[#allocation77_spill] sm:$0xff]  ;;  %v5372_v44 = vld [vmem:[#allocation144_spill] sm:$0xff]  ;;  %v5374_v25 = vld [vmem:[#allocation146_spill] sm:$0xff] }
 0x300   : > { %v4573_v27 = vmul.f32 %v5361_v40, %v4558_v0  ;;  %v4577_v36 = vmul.f32 %v5364_v29, %v4558_v0  ;;  %v1794_v30 = vmul.f32 %v5365_v50, %v4558_v0  ;;  %v1637_v7 = vmul.f32 %v5369_v26, %v4443_v4  ;;  %v5371_v9 = vld [vmem:[#allocation141_spill] sm:$0xff]  ;;  %v5373_v29 = vld [vmem:[#allocation48_spill] sm:$0xff] }
 0x301   : > { %1914 = vmatprep.subr.mxu1 %v1840_v51  ;;  %v1648_v23 = vadd.f32 %v5370_v6, %v1609_v16  ;;  %v1606_v17 = vadd.f32 %v4426_v3, %v5371_v9  ;;  %v1227_v53 = vadd.f32 %v5372_v44, %v1188_v31  ;;  %v1255_v40 = vmul.f32 %v3949_v8, %v4443_v4  ;;  %v5375_v0 = vld [vmem:[#allocation133_spill] sm:$0xff]  ;;  %v5378_v31 = vld [vmem:[#allocation126_spill] sm:$0xff] }
 0x302   : > { %1915 = vmatpush1.msra.mxu1 %v1839_v60  ;;  %v1224_v15 = vadd.f32 %v1216_v58, %v5373_v29  ;;  %v1223_v50 = vadd.f32 %v4409_v20, %v4405_v55  ;;  %v955_v26 = vadd.f32 %v5375_v0, %v5374_v25  ;;  %v5376_v51 = vld [vmem:[#allocation137_spill] sm:$0xff]  ;;  %v1644_v6 = vadd.f32 %v5378_v31, %v4432_v41  ;;  %v5379_v9 = vld [vmem:[#allocation142_spill] sm:$0xff]  ;;  %v5380_v60 = vld [vmem:[#allocation44_spill] sm:$0xff] }
 0x303   : > { %v1025_v16 = vmul.f32 %v5377_v32, %v5376_v51  ;;  %1916 = vmatprep.subr.mxu1 %v4378_v59  ;;  %v1645_v3 = vadd.f32 %v1637_v7, %v1606_v17  ;;  %v1266_v8 = vadd.f32 %v5379_v9, %v1227_v53  ;;  %v993_v58 = vadd.f32 %v5380_v60, %v4396_v5  ;;  %v5381_v55 = vld [vmem:[#allocation65_spill] sm:$0xff]  ;;  %v5382_v0 = vld [vmem:[#allocation96_spill] sm:$0xff]  ;;  %v5385_v59 = vld [vmem:[#allocation143_spill] sm:$0xff] }
 0x304   : > { %1917 = vmatpush1.msra.mxu1 %v1648_v23  ;;  %v1263_v44 = vadd.f32 %v1255_v40, %v1224_v15  ;;  %v994_v20 = vadd.f32 %v5381_v55, %v955_v26  ;;  %v1064_v29 = vmul.f32 %v5382_v0, %v4281_v18  ;;  %v5383_v25 = vld [vmem:[#allocation132_spill] sm:$0xff]  ;;  %v5384_v51 = vld [vmem:[#allocation49_spill] sm:$0xff]  ;;  %v1021_v41 = vmul.f32 %v5377_v32, %v4383_v11  ;;  %v5386_v23 = vld [vmem:[#allocation39_spill] sm:$0xff] }
 0x305   : > { %v990_v2 = vadd.f32 %v5384_v51, %v5383_v25  ;;  %1918 = vmatprep.subr.mxu1 %v1645_v3  ;;  %v1032_v7 = vadd.f32 %v5385_v59, %v993_v58  ;;  %v1060_v5 = vmul.f32 %v5382_v0, %v4443_v4  ;;  %v989_v17 = vadd.f32 %v5386_v23, %v4356_v34  ;;  %v5387_v53 = vld [vmem:[#allocation127_spill] sm:$0xff]  ;;  %v5388_v26 = vld [vmem:[#allocation129_spill] sm:$0xff]  ;;  %v5390_v3 = vld [vmem:[#allocation102_spill] sm:$0xff] }
 0x306   : > { %1919 = vmatpush1.msra.mxu1 %v1644_v6  ;;  %v1262_v40 = vadd.f32 %v5387_v53, %v1223_v50  ;;  %v1033_v15 = vadd.f32 %v1025_v16, %v994_v20  ;;  %v5389_v31 = vld [vmem:[#allocation91_spill] sm:$0xff]  ;;  %v1690_v9 = vmul.f32 %v5390_v3, %v4350_v22  ;;  %v5391_v58 = vld [vmem:[#allocation106_spill] sm:$0xff]  ;;  %v5393_v20 = vld [vmem:[#allocation97_spill] sm:$0xff]  ;;  %v1686_v25 = vmul.f32 %v5390_v3, %v4438_v42 }
 0x307   : > { %v1063_v51 = vmul.f32 %v5389_v31, %v5388_v26  ;;  %1920 = vmatprep.subr.mxu1 %v4402_v24  ;;  %v1029_v60 = vadd.f32 %v1021_v41, %v990_v2  ;;  %v1028_v32 = vadd.f32 %v4400_v56, %v989_v17  ;;  %v1799_v55 = vmul.f32 %v5391_v58, %v4535_v10  ;;  %v5392_v34 = vld [vmem:[#allocation70_spill] sm:$0xff]  ;;  %v5394_v59 = vld [vmem:[#allocation103_spill] sm:$0xff]  ;;  %v5395_v23 = vld [vmem:[#allocation85_spill] sm:$0xff] }
 0x308   : > { %v1767_v6 = vadd.f32 %v5392_v34, %v4489_v47  ;;  %1921 = vmatpush1.msra.mxu1 %v1266_v8  ;;  %v1729_v16 = vadd.f32 %v4474_v61, %v1690_v9  ;;  %v1838_v0 = vmul.f32 %v5393_v20, %v4328_v28  ;;  %v1072_v24 = vadd.f32 %v1064_v29, %v1033_v15  ;;  %v5397_v53 = vld [vmem:[#allocation130_spill] sm:$0xff]  ;;  %v5399_v15 = vld [vmem:[#allocation104_spill] sm:$0xff]  ;;  %v4643_v31 = vld [vmem:[#allocation12] sm:$0xff] }
 0x309   : > { %v1071_v50 = vadd.f32 %v1063_v51, %v1032_v7  ;;  %1922 = vmatprep.subr.mxu1 %v1263_v44  ;;  %v1068_v2 = vadd.f32 %v1060_v5, %v1029_v60  ;;  %v1837_v41 = vmul.f32 %v5394_v59, %v4350_v22  ;;  %v1725_v8 = vadd.f32 %v4520_v52, %v1686_v25  ;;  %v5396_v7 = vld [vmem:[#allocation66_spill] sm:$0xff]  ;;  %v5398_v5 = vld [vmem:[#allocation145_spill] sm:$0xff]  ;;  %v5404_v25 = vld [vmem:[#allocation107_spill] sm:$0xff] }
 0x30a   : > { %v1806_v56 = vadd.f32 %v1798_v21, %v1767_v6  ;;  %1923 = vmatpush1.msra.mxu1 %v1262_v40  ;;  %v1768_v47 = vadd.f32 %v5395_v23, %v1729_v16  ;;  %v1795_v61 = vmul.f32 %v5391_v58, %v4565_v12  ;;  %v1763_v17 = vadd.f32 %v5396_v7, %v4530_v57  ;;  %v5400_v51 = vld [vmem:[#allocation78_spill] sm:$0xff] }
 0x30b   : > { %1924 = vmatprep.subr.mxu1 %v1072_v24  ;;  %v1067_v44 = vadd.f32 %v5397_v53, %v1028_v32  ;;  %v1834_v21 = vmul.f32 %v5393_v20, %v5398_v5  ;;  %v1495_v40 = vmul.f32 %v5399_v15, %v4350_v22  ;;  %v1764_v3 = vadd.f32 %v5400_v51, %v1725_v8  ;;  %v5401_v32 = vld [vmem:[#allocation110_spill] sm:$0xff] }
 0x30c   : > { %v1845_v29 = vadd.f32 %v1837_v41, %v1806_v56  ;;  %1925 = vmatpush1.msra.mxu1 %v1071_v50  ;;  %v1807_v52 = vadd.f32 %v1799_v55, %v1768_v47  ;;  %v1802_v9 = vadd.f32 %v1794_v30, %v1763_v17  ;;  %v1833_v57 = vmul.f32 %v5394_v59, %v4438_v42  ;;  %v5402_v34 = vld [vmem:[#allocation74_spill] sm:$0xff]  ;;  %v5407_v47 = vld [vmem:[#allocation67_spill] sm:$0xff] }
 0x30d   : > { %1926 = vmatprep.subr.mxu1 %v1068_v2  ;;  %v1534_v60 = vadd.f32 %v4459_v46, %v1495_v40  ;;  %v1604_v58 = vmul.f32 %v5401_v32, %v4535_v10  ;;  %v1572_v6 = vadd.f32 %v5402_v34, %v4470_v54  ;;  %v1491_v50 = vmul.f32 %v5399_v15, %v4438_v42  ;;  %v5403_v30 = vld [vmem:[#allocation98_spill] sm:$0xff]  ;;  %v5408_v17 = vld [vmem:[#allocation79_spill] sm:$0xff] }
 0x30e   : > { %1927 = vmatpush1.msra.mxu1 %v1067_v44  ;;  %v1846_v55 = vadd.f32 %v1838_v0, %v1807_v52  ;;  %v1803_v16 = vadd.f32 %v1795_v61, %v1764_v3  ;;  %v1643_v20 = vmul.f32 %v5403_v30, %v4328_v28  ;;  %v1642_v24 = vmul.f32 %v5404_v25, %v4350_v22  ;;  %v5405_v46 = vld [vmem:[#allocation86_spill] sm:$0xff]  ;;  %v4669_v61 = vld [vmem:[#allocation12 + $0x8] sm:$0xff] }
 0x30f   : > { %2625 = vmatmul.mubr.msk.f32.vlgmr.msra.gmra.mxu1 %vm1889_vm3, %v4643_v31  ;;  %v1573_v2 = vadd.f32 %v5405_v46, %v1534_v60  ;;  %v1611_v56 = vadd.f32 %v4551_v35, %v1572_v6  ;;  %v1530_v54 = vadd.f32 %v4513_v38, %v1491_v50  ;;  %v1600_v59 = vmul.f32 %v5401_v32, %v4565_v12  ;;  %v5409_v38 = vld [vmem:[#allocation108_spill] sm:$0xff]  ;;  %v5412_v60 = vld [vmem:[#allocation105_spill] sm:$0xff]  ;;  %v5414_v50 = vld [vmem:[#allocation87_spill] sm:$0xff] }
 0x310   : > { %1989 = vmatprep.subr.mxu1 %v1846_v55  ;;  %v1842_v0 = vadd.f32 %v1834_v21, %v1803_v16  ;;  %v5406_v41 = vmov 0.0   ;;  %v1841_v23 = vadd.f32 %v1833_v57, %v1802_v9  ;;  %v1568_v8 = vadd.f32 %v5407_v47, %v4528_v33  ;;  %v5410_v33 = vld [vmem:[#allocation75_spill] sm:$0xff]  ;;  %v5411_v9 = vld [vmem:[#allocation113_spill] sm:$0xff]  ;;  %v5415_v16 = vld [vmem:[#allocation68_spill] sm:$0xff] }
 0x311   : > { %1966 = vmatprep.mubr.f32.mxu1 %v5406_v41  ;;  %1990 = vmatpush1.msra.mxu1 %v1845_v29  ;;  %v1612_v7 = vadd.f32 %v1604_v58, %v1573_v2  ;;  %v1569_v53 = vadd.f32 %v5408_v17, %v1530_v54  ;;  %v1639_v35 = vmul.f32 %v5403_v30, %v5398_v5  ;;  %v5413_v58 = vld [vmem:[#allocation109_spill] sm:$0xff] }
 0x312   : > { %v1113_v44 = vmul.f32 %v5409_v38, %v4350_v22  ;;  %1991 = vmatprep.subr.mxu1 %v1842_v0  ;;  %v1650_v21 = vadd.f32 %v1642_v24, %v1611_v56  ;;  %v1607_v15 = vadd.f32 %v4577_v36, %v1568_v8  ;;  %v1638_v40 = vmul.f32 %v5404_v25, %v4438_v42  ;;  %v5416_v24 = vld [vmem:[#allocation114_spill] sm:$0xff]  ;;  %v5419_v8 = vld [vmem:[#allocation76_spill] sm:$0xff] }
 0x313   : > { %v1190_v29 = vadd.f32 %v5410_v33, %v4467_v1  ;;  %1992 = vmatpush1.msra.mxu1 %v1841_v23  ;;  %v1651_v52 = vadd.f32 %v1643_v20, %v1612_v7  ;;  %v1608_v51 = vadd.f32 %v1600_v59, %v1569_v53  ;;  %v1222_v57 = vmul.f32 %v5411_v9, %v4535_v10  ;;  %v5417_v59 = vld [vmem:[#allocation80_spill] sm:$0xff]  ;;  %v5418_v23 = vld [vmem:[#allocation119_spill] sm:$0xff] }
 0x314   : > { %v1152_v3 = vadd.f32 %v4455_v39, %v1113_v44  ;;  %2626 = vmatmul.mubr.msk.f32.gmra.mxu1 %vm1889_vm3, %v4669_v61  ;;  %v1261_v36 = vmul.f32 %v5412_v60, %v4328_v28  ;;  %v1260_v34 = vmul.f32 %v5413_v58, %v4350_v22  ;;  %v1109_v1 = vmul.f32 %v5409_v38, %v4438_v42  ;;  %v5420_v53 = vld [vmem:[#allocation111_spill] sm:$0xff] }
 0x315   : > { %v1229_v32 = vadd.f32 %v4544_v43, %v1190_v29  ;;  %1993 = vmatprep.subr.mxu1 %v1651_v52  ;;  %v1647_v6 = vadd.f32 %v1639_v35, %v1608_v51  ;;  %v1646_v39 = vadd.f32 %v1638_v40, %v1607_v15  ;;  %v1186_v30 = vadd.f32 %v5415_v16, %v4516_v14  ;;  %v5422_v15 = vld [vmem:[#allocation92_spill] sm:$0xff]  ;;  %v5423_v52 = vld [vmem:[#allocation69_spill] sm:$0xff] }
 0x316   : > { %v1191_v55 = vadd.f32 %v5414_v50, %v1152_v3  ;;  %1994 = vmatpush1.msra.mxu1 %v1650_v21  ;;  %v1148_v20 = vadd.f32 %v4503_v63, %v1109_v1  ;;  %v1218_v43 = vmul.f32 %v5411_v9, %v4565_v12  ;;  %v1257_v25 = vmul.f32 %v5412_v60, %v5398_v5  ;;  %v5424_v3 = vld [vmem:[#allocation116_spill] sm:$0xff] }
 0x317   : > { %v918_v46 = vmul.f32 %v5416_v24, %v4350_v22  ;;  %1995 = vmatprep.subr.mxu1 %v1647_v6  ;;  %v1268_v56 = vadd.f32 %v1260_v34, %v1229_v32  ;;  %v1225_v54 = vadd.f32 %v4573_v27, %v1186_v30  ;;  %v1256_v14 = vmul.f32 %v5413_v58, %v4438_v42  ;;  %v5421_v27 = vld [vmem:[#allocation115_spill] sm:$0xff]  ;;  %v5425_v32 = vld [vmem:[#allocation112_spill] sm:$0xff]  ;;  %v5426_v34 = vld [vmem:[#allocation81_spill] sm:$0xff] }
 0x318   : > { %v1230_v2 = vadd.f32 %v1222_v57, %v1191_v55  ;;  %1996 = vmatpush1.msra.mxu1 %v1646_v39  ;;  %v1187_v63 = vadd.f32 %v5417_v59, %v1148_v20  ;;  %v1027_v47 = vmul.f32 %v5418_v23, %v4535_v10  ;;  %v995_v7 = vadd.f32 %v5419_v8, %v4464_v37  ;;  %v5428_v39 = vld [vmem:[#allocation128_spill] sm:$0xff]  ;;  %v5431_v20 = vld [vmem:[#allocation121_spill] sm:$0xff] }
 0x319   : > { %v957_v0 = vadd.f32 %v4451_v62, %v918_v46  ;;  %v1066_v35 = vmul.f32 %v5420_v53, %v4328_v28  ;;  %v1065_v38 = vmul.f32 %v5421_v27, %v4350_v22  ;;  %v914_v44 = vmul.f32 %v5416_v24, %v4438_v42  ;;  %2037 = vmatprep.mubr.f32.mxu1 %v5406_v41  ;;  %v5430_v16 = vld [vmem:[#allocation120_spill] sm:$0xff]  ;;  %v5432_v46 = vld [vmem:[#allocation42_spill] sm:$0xff] }
 0x31a   : > { %v1269_v17 = vadd.f32 %v1261_v36, %v1230_v2  ;;  %v1226_v21 = vadd.f32 %v1218_v43, %v1187_v63  ;;  %v1264_v62 = vadd.f32 %v1256_v14, %v1225_v54  ;;  %v1023_v33 = vmul.f32 %v5418_v23, %v4565_v12  ;;  %v5434_v54 = vld [vmem:[#allocation84_spill] sm:$0xff] }
 0x31b   : > { %v996_v40 = vadd.f32 %v5422_v15, %v957_v0  ;;  %v1034_v37 = vadd.f32 %v4539_v48, %v995_v7  ;;  %v953_v29 = vadd.f32 %v4499_v49, %v914_v44  ;;  %v991_v51 = vadd.f32 %v5423_v52, %v4506_v45  ;;  %v5427_v49 = vld [vmem:[#allocation50_spill] sm:$0xff]  ;;  %v5429_v45 = vld [vmem:[#allocation71_spill] sm:$0xff]  ;;  %v5436_v0 = vld [vmem:[#allocation101_spill] sm:$0xff] }
 0x31c   : > { %1997 = vmatprep.subr.mxu1 %v1269_v17  ;;  %v1301_v9 = vmul.f32 %v5424_v3, %v5398_v5  ;;  %v1265_v57 = vadd.f32 %v1257_v25, %v1226_v21  ;;  %v1062_v36 = vmul.f32 %v5420_v53, %v5398_v5  ;;  %v1410_v58 = vmul.f32 %v5425_v32, %v4388_v13  ;;  %v5437_v17 = vld [vmem:[#allocation136_spill] sm:$0xff]  ;;  %v5439_v44 = vld [vmem:[#allocation134_spill] sm:$0xff] }
 0x31d   : > { %1998 = vmatpush1.msra.mxu1 %v1268_v56  ;;  %v1035_v60 = vadd.f32 %v1027_v47, %v996_v40  ;;  %v992_v1 = vadd.f32 %v5426_v34, %v953_v29  ;;  %v1030_v48 = vadd.f32 %v4569_v19, %v991_v51  ;;  %v1380_v50 = vadd.f32 %v5429_v45, %v5428_v39  ;;  %v5433_v56 = vld [vmem:[#allocation60_spill] sm:$0xff]  ;;  %v5441_v40 = vld [vmem:[#allocation57_spill] sm:$0xff]  ;;  %v5443_v29 = vld [vmem:[#allocation131_spill] sm:$0xff] }
 0x31e   : > { %v1340_v6 = vadd.f32 %v5427_v49, %v1301_v9  ;;  %1999 = vmatprep.subr.mxu1 %v1265_v57  ;;  %v1411_v30 = vmul.f32 %v5430_v16, %v4383_v11  ;;  %v1450_v43 = vmul.f32 %v5431_v20, %v4443_v4  ;;  %v1305_v13 = vmul.f32 %v5424_v3, %v4328_v28  ;;  %v5435_v11 = vld [vmem:[#allocation52_spill] sm:$0xff]  ;;  %v5446_v57 = vld [vmem:[#allocation99_spill] sm:$0xff] }
 0x31f   : > { %v1074_v55 = vadd.f32 %v1066_v35, %v1035_v60  ;;  %2000 = vmatpush1.msra.mxu1 %v1264_v62  ;;  %v1073_v25 = vadd.f32 %v1065_v38, %v1034_v37  ;;  %v1031_v24 = vadd.f32 %v1023_v33, %v992_v1  ;;  %v1061_v19 = vmul.f32 %v5421_v27, %v4438_v42  ;;  %v5438_v27 = vld [vmem:[#allocation47_spill] sm:$0xff]  ;;  %v5440_v62 = vld [vmem:[#allocation122_spill] sm:$0xff]  ;;  %v5444_v51 = vld [vmem:[#allocation124_spill] sm:$0xff] }
 0x320   : > { %v1379_v2 = vadd.f32 %v5432_v46, %v1340_v6  ;;  %v1335_v14 = vmul.f32 %v5434_v54, %v5433_v56  ;;  %v1419_v59 = vadd.f32 %v1411_v30, %v1380_v50  ;;  %v1344_v63 = vadd.f32 %v5435_v11, %v1305_v13  ;;  %v5442_v33 = vld [vmem:[#allocation83_spill] sm:$0xff]  ;;  %v5445_v9 = vld [vmem:[#allocation28_spill] sm:$0xff]  ;;  %v5449_v1 = vld [vmem:[#allocation53_spill] sm:$0xff] }
 0x321   : > { %2001 = vmatprep.subr.mxu1 %v1074_v55  ;;  %v1306_v23 = vmul.f32 %v5436_v0, %v5388_v26  ;;  %v1070_v47 = vadd.f32 %v1062_v36, %v1031_v24  ;;  %v1069_v8 = vadd.f32 %v1061_v19, %v1030_v48  ;;  %v1414_v53 = vmul.f32 %v5425_v32, %v5437_v17  ;;  %v5447_v32 = vld [vmem:[#allocation72_spill] sm:$0xff]  ;;  %v5450_v48 = vld [vmem:[#allocation123_spill] sm:$0xff]  ;;  %v5452_v30 = vld [vmem:[#allocation73_spill] sm:$0xff] }
 0x322   : > { %2002 = vmatpush1.msra.mxu1 %v1073_v25  ;;  %v1418_v7 = vadd.f32 %v1410_v58, %v1379_v2  ;;  %v4753_v35 = vadd.f32 %v1450_v43, %v1419_v59  ;;  %v1383_v38 = vadd.f32 %v5438_v27, %v1344_v63  ;;  %v1303_v15 = vmul.f32 %v5440_v62, %v4443_v4  ;;  %v5448_v4 = vld [vmem:[#allocation61_spill] sm:$0xff]  ;;  %v5451_v6 = vld [vmem:[#allocation55_spill] sm:$0xff]  ;;  %v5454_v25 = vld [vmem:[#allocation88_spill] sm:$0xff] }
 0x323   : > { %v1345_v21 = vadd.f32 %v5439_v44, %v1306_v23  ;;  %v1338_v37 = vmul.f32 %v5442_v33, %v5441_v40  ;;  %2003 = vmatprep.subr.mxu1 %v1070_v47  ;;  %v1304_v3 = vmul.f32 %v5444_v51, %v4438_v42  ;;  %v1405_v60 = vrot.slane %v5446_v57, %v5445_v9  ;;  %v5453_v13 = vld [vmem:[#allocation27_spill] sm:$0xff]  ;;  %v5455_v19 = vld [vmem:[#allocation30_spill] sm:$0xff]  ;;  %v5459_v63 = vld [vmem:[#allocation33_spill] sm:$0xff] }
 0x324   : > { %v4762_v52 = vadd.f32 %v5443_v29, %v1418_v7  ;;  %2004 = vmatpush1.msra.mxu1 %v1069_v8  ;;  %v4768_v36 = vadd.f32 %v1414_v53, %v1383_v38  ;;  %v1342_v34 = vadd.f32 %v5448_v4, %v1303_v15  ;;  %v1412_v49 = vmul.f32 %v5450_v48, %v5449_v1  ;;  %v5456_v46 = vld [vmem:[#allocation34_spill] sm:$0xff]  ;;  %v5460_v0 = vld [vmem:[#allocation35_spill] sm:$0xff]  ;;  %v376_v40 = vld [vmem:[#allocation7 + $0xf8] sm:$0xff] }
 0x325   : > { %v4771_v58 = vadd.f32 %v5447_v32, %v1345_v21  ;;  %v1339_v39 = vmul.f32 %v5434_v54, %v5451_v6  ;;  %2627 = vmatmul.mubr.msk.f32.vlgmr.msra.gmra.mxu1 %vm1889_vm3, %v4643_v31  ;;  %v1343_v45 = vadd.f32 %v1335_v14, %v1304_v3  ;;  %v1413_v50 = vmul.f32 %v1405_v60, %v4565_v12  ;;  %v5457_v56 = vld [vmem:[#allocation82_spill] sm:$0xff]  ;;  %v5458_v31 = vld [vmem:[#allocation51_spill] sm:$0xff]  ;;  %v368_v3 = vld [vmem:[#allocation7 + $0xb8] sm:$0xff] }
 0x326   : > { %v1307_v55 = vmul.f32 %v5440_v62, %v4281_v18  ;;  %2043 = vmatprep.mubr.f32.mxu1 %v5406_v41  ;;  %v1381_v43 = vadd.f32 %v5452_v30, %v1342_v34  ;;  %v1440_v24 = vrot.slane %v5454_v25, %v5453_v13  ;;  %v1377_v2 = vmul.f32 %v5456_v46, %v5455_v19  ;;  %v374_v33 = vld [vmem:[#allocation7 + $0xe8] sm:$0xff]  ;;  %v371_v29 = vld [vmem:[#allocation7 + $0xd0] sm:$0xff]  ;;  %v365_v32 = vld [vmem:[#allocation7 + $0xa0] sm:$0xff] }
 0x327   : > { %v1382_v54 = vadd.f32 %v5457_v56, %v1343_v45  ;;  %v1416_v14 = vmul.f32 %v5450_v48, %v5458_v31  ;;  %v1308_v12 = vmul.f32 %v5444_v51, %v4350_v22  ;;  %v1378_v23 = vmul.f32 %v5460_v0, %v5459_v63  ;;  %2751 = vmatprep.subr.mxu0 %v376_v40  ;;  %v370_v51 = vld [vmem:[#allocation7 + $0xc8] sm:$0xff]  ;;  %v367_v57 = vld [vmem:[#allocation7 + $0xb0] sm:$0xff]  ;;  %v364_v4 = vld [vmem:[#allocation7 + $0x98] sm:$0xff] }
 0x328   : > { %v1346_v59 = vadd.f32 %v1338_v37, %v1307_v55  ;;  %v1420_v11 = vadd.f32 %v1412_v49, %v1381_v43  ;;  %v1451_v41 = vmul.f32 %v1440_v24, %v4438_v42  ;;  %v1417_v17 = vmul.f32 %v1405_v60, %v4535_v10  ;;  %v375_v10 = vld [vmem:[#allocation7 + $0xf0] sm:$0xff]  ;;  %2752 = vmatpush3.msra.mxu0 %v376_v40  ;;  %v373_v37 = vld [vmem:[#allocation7 + $0xe0] sm:$0xff]  ;;  %v366_v60 = vld [vmem:[#allocation7 + $0xa8] sm:$0xff] }
 0x329   : > { %2628 = vmatmul.mubr.msk.f32.gmra.mxu1 %vm1889_vm3, %v4669_v61  ;;  %v4799_v47 = vadd.f32 %v1413_v50, %v1382_v54  ;;  %v1347_v7 = vadd.f32 %v1339_v39, %v1308_v12  ;;  %v4806_v27 = vrot.slane %v5454_v25, %v5445_v9  ;;  %v1455_v42 = vmul.f32 %v1440_v24, %v4350_v22  ;;  %v372_v22 = vld [vmem:[#allocation7 + $0xd8] sm:$0xff]  ;;  %v363_v34 = vld [vmem:[#allocation7 + $0x90] sm:$0xff]  ;;  %v362_v1 = vld [vmem:[#allocation7 + $0x88] sm:$0xff]  ;;  %v4815_v39 = vpop.f32.mrf.mxu1 }
 0x32a   : > { %v1385_v8 = vadd.f32 %v1377_v2, %v1346_v59  ;;  %v4802_v53 = vadd.f32 %v1451_v41, %v1420_v11  ;;  %2753 = vmatprep.subr.mxu0 %v375_v10  ;;  %v361_v48 = vld [vmem:[#allocation7 + $0x80] sm:$0xff]  ;;  %v5463_v24 = vld [vmem:[#allocation22_spill] sm:$0xff]  ;;  %v5464_v54 = vld [vmem:[#allocation100_spill] sm:$0xff]  ;;  %v1454_v31 = vmul.f32 %v5431_v20, %v4281_v18 }
 0x32b   : > { %v1386_v44 = vadd.f32 %v1378_v23, %v1347_v7  ;;  %v1456_v61 = vmul.f32 %v4806_v27, %v4328_v28  ;;  %2754 = vmatpush3.msra.mxu0 %v375_v10  ;;  %v369_v28 = vld [vmem:[#allocation7 + $0xc0] sm:$0xff]  ;;  %v1453_v59 = vmul.f32 %v5464_v54, %v5388_v26 }
 0x32c   : > { %v1424_v38 = vadd.f32 %v1416_v14, %v1385_v8  ;;  %2755 = vmatprep.subr.mxu0 %v374_v33  ;;  %v411_v49 = vld [vmem:[#allocation10 + $0x1] ss:$4 sm:$0xf]  ;;  %v413_v6 = vld [vmem:[#allocation10 + $0x2] ss:$4 sm:$0xf] }
 0x32d   : > { %v1425_v62 = vadd.f32 %v1417_v17, %v1386_v44  ;;  %2756 = vmatpush3.msra.mxu0 %v374_v33  ;;  %v5461_v45 = vld [vmem:[#allocation21_spill] sm:$0xff]  ;;  %v783_v19 = vrot.slane %v411_v49, %v5463_v24  ;;  %v2066_v2 = vrot.slane %v413_v6, %v5463_v24  ;;  %v5465_v14 = vld [vmem:[#allocation23_spill] sm:$0xff] }
 0x32e   : > { %v4809_v21 = vadd.f32 %v1455_v42, %v1424_v38  ;;  %2757 = vmatprep.subr.mxu0 %v373_v37  ;;  %v779_v50 = vrot.slane %v411_v49, %v5461_v45  ;;  %v2062_v55 = vrot.slane %v413_v6, %v5461_v45  ;;  %v5462_v43 = vld [vmem:[#allocation137_spill] sm:$0xff]  ;;  %v5467_v42 = vld [vmem:[#allocation24_spill] sm:$0xff] }
 0x32f   : > { %v4813_v15 = vadd.f32 %v1456_v61, %v1425_v62  ;;  %2758 = vmatpush3.msra.mxu0 %v373_v37  ;;  %v1415_v25 = vmul.f32 %v5430_v16, %v5462_v43  ;;  %v1461_v16 = vadd.f32 %v1453_v59, %v4768_v36  ;;  %v5466_v0 = vld [vmem:[#allocation25_spill] sm:$0xff]  ;;  %v5468_v61 = vld [vmem:[#allocation26_spill] sm:$0xff]  ;;  %v1452_v43 = vmul.f32 %v4806_v27, %v5398_v5 }
 0x330   : > { %2759 = vmatprep.subr.mxu0 %v372_v22  ;;  %v796_v12 = vadd.f32 %v779_v50, %v5465_v14  ;;  %v801_v40 = vadd.f32 %v783_v19, %v5468_v61  ;;  %v5469_v59 = vld [vmem:[#allocation29_spill] sm:$0xff] }
 0x331   : > { %2760 = vmatpush3.msra.mxu0 %v372_v22  ;;  %v1423_v63 = vadd.f32 %v1415_v25, %v4771_v58  ;;  %v791_v25 = vrot.slane %v411_v49, %v5445_v9 }
 0x332   : > { %2761 = vmatprep.subr.mxu0 %v371_v29 }
 0x333   : > { %2762 = vmatpush3.msra.mxu0 %v371_v29  ;;  %v1462_v26 = vadd.f32 %v1454_v31, %v1423_v63 }
 0x334   : > { %2763 = vmatprep.subr.mxu0 %v370_v51 }
 0x335   : > { %2764 = vmatpush3.msra.mxu0 %v370_v51 }
 0x336   : > { %2765 = vmatprep.subr.mxu0 %v369_v28 }
 0x337   : > { %2766 = vmatpush3.msra.mxu0 %v369_v28 }
 0x338   : > { %2767 = vmatprep.subr.mxu0 %v368_v3 }
 0x339   : > { %2768 = vmatpush3.msra.mxu0 %v368_v3 }
 0x33a   : > { %2769 = vmatprep.subr.mxu0 %v367_v57 }
 0x33b   : > { %2770 = vmatpush3.msra.mxu0 %v367_v57 }
 0x33c   : > { %2771 = vmatprep.subr.mxu0 %v366_v60 }
 0x33d   : > { %2772 = vmatpush3.msra.mxu0 %v366_v60 }
 0x33e   : > { %2773 = vmatprep.subr.mxu0 %v365_v32 }
 0x33f   : > { %2774 = vmatpush3.msra.mxu0 %v365_v32 }
 0x340   : > { %2775 = vmatprep.subr.mxu0 %v364_v4 }
 0x341   : > { %2776 = vmatpush3.msra.mxu0 %v364_v4 }
 0x342   : > { %2777 = vmatprep.subr.mxu0 %v363_v34 }
 0x343   : > { %2778 = vmatpush3.msra.mxu0 %v363_v34 }
 0x344   : > { %2779 = vmatprep.subr.mxu0 %v362_v1 }
 0x345   : > { %2780 = vmatpush3.msra.mxu0 %v362_v1 }
 0x346   : > { %2781 = vmatprep.subr.mxu0 %v361_v48 }
 0x347   : > { %2782 = vmatpush3.msra.mxu0 %v361_v48 }
 0x3cf   : > { %v1962_v30 = vpop.f32.mrf.mxu1 }
 0x3d0   : > { %v2050_v46 = vadd.f32 %v1962_v30, %v4762_v52  ;;  %v797_v52 = vadd.f32 %v783_v19, %v5466_v0  ;;  %v2070_v30 = vrot.slane %v413_v6, %v5453_v13 }
 0x3d1   : > { %v1964_v56 = vpop.f32.mrf.mxu1 }
 0x3d2   : > { %v2079_v11 = vadd.f32 %v2062_v55, %v2050_v46  ;;  %v2051_v41 = vadd.f32 %v1964_v56, %v4753_v35  ;;  %v800_v35 = vadd.f32 %v779_v50, %v5467_v42  ;;  %v2074_v56 = vrot.slane %v413_v6, %v5445_v9 }
 0x3d4   : > { %v4833_v23 = vmul.f32 %v2079_v11, %v796_v12  ;;  %v2080_v8 = vadd.f32 %v2066_v2, %v2051_v41  ;;  %v1968_v7 = vpop.f32.mrf.mxu1 }
 0x3d5   : > { %v2054_v17 = vadd.f32 %v1968_v7, %v1461_v16  ;;  %v5470_v16 = vld [vmem:[#allocation32_spill] sm:$0xff] }
 0x3d6   : > { %v4836_v38 = vand.u32 2147483647, %v4833_v23  ;;  %v4838_v18 = vmul.f32 %v2080_v8, %v797_v52  ;;  %v1970_v20 = vpop.f32.mrf.mxu1  ;;  %v799_v63 = vadd.f32 %v791_v25, %v5470_v16 }
 0x3d7   : > { %v2083_v44 = vadd.f32 %v2062_v55, %v2054_v17  ;;  %v2055_v36 = vadd.f32 %v1970_v20, %v1462_v26  ;;  %v787_v55 = vrot.slane %v411_v49, %v5453_v13 }
 0x3d8   : > { %v2111_v58 = vmul.f32 0.70710677, %v4836_v38  ;;  %v4843_v62 = vand.u32 2147483647, %v4838_v18 }
 0x3d9   : > { %v4846_v10 = vmul.f32 %v2083_v44, %v800_v35  ;;  %v2084_v33 = vadd.f32 %v2066_v2, %v2055_v36  ;;  %v1460_v2 = vadd.f32 %v1452_v43, %v4799_v47  ;;  %v798_v31 = vadd.f32 %v787_v55, %v5469_v59 }
 0x3da   : > { %v2119_v37 = vmul.f32 0.3275911, %v2111_v58  ;;  %v4849_v22 = vmul.f32 0.70710677, %v4843_v62  ;;  %v2239_v11 = vsub.f32 0.0, %v2111_v58 }
 0x3db   : > { %v4852_v29 = vand.u32 2147483647, %v4846_v10  ;;  %v4854_v51 = vmul.f32 %v2084_v33, %v801_v40  ;;  %v803_v40 = vadd.f32 %v791_v25, %v4815_v39 }
 0x3dc   : > { %v2127_v28 = vadd.f32 1.0, %v2119_v37  ;;  %v2120_v3 = vmul.f32 0.3275911, %v4849_v22  ;;  %v2247_v20 = vmul.f32 %v2239_v11, %v2111_v58  ;;  %v2240_v37 = vsub.f32 0.0, %v4849_v22 }
 0x3dd   : > { %v2115_v57 = vmul.f32 0.70710677, %v4852_v29  ;;  %v4859_v60 = vand.u32 2147483647, %v4854_v51 }
 0x3de   : > { %2919 = vrcp.f32 %v2127_v28  ;;  %v2128_v32 = vadd.f32 1.0, %v2120_v3 }
 0x3df   : > { %v2123_v4 = vmul.f32 0.3275911, %v2115_v57  ;;  %v4862_v34 = vmul.f32 0.70710677, %v4859_v60  ;;  %v2243_v47 = vsub.f32 0.0, %v2115_v57 }
 0x3e0   : > { %2921 = vrcp.f32 %v2128_v32 }
 0x3e1   : > { %v2131_v1 = vadd.f32 1.0, %v2123_v4  ;;  %v2124_v48 = vmul.f32 0.3275911, %v4862_v34  ;;  %v2251_v4 = vmul.f32 %v2243_v47, %v2115_v57  ;;  %v2244_v59 = vsub.f32 0.0, %v4862_v34 }
 0x3e3   : > { %2923 = vrcp.f32 %v2131_v1  ;;  %v2132_v50 = vadd.f32 1.0, %v2124_v48  ;;  %v2263_v11 = vmul.f32 1.442695, %v2251_v4 }
 0x3e5   : > { %v2039_v19 = vpop.f32.mrf.mxu1  ;;  %2925 = vrcp.f32 %v2132_v50 }
 0x3e6   : > { %v2052_v46 = vadd.f32 %v2039_v19, %v4802_v53  ;;  %v5471_v53 = vld [vmem:[#allocation31_spill] sm:$0xff] }
 0x3e7   : > { %v2041_v54 = vpop.f32.mrf.mxu1  ;;  %v802_v52 = vadd.f32 %v787_v55, %v5471_v53  ;;  %v2252_v53 = vmul.f32 %v2244_v59, %v4862_v34 }
 0x3e8   : > { %v2081_v14 = vadd.f32 %v2070_v30, %v2052_v46  ;;  %v2053_v12 = vadd.f32 %v2041_v54, %v1460_v2  ;;  %v2255_v46 = vmul.f32 1.442695, %v2247_v20  ;;  %v2248_v2 = vmul.f32 %v2240_v37, %v4849_v22 }
 0x3e9   : > { %v2045_v41 = vpop.f32.mrf.mxu1 }
 0x3ea   : > { %v4875_v5 = vmul.f32 %v2081_v14, %v798_v31  ;;  %v2082_v27 = vadd.f32 %v2074_v56, %v2053_v12  ;;  %v2056_v49 = vadd.f32 %v2045_v41, %v4809_v21 }
 0x3eb   : > { %v2920_v0 = vpop.eup %2919  ;;  %v2047_v8 = vpop.f32.mrf.mxu1 }
 0x3ec   : > { %v2143_v6 = vmul.f32 %v2920_v0, %v2127_v28  ;;  %v4880_v7 = vand.u32 2147483647, %v4875_v5  ;;  %v4882_v17 = vmul.f32 %v2082_v27, %v799_v63  ;;  %v2085_v26 = vadd.f32 %v2070_v30, %v2056_v49 }
 0x3ed   : > { %v2057_v42 = vadd.f32 %v2047_v8, %v4813_v15  ;;  %v2922_v35 = vpop.eup %2921 }
 0x3ee   : > { %v2151_v44 = vsub.f32 2.0, %v2143_v6  ;;  %v2113_v36 = vmul.f32 0.70710677, %v4880_v7  ;;  %v4887_v21 = vand.u32 2147483647, %v4882_v17  ;;  %v4889_v61 = vmul.f32 %v2085_v26, %v802_v52 }
 0x3ef   : > { %v2144_v33 = vmul.f32 %v2922_v35, %v2128_v32  ;;  %v2086_v28 = vadd.f32 %v2074_v56, %v2057_v42 }
 0x3f0   : > { %v2924_v3 = vpop.eup %2923  ;;  %v2121_v58 = vmul.f32 0.3275911, %v2113_v36  ;;  %v2114_v15 = vmul.f32 0.70710677, %v4887_v21  ;;  %v4895_v30 = vand.u32 2147483647, %v4889_v61  ;;  %v4899_v19 = vmul.f32 %v2920_v0, %v2151_v44 }
 0x3f1   : > { %v2152_v48 = vsub.f32 2.0, %v2144_v33  ;;  %v2147_v55 = vmul.f32 %v2924_v3, %v2131_v1  ;;  %v4897_v43 = vmul.f32 %v2086_v28, %v803_v40  ;;  %v2241_v52 = vsub.f32 0.0, %v2113_v36 }
 0x3f2   : > { %v2129_v39 = vadd.f32 1.0, %v2121_v58  ;;  %v2122_v32 = vmul.f32 0.3275911, %v2114_v15  ;;  %v2926_v25 = vpop.eup %2925  ;;  %v4903_v57 = vmul.f32 0.70710677, %v4895_v30  ;;  %v2242_v20 = vsub.f32 0.0, %v2114_v15 }
 0x3f3   : > { %v2155_v56 = vsub.f32 2.0, %v2147_v55  ;;  %v4906_v54 = vand.u32 2147483647, %v4897_v43  ;;  %v2148_v1 = vmul.f32 %v2926_v25, %v2132_v50  ;;  %v4911_v14 = vmul.f32 %v2922_v35, %v2152_v48 }
 0x3f4   : > { %2927 = vrcp.f32 %v2129_v39  ;;  %v4909_v31 = vadd.f32 1.0, %v2122_v32  ;;  %v2125_v22 = vmul.f32 0.3275911, %v4903_v57  ;;  %v2167_v63 = vmul.f32 1.0614054, %v4899_v19 }
 0x3f5   : > { %v4913_v12 = vmul.f32 %v2924_v3, %v2155_v56  ;;  %2929 = vpow2.f32 %v2255_v46  ;;  %v2156_v41 = vsub.f32 2.0, %v2148_v1  ;;  %v4917_v16 = vmul.f32 0.70710677, %v4906_v54 }
 0x3f6   : > { %v2257_v50 = vmul.f32 1.442695, %v2248_v2  ;;  %2931 = vrcp.f32 %v4909_v31  ;;  %v4922_v49 = vadd.f32 1.0, %v2125_v22  ;;  %v2175_v6 = vadd.f32 -1.4531521, %v2167_v63 }
 0x3f7   : > { %v2171_v27 = vmul.f32 1.0614054, %v4913_v12  ;;  %v4924_v0 = vmul.f32 %v2926_v25, %v2156_v41  ;;  %v2126_v47 = vmul.f32 0.3275911, %v4917_v16  ;;  %2933 = vpow2.f32 %v2263_v11 }
 0x3f8   : > { %v2168_v26 = vmul.f32 1.0614054, %v4911_v14  ;;  %2935 = vrcp.f32 %v4922_v49  ;;  %v2183_v44 = vmul.f32 %v2175_v6, %v4899_v19  ;;  %v2265_v33 = vmul.f32 1.442695, %v2252_v53 }
 0x3f9   : > { %v2179_v8 = vadd.f32 -1.4531521, %v2171_v27  ;;  %v4930_v42 = vadd.f32 1.0, %v2126_v47  ;;  %v2172_v34 = vmul.f32 1.0614054, %v4924_v0  ;;  %2937 = vpow2.f32 %v2257_v50 }
 0x3fa   : > { %v2176_v40 = vadd.f32 -1.4531521, %v2168_v26  ;;  %v2249_v37 = vmul.f32 %v2241_v52, %v2113_v36  ;;  %v2191_v3 = vadd.f32 1.4214138, %v2183_v44  ;;  %v2250_v58 = vmul.f32 %v2242_v20, %v2114_v15 }
 0x3fb   : > { %v2187_v35 = vmul.f32 %v2179_v8, %v4913_v12  ;;  %2939 = vrcp.f32 %v4930_v42  ;;  %v2180_v48 = vadd.f32 -1.4531521, %v2172_v34  ;;  %v4941_v32 = vadd.f32 %v4836_v38, %v4833_v23 }
 0x3fc   : > { %v2184_v4 = vmul.f32 %v2176_v40, %v4911_v14  ;;  %v2199_v46 = vmul.f32 %v2191_v3, %v4899_v19  ;;  %2941 = vpow2.f32 %v2265_v33  ;;  %v2259_v2 = vmul.f32 1.442695, %v2249_v37 }
 0x3fd   : > { %v2195_v28 = vadd.f32 1.4214138, %v2187_v35  ;;  %v2245_v36 = vsub.f32 0.0, %v4903_v57  ;;  %v2188_v56 = vmul.f32 %v2180_v48, %v4924_v0  ;;  %v4948_v22 = vadd.f32 %v4843_v62, %v4838_v18 }
 0x3fe   : > { %v2192_v25 = vadd.f32 1.4214138, %v2184_v4  ;;  %v2207_v11 = vadd.f32 -0.28449672, %v2199_v46  ;;  %v2283_v23 = vadd.f32 %v4852_v29, %v4846_v10  ;;  %v2261_v63 = vmul.f32 1.442695, %v2250_v58 }
 0x3ff   : > { %v2203_v55 = vmul.f32 %v2195_v28, %v4913_v12  ;;  %v2196_v50 = vadd.f32 1.4214138, %v2188_v56  ;;  %v4956_v8 = vadd.f32 %v4859_v60, %v4854_v51  ;;  %2943 = vpow2.f32 %v2259_v2 }
 0x400   : > { %v2200_v15 = vmul.f32 %v2192_v25, %v4911_v14  ;;  %v2215_v52 = vmul.f32 %v2207_v11, %v4899_v19  ;;  %v2253_v18 = vmul.f32 %v2245_v36, %v4903_v57  ;;  %2945 = vpow2.f32 %v2261_v63 }
 0x401   : > { %v2928_v1 = vpop.eup %2927  ;;  %v2211_v59 = vadd.f32 -0.28449672, %v2203_v55  ;;  %v2204_v10 = vmul.f32 %v2196_v50, %v4924_v0  ;;  %v2246_v51 = vsub.f32 0.0, %v4917_v16 }
 0x402   : > { %v2145_v41 = vmul.f32 %v2928_v1, %v2129_v39  ;;  %v2930_v27 = vpop.eup %2929  ;;  %v2208_v47 = vadd.f32 -0.28449672, %v2200_v15  ;;  %v2223_v35 = vadd.f32 0.2548296, %v2215_v52 }
 0x403   : > { %v2219_v53 = vmul.f32 %v2211_v59, %v4913_v12  ;;  %v2932_v6 = vpop.eup %2931  ;;  %v2212_v33 = vadd.f32 -0.28449672, %v2204_v10  ;;  %v2254_v59 = vmul.f32 %v2246_v51, %v4917_v16 }
 0x404   : > { %v2153_v26 = vsub.f32 2.0, %v2145_v41  ;;  %v2146_v20 = vmul.f32 %v2932_v6, %v4909_v31  ;;  %v2216_v44 = vmul.f32 %v2208_v47, %v4911_v14  ;;  %v2934_v40 = vpop.eup %2933  ;;  %v2231_v57 = vmul.f32 %v2223_v35, %v4899_v19 }
 0x405   : > { %v2227_v39 = vadd.f32 0.2548296, %v2219_v53  ;;  %v2936_v37 = vpop.eup %2935  ;;  %v2267_v31 = vmul.f32 1.442695, %v2253_v18  ;;  %v2220_v48 = vmul.f32 %v2212_v33, %v4924_v0 }
 0x406   : > { %v4962_v34 = vmul.f32 %v2928_v1, %v2153_v26  ;;  %v2154_v3 = vsub.f32 2.0, %v2146_v20  ;;  %v2224_v4 = vadd.f32 0.2548296, %v2216_v44  ;;  %v2149_v58 = vmul.f32 %v2936_v37, %v4922_v49  ;;  %v2938_v46 = vpop.eup %2937 }
 0x407   : > { %v2235_v28 = vmul.f32 %v2227_v39, %v4913_v12  ;;  %v2271_v36 = vmul.f32 %v2930_v27, %v2231_v57  ;;  %v2228_v19 = vadd.f32 0.2548296, %v2220_v48  ;;  %2947 = vpow2.f32 %v2267_v31 }
 0x408   : > { %v2169_v55 = vmul.f32 1.0614054, %v4962_v34  ;;  %v4970_v2 = vmul.f32 %v2932_v6, %v2154_v3  ;;  %v2232_v56 = vmul.f32 %v2224_v4, %v4911_v14  ;;  %v2940_v1 = vpop.eup %2939  ;;  %v2157_v12 = vsub.f32 2.0, %v2149_v58 }
 0x409   : > { %v2275_v25 = vmul.f32 %v2934_v40, %v2235_v28  ;;  %v2150_v15 = vmul.f32 %v2940_v1, %v4930_v42  ;;  %v2287_v41 = vmul.f32 %v2271_v36, %v4836_v38  ;;  %v2236_v53 = vmul.f32 %v2228_v19, %v4924_v0  ;;  %v2942_v52 = vpop.eup %2941 }
 0x40a   : > { %v2177_v11 = vadd.f32 -1.4531521, %v2169_v55  ;;  %v2272_v63 = vmul.f32 %v2938_v46, %v2232_v56  ;;  %v2165_v50 = vmul.f32 %v2936_v37, %v2157_v12  ;;  %v2170_v14 = vmul.f32 1.0614054, %v4970_v2 }
 0x40b   : > { %v2291_v49 = vmul.f32 %v2275_v25, %v4852_v29  ;;  %v2158_v6 = vsub.f32 2.0, %v2150_v15  ;;  %v2295_v16 = vsub.f32 %v4941_v32, %v2287_v41  ;;  %v2276_v29 = vmul.f32 %v2942_v52, %v2236_v53 }
 0x40c   : > { %v2185_v27 = vmul.f32 %v2177_v11, %v4962_v34  ;;  %v2288_v26 = vmul.f32 %v2272_v63, %v4843_v62  ;;  %v2173_v42 = vmul.f32 1.0614054, %v2165_v50  ;;  %v2178_v10 = vadd.f32 -1.4531521, %v2170_v14  ;;  %v2944_v51 = vpop.eup %2943 }
 0x40d   : > { %v2299_v47 = vsub.f32 %v2283_v23, %v2291_v49  ;;  %v2166_v39 = vmul.f32 %v2940_v1, %v2158_v6  ;;  %v2303_v20 = vmul.f32 0.5, %v2295_v16  ;;  %v2292_v35 = vmul.f32 %v2276_v29, %v4859_v60 }
 0x40e   : > { %v2193_v18 = vadd.f32 1.4214138, %v2185_v27  ;;  %v2296_v0 = vsub.f32 %v4948_v22, %v2288_v26  ;;  %v2181_v40 = vadd.f32 -1.4531521, %v2173_v42  ;;  %v2186_v23 = vmul.f32 %v2178_v10, %v4970_v2  ;;  %v2946_v22 = vpop.eup %2945 }
 0x40f   : > { %v2307_v38 = vmul.f32 0.5, %v2299_v47  ;;  %v2269_v32 = vmul.f32 1.442695, %v2254_v59  ;;  %2783 = vmatprep.mubr.f32.mxu0 %v2303_v20  ;;  %v2174_v33 = vmul.f32 1.0614054, %v2166_v39  ;;  %v2300_v37 = vsub.f32 %v4956_v8, %v2292_v35 }
 0x410   : > { %v2201_v44 = vmul.f32 %v2193_v18, %v4962_v34  ;;  %v2304_v62 = vmul.f32 0.5, %v2296_v0  ;;  %v2189_v3 = vmul.f32 %v2181_v40, %v2165_v50  ;;  %v2194_v57 = vadd.f32 1.4214138, %v2186_v23  ;;  %v2449_v23 = vld [vmem:[%s3413_s19 + $0x20] sm:$0xff] }
 0x411   : > { %2784 = vmatmul.mubr.f32.vlgmr.msra.gmra.mxu0 %v2307_v38  ;;  %v2182_v60 = vadd.f32 -1.4531521, %v2174_v33  ;;  %v2308_v4 = vmul.f32 0.5, %v2300_v37  ;;  %2949 = vpow2.f32 %v2269_v32  ;;  %v2281_v41 = vadd.f32 %v4880_v7, %v4875_v5 }
 0x412   : > { %v2209_v28 = vadd.f32 -0.28449672, %v2201_v44  ;;  %2786 = vmatprep.mubr.f32.mxu0 %v2304_v62  ;;  %v2197_v48 = vadd.f32 1.4214138, %v2189_v3  ;;  %v2202_v55 = vmul.f32 %v2194_v57, %v4970_v2  ;;  %v2282_v42 = vadd.f32 %v4887_v21, %v4882_v17 }
 0x413   : > { %v2190_v31 = vmul.f32 %v2182_v60, %v2166_v39  ;;  %v2286_v0 = vadd.f32 %v4906_v54, %v4897_v43 }
 0x414   : > { %v2217_v58 = vmul.f32 %v2209_v28, %v4962_v34  ;;  %v2205_v25 = vmul.f32 %v2197_v48, %v2165_v50  ;;  %v2210_v36 = vadd.f32 -0.28449672, %v2202_v55  ;;  %v2948_v52 = vpop.eup %2947  ;;  %v2450_v28 = vld [vmem:[%s3413_s19 + $0x28] sm:$0xff]  ;;  %v2451_v55 = vld [vmem:[%s3413_s19 + $0x30] sm:$0xff] }
 0x415   : > { %2787 = vmatmul.mubr.f32.gmra.mxu0 %v2308_v4  ;;  %v2198_v56 = vadd.f32 1.4214138, %v2190_v31 }
 0x416   : > { %v2225_v46 = vadd.f32 0.2548296, %v2217_v58  ;;  %v2213_v1 = vadd.f32 -0.28449672, %v2205_v25  ;;  %v2218_v12 = vmul.f32 %v2210_v36, %v4970_v2  ;;  %v2447_v36 = vld [vmem:[%s3413_s19 + $0x10] sm:$0xff] }
 0x417   : > { %v2206_v59 = vmul.f32 %v2198_v56, %v2166_v39 }
 0x418   : > { %v2233_v8 = vmul.f32 %v2225_v46, %v4962_v34  ;;  %v2221_v11 = vmul.f32 %v2213_v1, %v2165_v50  ;;  %v2226_v49 = vadd.f32 0.2548296, %v2218_v12  ;;  %v2452_v12 = vld [vmem:[%s3413_s19 + $0x38] sm:$0xff] }
 0x419   : > { %v2214_v15 = vadd.f32 -0.28449672, %v2206_v59 }
 0x41a   : > { %v2273_v19 = vmul.f32 %v2944_v51, %v2233_v8  ;;  %v2229_v53 = vadd.f32 0.2548296, %v2221_v11  ;;  %v2234_v27 = vmul.f32 %v2226_v49, %v4970_v2  ;;  %v2448_v11 = vld [vmem:[%s3413_s19 + $0x18] sm:$0xff] }
 0x41b   : > { %v2222_v14 = vmul.f32 %v2214_v15, %v2166_v39 }
 0x41c   : > { %v2289_v63 = vmul.f32 %v2273_v19, %v4880_v7  ;;  %v2237_v34 = vmul.f32 %v2229_v53, %v2165_v50  ;;  %v2274_v6 = vmul.f32 %v2946_v22, %v2234_v27  ;;  %v2285_v7 = vadd.f32 %v4895_v30, %v4889_v61 }
 0x41d   : > { %v2230_v16 = vadd.f32 0.2548296, %v2222_v14 }
 0x41e   : > { %v2297_v47 = vsub.f32 %v2281_v41, %v2289_v63  ;;  %v2277_v29 = vmul.f32 %v2948_v52, %v2237_v34  ;;  %v2290_v18 = vmul.f32 %v2274_v6, %v4887_v21  ;;  %v2950_v5 = vpop.eup %2949 }
 0x41f   : > { %v2238_v10 = vmul.f32 %v2230_v16, %v2166_v39 }
 0x420   : > { %v2305_v26 = vmul.f32 0.5, %v2297_v47  ;;  %v2293_v2 = vmul.f32 %v2277_v29, %v4895_v30  ;;  %v2298_v38 = vsub.f32 %v2282_v42, %v2290_v18  ;;  %v415_v30 = vld [vmem:[#allocation10 + $0x3] ss:$4 sm:$0xf] }
 0x421   : > { %v2278_v50 = vmul.f32 %v2950_v5, %v2238_v10  ;;  %v2420_v39 = vrot.slane %v415_v30, %v5461_v45  ;;  %v2424_v43 = vrot.slane %v415_v30, %v5463_v24  ;;  %v2446_v24 = vld [vmem:[%s3413_s19 + $0x8] sm:$0xff]  ;;  %v2428_v58 = vrot.slane %v415_v30, %v5453_v13 }
 0x422   : > { %2789 = vmatprep.mubr.f32.mxu0 %v2305_v26  ;;  %v2301_v20 = vsub.f32 %v2285_v7, %v2293_v2  ;;  %v2306_v17 = vmul.f32 0.5, %v2298_v38  ;;  %v2432_v46 = vrot.slane %v415_v30, %v5445_v9 }
 0x423   : > { %v2294_v35 = vmul.f32 %v2278_v50, %v4906_v54  ;;  %v2445_v54 = vld [vmem:[%s3413_s19] sm:$0xff] }
 0x424   : > { %v2309_v44 = vmul.f32 0.5, %v2301_v20 }
 0x425   : > { %v2302_v21 = vsub.f32 %v2286_v0, %v2294_v35 }
 0x426   : > { %2790 = vmatmul.mubr.f32.gmra.mxu0 %v2309_v44 }
 0x427   : > { %2792 = vmatprep.mubr.f32.mxu0 %v2306_v17  ;;  %v2310_v61 = vmul.f32 0.5, %v2302_v21 }
 0x42a   : > { %2793 = vmatmul.mubr.f32.gmra.mxu0 %v2310_v61 }
 0x4d1   : > { %v2785_v40 = vpop.f32.mrf.mxu0 }
 0x4d2   : > { %v2441_v51 = vadd.f32 %v2785_v40, %v2420_v39 }
 0x4d3   : > { %v2377_v32 = vpop.f32.mrf.mxu0 }
 0x4d4   : > { %v2457_v62 = vadd.f32 %v2449_v23, %v2441_v51  ;;  %v2437_v33 = vadd.f32 %v2420_v39, %v2377_v32 }
 0x4d5   : > { %v2788_v37 = vpop.f32.mrf.mxu0 }
 0x4d6   : > { %2465 = vst [vmem:[%s5011_s13 + $0x20] sm:$0xff] %v2457_v62  ;;  %v2453_v45 = vadd.f32 %v2445_v54, %v2437_v33  ;;  %v2442_v3 = vadd.f32 %v2788_v37, %v2424_v43 }
 0x4d7   : > { %v2387_v57 = vpop.f32.mrf.mxu0 }
 0x4d8   : > { %2461 = vst [vmem:[%s5011_s13] sm:$0xff] %v2453_v45  ;;  %v2458_v22 = vadd.f32 %v2450_v28, %v2442_v3  ;;  %v2438_v60 = vadd.f32 %v2424_v43, %v2387_v57 }
 0x4da   : > { %2466 = vst [vmem:[%s5011_s13 + $0x28] sm:$0xff] %v2458_v22  ;;  %v2454_v4 = vadd.f32 %v2446_v24, %v2438_v60 }
 0x4dc   : > { %2462 = vst [vmem:[%s5011_s13 + $0x8] sm:$0xff] %v2454_v4 }
 0x4e6   : > { %v2791_v48 = vpop.f32.mrf.mxu0 }
 0x4e7   : > { %v2443_v31 = vadd.f32 %v2791_v48, %v2428_v58 }
 0x4e8   : > { %v2397_v25 = vpop.f32.mrf.mxu0 }
 0x4e9   : > { %v2459_v56 = vadd.f32 %v2451_v55, %v2443_v31  ;;  %v2439_v8 = vadd.f32 %v2428_v58, %v2397_v25 }
 0x4ea   : > { %v2794_v1 = vpop.f32.mrf.mxu0 }
 0x4eb   : > { %2467 = vst [vmem:[%s5011_s13 + $0x30] sm:$0xff] %v2459_v56  ;;  %v2455_v13 = vadd.f32 %v2447_v36, %v2439_v8  ;;  %v2444_v59 = vadd.f32 %v2794_v1, %v2432_v46 }
 0x4ec   : > { %v2407_v19 = vpop.f32.mrf.mxu0 }
 0x4ed   : > { %2463 = vst [vmem:[%s5011_s13 + $0x10] sm:$0xff] %v2455_v13  ;;  %v2460_v49 = vadd.f32 %v2452_v12, %v2444_v59  ;;  %v2440_v9 = vadd.f32 %v2432_v46, %v2407_v19 }
 0x4ef   : > { %2468 = vst [vmem:[%s5011_s13 + $0x38] sm:$0xff] %v2460_v49  ;;  %v2456_v15 = vadd.f32 %v2448_v11, %v2440_v9 }
 0x4f1   : > { %2464 = vst [vmem:[%s5011_s13 + $0x18] sm:$0xff] %v2456_v15 }
 0x4f2   : > { %3122 = shalt.err (!%p3119_p3)
}
 0x4f3   : > { %s3123_s19 = scalar_lea.hbm %s5034_s15, 1024  ;;  %s3127_s13 = scalar_lea.hbm %s5085_s6, 2048 }
 0x4f4   : > { %p3124_p4 = scmp.ne.s32.totalorder %s5034_s15, %s3123_s19  ;;  %p3128_p2 = scmp.lt.s32.totalorder %s5034_s15, %s5085_s6 }
 0x4f5   : > { %p3129_p7 = scmp.lt.s32.totalorder %s3127_s13, %s3123_s19 }
 0x4f6   : > { %p3125_p12 = pnand %p3124_p4, %p5472_p11 }
 0x4f7   : > { %p3130_p9 = por %p3129_p7, %p3128_p2 }
 0x4f8   : > { %p3126_p6 = pneg %p3125_p12 }
 0x4fa   : > { %p3131_p10 = pnand %p3130_p9, %p3126_p6 }
 0x4fc   : > { %3134 = shalt.err (!%p3131_p10)
}
 0x4fd   : > { %s3204_s8 = smov 512  }
 0x4fe   : > { %2817 = dma.vmem_to_hbm [thread:$0]  (%p5472_p11), %s5028_s25, 1024, %s5034_s15, %s2470_s26, %s3204_s8, %s3204_s8, %s3201_s29  }
 0x4ff PF: > { %s2499_s9 = sand.u32 1, %s3173_s21   ;;  %p5473_p0 = scmp.ne.s32.totalorder %s5180_s11, 0 }
 0x500   : > { %p5474_p13 = scmp.ge.s32.totalorder %s3185_s24, 2  ;;  %s2500_s27 = scalar_lea.sflag [#allocation6], %s2499_s9 }
 0x502   : > { %p2840_p5 = pnand %p5474_p13, %p5473_p0 }
 0x504   : > { %p2841_p8 = pneg %p2840_p5 }
 0x506   : > { %3168 = dma.done.wait (%p2841_p8), %s2500_s27, 1024  }
 0x507   : > { %3170 = vsyncadd (%p2841_p8), %s2500_s27, 4294966272  ;;  %p22_p1 = scmp.ge.s32.totalorder %s3338_s20, 4   ;;  %s5475_s21 = smov %s3177_s22 }
 0x508   : > { %s5476_s22 = smov %s3181_s23  ;;  %s5477_s23 = smov %s3350_s7 }
 0x509   : > { %s5478_s24 = smov %s3338_s20  ;;  %24 = sbr.rel (!%p22_p1) target bundleno = 8 (0x8), region = 137 }
 0x50e   :  { %2505 = vsyncpa [#allocation5], 1 }
 0x50f   :  { %2507 = vsyncpa [#allocation5 + $0x1], 1 }
 0x510   :  { %2508 = vsyncpa [#allocation8], 1 }
 0x511   :  { %2509 = vsyncpa [#allocation11], 1 }
 0x512   :  { %2510 = vsyncpa [#allocation14], 1 }
 0x513   :  { %2511 = vsyncpa [#allocation6], 1 }
 0x514   :  { %2513 = vsyncpa [#allocation6 + $0x1], 1 }

</bundles_post_ra>
